<compile_context>
chip_gen: v7x
topology: tpu7x:2x2x1
jax: 0.10.0
libtpu: 0.0.40
codegen_flags: <defaults>
</compile_context>

<pallas_src>
import math

import jax
import jax.numpy as jnp
from jax.experimental import pallas as pl
from jax.experimental.pallas import tpu as pltpu

# ---- module hyper-parameters (small test shapes consistent with the spec) ----
B = 2            # batch
T = 8            # num_steps (sequence length)
E = 20           # input_size / d_model (divisible by nhead=10)
FF = 32          # hidden_size -> dim_feedforward
L = 3            # num_layers
NH = 10          # nhead
HD = E // NH     # head dim
EPS = 1e-5       # LayerNorm eps (PyTorch default)
STD = 0.1
QKV_STRIDE = 128  # lane-aligned packing stride for the fused QKV output


def _layer_norm(x, w, b):
    mu = jnp.mean(x, axis=-1, keepdims=True)
    xc = x - mu
    var = jnp.mean(xc * xc, axis=-1, keepdims=True)
    return xc * jax.lax.rsqrt(var + EPS) * w + b


# ------------------------------ Pallas kernel ------------------------------- #

def transformer_kernel(
    x_ref,                                    # (1, T, E)   one sequence
    wqkv_ref, bqkv_ref,                       # (L, E, 3*128) / (L, 1, 3*128)
    woa_ref, boa_ref,                         # attn out-proj (L,E,E)/(L,1,E)
    ln1w_ref, ln1b_ref, ln2w_ref, ln2b_ref,   # (L, 1, E)
    w1_ref, b1_ref, w2_ref, b2_ref,           # FFN (L,E,FF)/(L,1,FF)/(L,FF,E)/(L,1,E)
    wh_ref, bh_ref,                           # hidden Linear(E,E): (E,E)/(1,E)
    wot_ref, bout_ref,                        # final Linear(T*E,1): (T,E)/(1,1)
    hmask_ref, hsum_ref,                      # (NH*T, E) / (T, NH*T)
    out_ref,                                  # (1, 1, 1)
):
    f32 = jnp.float32
    x = x_ref[0]                 # (T, E) activations for this sequence
    m = hmask_ref[...]           # head-stacked lane mask (NH*T, E)
    hsum = hsum_ref[...]         # head-sum selection matrix (T, NH*T)

    for l in range(L):           # static layer loop, everything VMEM-resident
        # Fused QKV projection (single matmul). q occupies lanes [0,E),
        # k lanes [128,128+E), v lanes [256,256+E) -> vreg-aligned slices.
        qkv = jnp.dot(x, wqkv_ref[l], preferred_element_type=f32) + bqkv_ref[l]
        q = qkv[:, 0:E]                              # pre-scaled by 1/sqrt(HD)
        k = qkv[:, QKV_STRIDE:QKV_STRIDE + E]
        v = qkv[:, 2 * QKV_STRIDE:2 * QKV_STRIDE + E]

        # Head-stacked attention: no per-head loop.
        #   row (h*T + i) of qs is query i masked to head-h lanes, so one
        #   contraction over the full lane dim gives every head's score matrix.
        qs = jnp.concatenate([q] * NH, axis=0) * m                   # (NH*T, E)
        s = jax.lax.dot_general(qs, k, (((1,), (1,)), ((), ())),
                                preferred_element_type=f32)          # (NH*T, T)
        s = s - jnp.max(s, axis=-1, keepdims=True)
        p = jnp.exp(s)
        p = p * pl.reciprocal(jnp.sum(p, axis=-1, keepdims=True), approx=True)
        # P @ V masked per head, then the head-sum matmul reassembles concat(heads).
        o = jnp.dot(p, v, preferred_element_type=f32) * m            # (NH*T, E)
        acc = jnp.dot(hsum, o, preferred_element_type=f32)           # (T, E)

        attn = jnp.dot(acc, woa_ref[l], preferred_element_type=f32) + boa_ref[l]
        x = _layer_norm(x + attn, ln1w_ref[l], ln1b_ref[l])

        ff = jnp.maximum(
            jnp.dot(x, w1_ref[l], preferred_element_type=f32) + b1_ref[l], 0.0)
        ff = jnp.dot(ff, w2_ref[l], preferred_element_type=f32) + b2_ref[l]
        x = _layer_norm(x + ff, ln2w_ref[l], ln2b_ref[l])

    # hidden Linear(E,E) + ReLU applied to all timesteps at once.
    h = jnp.maximum(
        jnp.dot(x, wh_ref[...], preferred_element_type=f32) + bh_ref[...], 0.0)

    # out Linear(T*E, 1): out = sum_{t,e} h[t,e] * W_out[t,e] + b_out.
    out_ref[0] = jnp.sum(h * wot_ref[...], keepdims=True) + bout_ref[...]


# -------------------------------- wrapper ----------------------------------- #

def transformer_forward(x, params):
    """x: (B, T, E) batch_first like the PyTorch module. Returns (B, 1)."""
    Bn, Tn, En = x.shape
    assert (Tn, En) == (T, E)

    order = ["wqkv", "bqkv", "woa_T", "boa", "ln1_w", "ln1_b", "ln2_w", "ln2_b",
             "w1_T", "b1", "w2_T", "b2", "wh_T", "bh", "wo_2d", "b_out",
             "hmask", "hsum"]
    weight_args = [params[k] for k in order]

    def const_spec(shape):
        # Whole-array block, constant index map -> loaded once, stays VMEM-resident.
        return pl.BlockSpec(shape, lambda b: (0,) * len(shape),
                            memory_space=pltpu.MemorySpace.VMEM)

    in_specs = [pl.BlockSpec((1, T, E), lambda b: (b, 0, 0),
                             memory_space=pltpu.MemorySpace.VMEM)]
    in_specs += [const_spec(w.shape) for w in weight_args]

    out = pl.pallas_call(
        transformer_kernel,
        out_shape=jax.ShapeDtypeStruct((Bn, 1, 1), jnp.float32),
        grid_spec=pltpu.PrefetchScalarGridSpec(
            num_scalar_prefetch=0,
            grid=(Bn,),
            in_specs=in_specs,
            out_specs=pl.BlockSpec((1, 1, 1), lambda b: (b, 0, 0),
                                   memory_space=pltpu.MemorySpace.VMEM),
        ),
        compiler_params=pltpu.CompilerParams(
            dimension_semantics=("parallel",)),
    )(x.astype(jnp.float32), *weight_args)
    return out.reshape(Bn, 1)


# ---------------------------- pure-JAX reference ----------------------------- #

def reference(x, per_layer, wh, bh, w_out, b_out):
    h = x.astype(jnp.float32)
    for p in per_layer:
        q = h @ p["wq"].T + p["bq"]
        k = h @ p["wk"].T + p["bk"]
        v = h @ p["wv"].T + p["bv"]

        def split(z):
            return z.reshape(B, T, NH, HD).transpose(0, 2, 1, 3)

        qh, kh, vh = split(q), split(k), split(v)
        s = jnp.einsum("bhtd,bhsd->bhts", qh, kh) / math.sqrt(HD)
        a = jax.nn.softmax(s, axis=-1)
        o = jnp.einsum("bhts,bhsd->bhtd", a, vh)
        o = o.transpose(0, 2, 1, 3).reshape(B, T, E)
        o = o @ p["wo"].T + p["bo"]
        h = _layer_norm(h + o, p["g1"], p["be1"])
        ff = jax.nn.relu(h @ p["w1"].T + p["b1"]) @ p["w2"].T + p["b2"]
        h = _layer_norm(h + ff, p["g2"], p["be2"])
    hid = jax.nn.relu(h @ wh.T + bh)                 # (B, T, E)
    flat = hid.reshape(B, T * E)
    return flat @ w_out.T + b_out


# ---------------------------------- main ------------------------------------ #

if __name__ == "__main__":
    key = jax.random.PRNGKey(0)

    # Parameters mirror the module's __init__: every weight ~ N(0, std^2)
    # (including the LayerNorm gammas, per the init loop), every bias = 0.
    per_layer = []
    for _ in range(L):
        key, k1, k2, k3, k4, k5, k6 = jax.random.split(key, 7)
        in_proj_w = STD * jax.random.normal(k1, (3 * E, E), jnp.float32)
        out_proj_w = STD * jax.random.normal(k2, (E, E), jnp.float32)
        lin1_w = STD * jax.random.normal(k3, (FF, E), jnp.float32)
        lin2_w = STD * jax.random.normal(k4, (E, FF), jnp.float32)
        norm1_w = STD * jax.random.normal(k5, (E,), jnp.float32)
        norm2_w = STD * jax.random.normal(k6, (E,), jnp.float32)
        per_layer.append(dict(
            wq=in_proj_w[0:E], wk=in_proj_w[E:2 * E], wv=in_proj_w[2 * E:3 * E],
            bq=jnp.zeros((E,), jnp.float32), bk=jnp.zeros((E,), jnp.float32),
            bv=jnp.zeros((E,), jnp.float32),
            wo=out_proj_w, bo=jnp.zeros((E,), jnp.float32),
            w1=lin1_w, b1=jnp.zeros((FF,), jnp.float32),
            w2=lin2_w, b2=jnp.zeros((E,), jnp.float32),
            g1=norm1_w, be1=jnp.zeros((E,), jnp.float32),
            g2=norm2_w, be2=jnp.zeros((E,), jnp.float32),
        ))
    key, kh, ko, kx = jax.random.split(key, 4)
    wh = STD * jax.random.normal(kh, (E, E), jnp.float32)
    bh = jnp.zeros((E,), jnp.float32)
    w_out = STD * jax.random.normal(ko, (1, T * E), jnp.float32)
    b_out = jnp.zeros((1,), jnp.float32)

    x = jax.random.normal(kx, (B, T, E), jnp.float32)

    def stack(f):
        return jnp.stack([f(p) for p in per_layer], axis=0)

    # Fused QKV weight/bias, lane-aligned at 0 / 128 / 256; the 1/sqrt(HD)
    # attention scale is folded into BOTH the q weight block and the q bias.
    scale = 1.0 / math.sqrt(HD)
    wqkv = jnp.zeros((L, E, 3 * QKV_STRIDE), jnp.float32)
    wqkv = wqkv.at[:, :, 0:E].set(stack(lambda p: p["wq"].T) * scale)
    wqkv = wqkv.at[:, :, QKV_STRIDE:QKV_STRIDE + E].set(stack(lambda p: p["wk"].T))
    wqkv = wqkv.at[:, :, 2 * QKV_STRIDE:2 * QKV_STRIDE + E].set(
        stack(lambda p: p["wv"].T))
    bqkv = jnp.zeros((L, 1, 3 * QKV_STRIDE), jnp.float32)
    bqkv = bqkv.at[:, :, 0:E].set(stack(lambda p: p["bq"].reshape(1, E)) * scale)
    bqkv = bqkv.at[:, :, QKV_STRIDE:QKV_STRIDE + E].set(
        stack(lambda p: p["bk"].reshape(1, E)))
    bqkv = bqkv.at[:, :, 2 * QKV_STRIDE:2 * QKV_STRIDE + E].set(
        stack(lambda p: p["bv"].reshape(1, E)))

    # Head-stacked lane mask (NH*T, E) and head-sum selection matrix (T, NH*T).
    head_id = jnp.arange(NH * T, dtype=jnp.int32) // T
    lane = jnp.arange(E, dtype=jnp.int32)
    hmask = ((lane[None, :] >= head_id[:, None] * HD)
             & (lane[None, :] < (head_id[:, None] + 1) * HD)).astype(jnp.float32)
    hsum = jnp.tile(jnp.eye(T, dtype=jnp.float32), (1, NH))          # (T, NH*T)

    params = dict(
        wqkv=wqkv, bqkv=bqkv,
        woa_T=stack(lambda p: p["wo"].T),
        boa=stack(lambda p: p["bo"].reshape(1, E)),
        ln1_w=stack(lambda p: p["g1"].reshape(1, E)),
        ln1_b=stack(lambda p: p["be1"].reshape(1, E)),
        ln2_w=stack(lambda p: p["g2"].reshape(1, E)),
        ln2_b=stack(lambda p: p["be2"].reshape(1, E)),
        w1_T=stack(lambda p: p["w1"].T), b1=stack(lambda p: p["b1"].reshape(1, FF)),
        w2_T=stack(lambda p: p["w2"].T), b2=stack(lambda p: p["b2"].reshape(1, E)),
        wh_T=wh.T, bh=bh.reshape(1, E),
        wo_2d=w_out.reshape(T, E),            # row-major (t, e) flatten order
        b_out=b_out.reshape(1, 1),
        hmask=hmask, hsum=hsum,
    )

    out = transformer_forward(x, params)
    out = jax.block_until_ready(out)

    ref = reference(x, per_layer, wh, bh, w_out, b_out)

    assert out.ndim == 2 and out.shape == (B, 1)
    # approx reciprocal in the softmax denominator adds ~2^-12 relative error.
    assert jnp.allclose(out, ref, rtol=1e-3, atol=2e-4), (out, ref)
    print("KERNEL_OK")
</pallas_src>

<mosaic_0001>
module attributes {stable_mosaic.version = 11 : i64} {
  func.func @transformer_kernel(%arg0: i32, %arg1: memref<1x8x20xf32, #tpu.memory_space<vmem>>, %arg2: memref<3x20x384xf32, #tpu.memory_space<vmem>>, %arg3: memref<3x1x384xf32, #tpu.memory_space<vmem>>, %arg4: memref<3x20x20xf32, #tpu.memory_space<vmem>>, %arg5: memref<3x1x20xf32, #tpu.memory_space<vmem>>, %arg6: memref<3x1x20xf32, #tpu.memory_space<vmem>>, %arg7: memref<3x1x20xf32, #tpu.memory_space<vmem>>, %arg8: memref<3x1x20xf32, #tpu.memory_space<vmem>>, %arg9: memref<3x1x20xf32, #tpu.memory_space<vmem>>, %arg10: memref<3x20x32xf32, #tpu.memory_space<vmem>>, %arg11: memref<3x1x32xf32, #tpu.memory_space<vmem>>, %arg12: memref<3x32x20xf32, #tpu.memory_space<vmem>>, %arg13: memref<3x1x20xf32, #tpu.memory_space<vmem>>, %arg14: memref<20x20xf32, #tpu.memory_space<vmem>>, %arg15: memref<1x20xf32, #tpu.memory_space<vmem>>, %arg16: memref<8x20xf32, #tpu.memory_space<vmem>>, %arg17: memref<1x1xf32, #tpu.memory_space<vmem>>, %arg18: memref<80x20xf32, #tpu.memory_space<vmem>>, %arg19: memref<8x80xf32, #tpu.memory_space<vmem>>, %arg20: memref<1x1x1xf32, #tpu.memory_space<vmem>>) attributes {dimension_semantics = [#tpu.dimension_semantics<parallel>], iteration_bounds = array<i64: 2>, scalar_prefetch = 0 : i64, scratch_operands = 0 : i64, tpu.core_type = #tpu.core_type<tc>, window_params = [{transform_indices = @transform_0, window_bounds = array<i64: 1, 8, 20>}, {pipeline_mode = #tpu.pipeline_mode<synchronous>, transform_indices = @transform_1, window_bounds = array<i64: 3, 20, 384>}, {pipeline_mode = #tpu.pipeline_mode<synchronous>, transform_indices = @transform_2, window_bounds = array<i64: 3, 1, 384>}, {pipeline_mode = #tpu.pipeline_mode<synchronous>, transform_indices = @transform_3, window_bounds = array<i64: 3, 20, 20>}, {pipeline_mode = #tpu.pipeline_mode<synchronous>, transform_indices = @transform_4, window_bounds = array<i64: 3, 1, 20>}, {pipeline_mode = #tpu.pipeline_mode<synchronous>, transform_indices = @transform_5, window_bounds = array<i64: 3, 1, 20>}, {pipeline_mode = #tpu.pipeline_mode<synchronous>, transform_indices = @transform_6, window_bounds = array<i64: 3, 1, 20>}, {pipeline_mode = #tpu.pipeline_mode<synchronous>, transform_indices = @transform_7, window_bounds = array<i64: 3, 1, 20>}, {pipeline_mode = #tpu.pipeline_mode<synchronous>, transform_indices = @transform_8, window_bounds = array<i64: 3, 1, 20>}, {pipeline_mode = #tpu.pipeline_mode<synchronous>, transform_indices = @transform_9, window_bounds = array<i64: 3, 20, 32>}, {pipeline_mode = #tpu.pipeline_mode<synchronous>, transform_indices = @transform_10, window_bounds = array<i64: 3, 1, 32>}, {pipeline_mode = #tpu.pipeline_mode<synchronous>, transform_indices = @transform_11, window_bounds = array<i64: 3, 32, 20>}, {pipeline_mode = #tpu.pipeline_mode<synchronous>, transform_indices = @transform_12, window_bounds = array<i64: 3, 1, 20>}, {pipeline_mode = #tpu.pipeline_mode<synchronous>, transform_indices = @transform_13, window_bounds = array<i64: 20, 20>}, {pipeline_mode = #tpu.pipeline_mode<synchronous>, transform_indices = @transform_14, window_bounds = array<i64: 1, 20>}, {pipeline_mode = #tpu.pipeline_mode<synchronous>, transform_indices = @transform_15, window_bounds = array<i64: 8, 20>}, {pipeline_mode = #tpu.pipeline_mode<synchronous>, transform_indices = @transform_16, window_bounds = array<i64: 1, 1>}, {pipeline_mode = #tpu.pipeline_mode<synchronous>, transform_indices = @transform_17, window_bounds = array<i64: 80, 20>}, {pipeline_mode = #tpu.pipeline_mode<synchronous>, transform_indices = @transform_18, window_bounds = array<i64: 8, 80>}, {transform_indices = @transform_19, window_bounds = array<i64: 1, 1, 1>}]} {
    %c0 = arith.constant 0 : index
    %c0_0 = arith.constant 0 : index
    %c0_1 = arith.constant 0 : index
    %0 = vector.load %arg1[%c0, %c0_0, %c0_1] : memref<1x8x20xf32, #tpu.memory_space<vmem>>, vector<1x8x20xf32>
    %1 = vector.shape_cast %0 : vector<1x8x20xf32> to vector<8x20xf32>
    %c0_2 = arith.constant 0 : index
    %c0_3 = arith.constant 0 : index
    %2 = vector.load %arg18[%c0_2, %c0_3] : memref<80x20xf32, #tpu.memory_space<vmem>>, vector<80x20xf32>
    %c0_4 = arith.constant 0 : index
    %c0_5 = arith.constant 0 : index
    %3 = vector.load %arg19[%c0_4, %c0_5] : memref<8x80xf32, #tpu.memory_space<vmem>>, vector<8x80xf32>
    %c0_6 = arith.constant 0 : index
    %c0_7 = arith.constant 0 : index
    %c0_8 = arith.constant 0 : index
    %4 = vector.load %arg2[%c0_6, %c0_7, %c0_8] : memref<3x20x384xf32, #tpu.memory_space<vmem>>, vector<1x20x384xf32>
    %5 = vector.shape_cast %4 : vector<1x20x384xf32> to vector<20x384xf32>
    %cst = arith.constant dense<0.000000e+00> : vector<8x384xf32>
    %6 = tpu.matmul %1, %5, %cst {dimension_numbers = #tpu.dot_dimension_numbers<[1], [0], [0], [1], [0, 0, 1, 1], [], []>} : vector<8x20xf32>, vector<20x384xf32>, vector<8x384xf32> -> vector<8x384xf32>
    %c0_9 = arith.constant 0 : index
    %c0_10 = arith.constant 0 : index
    %c0_11 = arith.constant 0 : index
    %7 = vector.load %arg3[%c0_9, %c0_10, %c0_11] : memref<3x1x384xf32, #tpu.memory_space<vmem>>, vector<1x1x384xf32>
    %8 = vector.shape_cast %7 : vector<1x1x384xf32> to vector<1x384xf32>
    %9 = vector.broadcast %8 : vector<1x384xf32> to vector<8x384xf32>
    %10 = arith.addf %6, %9 : vector<8x384xf32>
    %11 = vector.extract_strided_slice %10 {offsets = [0, 0], sizes = [8, 20], strides = [1, 1]} : vector<8x384xf32> to vector<8x20xf32>
    %12 = vector.extract_strided_slice %10 {offsets = [0, 128], sizes = [8, 20], strides = [1, 1]} : vector<8x384xf32> to vector<8x20xf32>
    %13 = vector.extract_strided_slice %10 {offsets = [0, 256], sizes = [8, 20], strides = [1, 1]} : vector<8x384xf32> to vector<8x20xf32>
    %14 = tpu.concatenate %11, %11, %11, %11, %11, %11, %11, %11, %11, %11 in 0 : vector<8x20xf32>, vector<8x20xf32>, vector<8x20xf32>, vector<8x20xf32>, vector<8x20xf32>, vector<8x20xf32>, vector<8x20xf32>, vector<8x20xf32>, vector<8x20xf32>, vector<8x20xf32> -> vector<80x20xf32>
    %15 = arith.mulf %14, %2 : vector<80x20xf32>
    %cst_12 = arith.constant dense<0.000000e+00> : vector<80x8xf32>
    %16 = tpu.matmul %15, %12, %cst_12 {dimension_numbers = #tpu.dot_dimension_numbers<[1], [1], [0], [0], [0, 0, 1, 0], [], []>} : vector<80x20xf32>, vector<8x20xf32>, vector<80x8xf32> -> vector<80x8xf32>
    %cst_13 = arith.constant dense<0xFF800000> : vector<80xf32>
    %17 = vector.multi_reduction <maximumf>, %16, %cst_13 [1] : vector<80x8xf32> to vector<80xf32>
    %18 = vector.shape_cast %17 : vector<80xf32> to vector<80x1xf32>
    %19 = vector.broadcast %18 : vector<80x1xf32> to vector<80x8xf32>
    %20 = arith.subf %16, %19 : vector<80x8xf32>
    %21 = math.exp %20 : vector<80x8xf32>
    %cst_14 = arith.constant dense<0.000000e+00> : vector<80xf32>
    %22 = vector.multi_reduction <add>, %21, %cst_14 [1] : vector<80x8xf32> to vector<80xf32>
    %23 = vector.shape_cast %22 : vector<80xf32> to vector<80x1xf32>
    %24 = tpu.reciprocal %23 {approx = true} : vector<80x1xf32> -> vector<80x1xf32>
    %25 = vector.broadcast %24 : vector<80x1xf32> to vector<80x8xf32>
    %26 = arith.mulf %21, %25 : vector<80x8xf32>
    %cst_15 = arith.constant dense<0.000000e+00> : vector<80x20xf32>
    %27 = tpu.matmul %26, %13, %cst_15 {dimension_numbers = #tpu.dot_dimension_numbers<[1], [0], [0], [1], [0, 0, 1, 1], [], []>} : vector<80x8xf32>, vector<8x20xf32>, vector<80x20xf32> -> vector<80x20xf32>
    %28 = arith.mulf %27, %2 : vector<80x20xf32>
    %cst_16 = arith.constant dense<0.000000e+00> : vector<8x20xf32>
    %29 = tpu.matmul %3, %28, %cst_16 {dimension_numbers = #tpu.dot_dimension_numbers<[1], [0], [0], [1], [0, 0, 1, 1], [], []>} : vector<8x80xf32>, vector<80x20xf32>, vector<8x20xf32> -> vector<8x20xf32>
    %c0_17 = arith.constant 0 : index
    %c0_18 = arith.constant 0 : index
    %c0_19 = arith.constant 0 : index
    %30 = vector.load %arg4[%c0_17, %c0_18, %c0_19] : memref<3x20x20xf32, #tpu.memory_space<vmem>>, vector<1x20x20xf32>
    %31 = vector.shape_cast %30 : vector<1x20x20xf32> to vector<20x20xf32>
    %cst_20 = arith.constant dense<0.000000e+00> : vector<8x20xf32>
    %32 = tpu.matmul %29, %31, %cst_20 {dimension_numbers = #tpu.dot_dimension_numbers<[1], [0], [0], [1], [0, 0, 1, 1], [], []>} : vector<8x20xf32>, vector<20x20xf32>, vector<8x20xf32> -> vector<8x20xf32>
    %c0_21 = arith.constant 0 : index
    %c0_22 = arith.constant 0 : index
    %c0_23 = arith.constant 0 : index
    %33 = vector.load %arg5[%c0_21, %c0_22, %c0_23] : memref<3x1x20xf32, #tpu.memory_space<vmem>>, vector<1x1x20xf32>
    %34 = vector.shape_cast %33 : vector<1x1x20xf32> to vector<1x20xf32>
    %35 = vector.broadcast %34 : vector<1x20xf32> to vector<8x20xf32>
    %36 = arith.addf %32, %35 : vector<8x20xf32>
    %37 = arith.addf %1, %36 : vector<8x20xf32>
    %c0_24 = arith.constant 0 : index
    %c0_25 = arith.constant 0 : index
    %c0_26 = arith.constant 0 : index
    %38 = vector.load %arg6[%c0_24, %c0_25, %c0_26] : memref<3x1x20xf32, #tpu.memory_space<vmem>>, vector<1x1x20xf32>
    %39 = vector.shape_cast %38 : vector<1x1x20xf32> to vector<1x20xf32>
    %c0_27 = arith.constant 0 : index
    %c0_28 = arith.constant 0 : index
    %c0_29 = arith.constant 0 : index
    %40 = vector.load %arg7[%c0_27, %c0_28, %c0_29] : memref<3x1x20xf32, #tpu.memory_space<vmem>>, vector<1x1x20xf32>
    %41 = vector.shape_cast %40 : vector<1x1x20xf32> to vector<1x20xf32>
    %cst_30 = arith.constant dense<0.000000e+00> : vector<8xf32>
    %42 = vector.multi_reduction <add>, %37, %cst_30 [1] : vector<8x20xf32> to vector<8xf32>
    %43 = vector.shape_cast %42 : vector<8xf32> to vector<8x1xf32>
    %cst_31 = arith.constant 2.000000e+01 : f32
    %44 = vector.broadcast %cst_31 : f32 to vector<8x1xf32>
    %45 = arith.divf %43, %44 : vector<8x1xf32>
    %46 = vector.broadcast %45 : vector<8x1xf32> to vector<8x20xf32>
    %47 = arith.subf %37, %46 : vector<8x20xf32>
    %48 = arith.mulf %47, %47 : vector<8x20xf32>
    %cst_32 = arith.constant dense<0.000000e+00> : vector<8xf32>
    %49 = vector.multi_reduction <add>, %48, %cst_32 [1] : vector<8x20xf32> to vector<8xf32>
    %50 = vector.shape_cast %49 : vector<8xf32> to vector<8x1xf32>
    %cst_33 = arith.constant 2.000000e+01 : f32
    %51 = vector.broadcast %cst_33 : f32 to vector<8x1xf32>
    %52 = arith.divf %50, %51 : vector<8x1xf32>
    %cst_34 = arith.constant 9.99999974E-6 : f32
    %53 = vector.broadcast %cst_34 : f32 to vector<8x1xf32>
    %54 = arith.addf %52, %53 : vector<8x1xf32>
    %55 = math.rsqrt %54 : vector<8x1xf32>
    %56 = vector.broadcast %55 : vector<8x1xf32> to vector<8x20xf32>
    %57 = arith.mulf %47, %56 : vector<8x20xf32>
    %58 = vector.broadcast %39 : vector<1x20xf32> to vector<8x20xf32>
    %59 = arith.mulf %57, %58 : vector<8x20xf32>
    %60 = vector.broadcast %41 : vector<1x20xf32> to vector<8x20xf32>
    %61 = arith.addf %59, %60 : vector<8x20xf32>
    %c0_35 = arith.constant 0 : index
    %c0_36 = arith.constant 0 : index
    %c0_37 = arith.constant 0 : index
    %62 = vector.load %arg10[%c0_35, %c0_36, %c0_37] : memref<3x20x32xf32, #tpu.memory_space<vmem>>, vector<1x20x32xf32>
    %63 = vector.shape_cast %62 : vector<1x20x32xf32> to vector<20x32xf32>
    %cst_38 = arith.constant dense<0.000000e+00> : vector<8x32xf32>
    %64 = tpu.matmul %61, %63, %cst_38 {dimension_numbers = #tpu.dot_dimension_numbers<[1], [0], [0], [1], [0, 0, 1, 1], [], []>} : vector<8x20xf32>, vector<20x32xf32>, vector<8x32xf32> -> vector<8x32xf32>
    %c0_39 = arith.constant 0 : index
    %c0_40 = arith.constant 0 : index
    %c0_41 = arith.constant 0 : index
    %65 = vector.load %arg11[%c0_39, %c0_40, %c0_41] : memref<3x1x32xf32, #tpu.memory_space<vmem>>, vector<1x1x32xf32>
    %66 = vector.shape_cast %65 : vector<1x1x32xf32> to vector<1x32xf32>
    %67 = vector.broadcast %66 : vector<1x32xf32> to vector<8x32xf32>
    %68 = arith.addf %64, %67 : vector<8x32xf32>
    %cst_42 = arith.constant 0.000000e+00 : f32
    %69 = vector.broadcast %cst_42 : f32 to vector<8x32xf32>
    %70 = arith.maximumf %68, %69 : vector<8x32xf32>
    %c0_43 = arith.constant 0 : index
    %c0_44 = arith.constant 0 : index
    %c0_45 = arith.constant 0 : index
    %71 = vector.load %arg12[%c0_43, %c0_44, %c0_45] : memref<3x32x20xf32, #tpu.memory_space<vmem>>, vector<1x32x20xf32>
    %72 = vector.shape_cast %71 : vector<1x32x20xf32> to vector<32x20xf32>
    %cst_46 = arith.constant dense<0.000000e+00> : vector<8x20xf32>
    %73 = tpu.matmul %70, %72, %cst_46 {dimension_numbers = #tpu.dot_dimension_numbers<[1], [0], [0], [1], [0, 0, 1, 1], [], []>} : vector<8x32xf32>, vector<32x20xf32>, vector<8x20xf32> -> vector<8x20xf32>
    %c0_47 = arith.constant 0 : index
    %c0_48 = arith.constant 0 : index
    %c0_49 = arith.constant 0 : index
    %74 = vector.load %arg13[%c0_47, %c0_48, %c0_49] : memref<3x1x20xf32, #tpu.memory_space<vmem>>, vector<1x1x20xf32>
    %75 = vector.shape_cast %74 : vector<1x1x20xf32> to vector<1x20xf32>
    %76 = vector.broadcast %75 : vector<1x20xf32> to vector<8x20xf32>
    %77 = arith.addf %73, %76 : vector<8x20xf32>
    %78 = arith.addf %61, %77 : vector<8x20xf32>
    %c0_50 = arith.constant 0 : index
    %c0_51 = arith.constant 0 : index
    %c0_52 = arith.constant 0 : index
    %79 = vector.load %arg8[%c0_50, %c0_51, %c0_52] : memref<3x1x20xf32, #tpu.memory_space<vmem>>, vector<1x1x20xf32>
    %80 = vector.shape_cast %79 : vector<1x1x20xf32> to vector<1x20xf32>
    %c0_53 = arith.constant 0 : index
    %c0_54 = arith.constant 0 : index
    %c0_55 = arith.constant 0 : index
    %81 = vector.load %arg9[%c0_53, %c0_54, %c0_55] : memref<3x1x20xf32, #tpu.memory_space<vmem>>, vector<1x1x20xf32>
    %82 = vector.shape_cast %81 : vector<1x1x20xf32> to vector<1x20xf32>
    %cst_56 = arith.constant dense<0.000000e+00> : vector<8xf32>
    %83 = vector.multi_reduction <add>, %78, %cst_56 [1] : vector<8x20xf32> to vector<8xf32>
    %84 = vector.shape_cast %83 : vector<8xf32> to vector<8x1xf32>
    %cst_57 = arith.constant 2.000000e+01 : f32
    %85 = vector.broadcast %cst_57 : f32 to vector<8x1xf32>
    %86 = arith.divf %84, %85 : vector<8x1xf32>
    %87 = vector.broadcast %86 : vector<8x1xf32> to vector<8x20xf32>
    %88 = arith.subf %78, %87 : vector<8x20xf32>
    %89 = arith.mulf %88, %88 : vector<8x20xf32>
    %cst_58 = arith.constant dense<0.000000e+00> : vector<8xf32>
    %90 = vector.multi_reduction <add>, %89, %cst_58 [1] : vector<8x20xf32> to vector<8xf32>
    %91 = vector.shape_cast %90 : vector<8xf32> to vector<8x1xf32>
    %cst_59 = arith.constant 2.000000e+01 : f32
    %92 = vector.broadcast %cst_59 : f32 to vector<8x1xf32>
    %93 = arith.divf %91, %92 : vector<8x1xf32>
    %cst_60 = arith.constant 9.99999974E-6 : f32
    %94 = vector.broadcast %cst_60 : f32 to vector<8x1xf32>
    %95 = arith.addf %93, %94 : vector<8x1xf32>
    %96 = math.rsqrt %95 : vector<8x1xf32>
    %97 = vector.broadcast %96 : vector<8x1xf32> to vector<8x20xf32>
    %98 = arith.mulf %88, %97 : vector<8x20xf32>
    %99 = vector.broadcast %80 : vector<1x20xf32> to vector<8x20xf32>
    %100 = arith.mulf %98, %99 : vector<8x20xf32>
    %101 = vector.broadcast %82 : vector<1x20xf32> to vector<8x20xf32>
    %102 = arith.addf %100, %101 : vector<8x20xf32>
    %c1 = arith.constant 1 : index
    %c0_61 = arith.constant 0 : index
    %c0_62 = arith.constant 0 : index
    %103 = vector.load %arg2[%c1, %c0_61, %c0_62] : memref<3x20x384xf32, #tpu.memory_space<vmem>>, vector<1x20x384xf32>
    %104 = vector.shape_cast %103 : vector<1x20x384xf32> to vector<20x384xf32>
    %cst_63 = arith.constant dense<0.000000e+00> : vector<8x384xf32>
    %105 = tpu.matmul %102, %104, %cst_63 {dimension_numbers = #tpu.dot_dimension_numbers<[1], [0], [0], [1], [0, 0, 1, 1], [], []>} : vector<8x20xf32>, vector<20x384xf32>, vector<8x384xf32> -> vector<8x384xf32>
    %c1_64 = arith.constant 1 : index
    %c0_65 = arith.constant 0 : index
    %c0_66 = arith.constant 0 : index
    %106 = vector.load %arg3[%c1_64, %c0_65, %c0_66] : memref<3x1x384xf32, #tpu.memory_space<vmem>>, vector<1x1x384xf32>
    %107 = vector.shape_cast %106 : vector<1x1x384xf32> to vector<1x384xf32>
    %108 = vector.broadcast %107 : vector<1x384xf32> to vector<8x384xf32>
    %109 = arith.addf %105, %108 : vector<8x384xf32>
    %110 = vector.extract_strided_slice %109 {offsets = [0, 0], sizes = [8, 20], strides = [1, 1]} : vector<8x384xf32> to vector<8x20xf32>
    %111 = vector.extract_strided_slice %109 {offsets = [0, 128], sizes = [8, 20], strides = [1, 1]} : vector<8x384xf32> to vector<8x20xf32>
    %112 = vector.extract_strided_slice %109 {offsets = [0, 256], sizes = [8, 20], strides = [1, 1]} : vector<8x384xf32> to vector<8x20xf32>
    %113 = tpu.concatenate %110, %110, %110, %110, %110, %110, %110, %110, %110, %110 in 0 : vector<8x20xf32>, vector<8x20xf32>, vector<8x20xf32>, vector<8x20xf32>, vector<8x20xf32>, vector<8x20xf32>, vector<8x20xf32>, vector<8x20xf32>, vector<8x20xf32>, vector<8x20xf32> -> vector<80x20xf32>
    %114 = arith.mulf %113, %2 : vector<80x20xf32>
    %cst_67 = arith.constant dense<0.000000e+00> : vector<80x8xf32>
    %115 = tpu.matmul %114, %111, %cst_67 {dimension_numbers = #tpu.dot_dimension_numbers<[1], [1], [0], [0], [0, 0, 1, 0], [], []>} : vector<80x20xf32>, vector<8x20xf32>, vector<80x8xf32> -> vector<80x8xf32>
    %cst_68 = arith.constant dense<0xFF800000> : vector<80xf32>
    %116 = vector.multi_reduction <maximumf>, %115, %cst_68 [1] : vector<80x8xf32> to vector<80xf32>
    %117 = vector.shape_cast %116 : vector<80xf32> to vector<80x1xf32>
    %118 = vector.broadcast %117 : vector<80x1xf32> to vector<80x8xf32>
    %119 = arith.subf %115, %118 : vector<80x8xf32>
    %120 = math.exp %119 : vector<80x8xf32>
    %cst_69 = arith.constant dense<0.000000e+00> : vector<80xf32>
    %121 = vector.multi_reduction <add>, %120, %cst_69 [1] : vector<80x8xf32> to vector<80xf32>
    %122 = vector.shape_cast %121 : vector<80xf32> to vector<80x1xf32>
    %123 = tpu.reciprocal %122 {approx = true} : vector<80x1xf32> -> vector<80x1xf32>
    %124 = vector.broadcast %123 : vector<80x1xf32> to vector<80x8xf32>
    %125 = arith.mulf %120, %124 : vector<80x8xf32>
    %cst_70 = arith.constant dense<0.000000e+00> : vector<80x20xf32>
    %126 = tpu.matmul %125, %112, %cst_70 {dimension_numbers = #tpu.dot_dimension_numbers<[1], [0], [0], [1], [0, 0, 1, 1], [], []>} : vector<80x8xf32>, vector<8x20xf32>, vector<80x20xf32> -> vector<80x20xf32>
    %127 = arith.mulf %126, %2 : vector<80x20xf32>
    %cst_71 = arith.constant dense<0.000000e+00> : vector<8x20xf32>
    %128 = tpu.matmul %3, %127, %cst_71 {dimension_numbers = #tpu.dot_dimension_numbers<[1], [0], [0], [1], [0, 0, 1, 1], [], []>} : vector<8x80xf32>, vector<80x20xf32>, vector<8x20xf32> -> vector<8x20xf32>
    %c1_72 = arith.constant 1 : index
    %c0_73 = arith.constant 0 : index
    %c0_74 = arith.constant 0 : index
    %129 = vector.load %arg4[%c1_72, %c0_73, %c0_74] : memref<3x20x20xf32, #tpu.memory_space<vmem>>, vector<1x20x20xf32>
    %130 = vector.shape_cast %129 : vector<1x20x20xf32> to vector<20x20xf32>
    %cst_75 = arith.constant dense<0.000000e+00> : vector<8x20xf32>
    %131 = tpu.matmul %128, %130, %cst_75 {dimension_numbers = #tpu.dot_dimension_numbers<[1], [0], [0], [1], [0, 0, 1, 1], [], []>} : vector<8x20xf32>, vector<20x20xf32>, vector<8x20xf32> -> vector<8x20xf32>
    %c1_76 = arith.constant 1 : index
    %c0_77 = arith.constant 0 : index
    %c0_78 = arith.constant 0 : index
    %132 = vector.load %arg5[%c1_76, %c0_77, %c0_78] : memref<3x1x20xf32, #tpu.memory_space<vmem>>, vector<1x1x20xf32>
    %133 = vector.shape_cast %132 : vector<1x1x20xf32> to vector<1x20xf32>
    %134 = vector.broadcast %133 : vector<1x20xf32> to vector<8x20xf32>
    %135 = arith.addf %131, %134 : vector<8x20xf32>
    %136 = arith.addf %102, %135 : vector<8x20xf32>
    %c1_79 = arith.constant 1 : index
    %c0_80 = arith.constant 0 : index
    %c0_81 = arith.constant 0 : index
    %137 = vector.load %arg6[%c1_79, %c0_80, %c0_81] : memref<3x1x20xf32, #tpu.memory_space<vmem>>, vector<1x1x20xf32>
    %138 = vector.shape_cast %137 : vector<1x1x20xf32> to vector<1x20xf32>
    %c1_82 = arith.constant 1 : index
    %c0_83 = arith.constant 0 : index
    %c0_84 = arith.constant 0 : index
    %139 = vector.load %arg7[%c1_82, %c0_83, %c0_84] : memref<3x1x20xf32, #tpu.memory_space<vmem>>, vector<1x1x20xf32>
    %140 = vector.shape_cast %139 : vector<1x1x20xf32> to vector<1x20xf32>
    %cst_85 = arith.constant dense<0.000000e+00> : vector<8xf32>
    %141 = vector.multi_reduction <add>, %136, %cst_85 [1] : vector<8x20xf32> to vector<8xf32>
    %142 = vector.shape_cast %141 : vector<8xf32> to vector<8x1xf32>
    %cst_86 = arith.constant 2.000000e+01 : f32
    %143 = vector.broadcast %cst_86 : f32 to vector<8x1xf32>
    %144 = arith.divf %142, %143 : vector<8x1xf32>
    %145 = vector.broadcast %144 : vector<8x1xf32> to vector<8x20xf32>
    %146 = arith.subf %136, %145 : vector<8x20xf32>
    %147 = arith.mulf %146, %146 : vector<8x20xf32>
    %cst_87 = arith.constant dense<0.000000e+00> : vector<8xf32>
    %148 = vector.multi_reduction <add>, %147, %cst_87 [1] : vector<8x20xf32> to vector<8xf32>
    %149 = vector.shape_cast %148 : vector<8xf32> to vector<8x1xf32>
    %cst_88 = arith.constant 2.000000e+01 : f32
    %150 = vector.broadcast %cst_88 : f32 to vector<8x1xf32>
    %151 = arith.divf %149, %150 : vector<8x1xf32>
    %cst_89 = arith.constant 9.99999974E-6 : f32
    %152 = vector.broadcast %cst_89 : f32 to vector<8x1xf32>
    %153 = arith.addf %151, %152 : vector<8x1xf32>
    %154 = math.rsqrt %153 : vector<8x1xf32>
    %155 = vector.broadcast %154 : vector<8x1xf32> to vector<8x20xf32>
    %156 = arith.mulf %146, %155 : vector<8x20xf32>
    %157 = vector.broadcast %138 : vector<1x20xf32> to vector<8x20xf32>
    %158 = arith.mulf %156, %157 : vector<8x20xf32>
    %159 = vector.broadcast %140 : vector<1x20xf32> to vector<8x20xf32>
    %160 = arith.addf %158, %159 : vector<8x20xf32>
    %c1_90 = arith.constant 1 : index
    %c0_91 = arith.constant 0 : index
    %c0_92 = arith.constant 0 : index
    %161 = vector.load %arg10[%c1_90, %c0_91, %c0_92] : memref<3x20x32xf32, #tpu.memory_space<vmem>>, vector<1x20x32xf32>
    %162 = vector.shape_cast %161 : vector<1x20x32xf32> to vector<20x32xf32>
    %cst_93 = arith.constant dense<0.000000e+00> : vector<8x32xf32>
    %163 = tpu.matmul %160, %162, %cst_93 {dimension_numbers = #tpu.dot_dimension_numbers<[1], [0], [0], [1], [0, 0, 1, 1], [], []>} : vector<8x20xf32>, vector<20x32xf32>, vector<8x32xf32> -> vector<8x32xf32>
    %c1_94 = arith.constant 1 : index
    %c0_95 = arith.constant 0 : index
    %c0_96 = arith.constant 0 : index
    %164 = vector.load %arg11[%c1_94, %c0_95, %c0_96] : memref<3x1x32xf32, #tpu.memory_space<vmem>>, vector<1x1x32xf32>
    %165 = vector.shape_cast %164 : vector<1x1x32xf32> to vector<1x32xf32>
    %166 = vector.broadcast %165 : vector<1x32xf32> to vector<8x32xf32>
    %167 = arith.addf %163, %166 : vector<8x32xf32>
    %cst_97 = arith.constant 0.000000e+00 : f32
    %168 = vector.broadcast %cst_97 : f32 to vector<8x32xf32>
    %169 = arith.maximumf %167, %168 : vector<8x32xf32>
    %c1_98 = arith.constant 1 : index
    %c0_99 = arith.constant 0 : index
    %c0_100 = arith.constant 0 : index
    %170 = vector.load %arg12[%c1_98, %c0_99, %c0_100] : memref<3x32x20xf32, #tpu.memory_space<vmem>>, vector<1x32x20xf32>
    %171 = vector.shape_cast %170 : vector<1x32x20xf32> to vector<32x20xf32>
    %cst_101 = arith.constant dense<0.000000e+00> : vector<8x20xf32>
    %172 = tpu.matmul %169, %171, %cst_101 {dimension_numbers = #tpu.dot_dimension_numbers<[1], [0], [0], [1], [0, 0, 1, 1], [], []>} : vector<8x32xf32>, vector<32x20xf32>, vector<8x20xf32> -> vector<8x20xf32>
    %c1_102 = arith.constant 1 : index
    %c0_103 = arith.constant 0 : index
    %c0_104 = arith.constant 0 : index
    %173 = vector.load %arg13[%c1_102, %c0_103, %c0_104] : memref<3x1x20xf32, #tpu.memory_space<vmem>>, vector<1x1x20xf32>
    %174 = vector.shape_cast %173 : vector<1x1x20xf32> to vector<1x20xf32>
    %175 = vector.broadcast %174 : vector<1x20xf32> to vector<8x20xf32>
    %176 = arith.addf %172, %175 : vector<8x20xf32>
    %177 = arith.addf %160, %176 : vector<8x20xf32>
    %c1_105 = arith.constant 1 : index
    %c0_106 = arith.constant 0 : index
    %c0_107 = arith.constant 0 : index
    %178 = vector.load %arg8[%c1_105, %c0_106, %c0_107] : memref<3x1x20xf32, #tpu.memory_space<vmem>>, vector<1x1x20xf32>
    %179 = vector.shape_cast %178 : vector<1x1x20xf32> to vector<1x20xf32>
    %c1_108 = arith.constant 1 : index
    %c0_109 = arith.constant 0 : index
    %c0_110 = arith.constant 0 : index
    %180 = vector.load %arg9[%c1_108, %c0_109, %c0_110] : memref<3x1x20xf32, #tpu.memory_space<vmem>>, vector<1x1x20xf32>
    %181 = vector.shape_cast %180 : vector<1x1x20xf32> to vector<1x20xf32>
    %cst_111 = arith.constant dense<0.000000e+00> : vector<8xf32>
    %182 = vector.multi_reduction <add>, %177, %cst_111 [1] : vector<8x20xf32> to vector<8xf32>
    %183 = vector.shape_cast %182 : vector<8xf32> to vector<8x1xf32>
    %cst_112 = arith.constant 2.000000e+01 : f32
    %184 = vector.broadcast %cst_112 : f32 to vector<8x1xf32>
    %185 = arith.divf %183, %184 : vector<8x1xf32>
    %186 = vector.broadcast %185 : vector<8x1xf32> to vector<8x20xf32>
    %187 = arith.subf %177, %186 : vector<8x20xf32>
    %188 = arith.mulf %187, %187 : vector<8x20xf32>
    %cst_113 = arith.constant dense<0.000000e+00> : vector<8xf32>
    %189 = vector.multi_reduction <add>, %188, %cst_113 [1] : vector<8x20xf32> to vector<8xf32>
    %190 = vector.shape_cast %189 : vector<8xf32> to vector<8x1xf32>
    %cst_114 = arith.constant 2.000000e+01 : f32
    %191 = vector.broadcast %cst_114 : f32 to vector<8x1xf32>
    %192 = arith.divf %190, %191 : vector<8x1xf32>
    %cst_115 = arith.constant 9.99999974E-6 : f32
    %193 = vector.broadcast %cst_115 : f32 to vector<8x1xf32>
    %194 = arith.addf %192, %193 : vector<8x1xf32>
    %195 = math.rsqrt %194 : vector<8x1xf32>
    %196 = vector.broadcast %195 : vector<8x1xf32> to vector<8x20xf32>
    %197 = arith.mulf %187, %196 : vector<8x20xf32>
    %198 = vector.broadcast %179 : vector<1x20xf32> to vector<8x20xf32>
    %199 = arith.mulf %197, %198 : vector<8x20xf32>
    %200 = vector.broadcast %181 : vector<1x20xf32> to vector<8x20xf32>
    %201 = arith.addf %199, %200 : vector<8x20xf32>
    %c2 = arith.constant 2 : index
    %c0_116 = arith.constant 0 : index
    %c0_117 = arith.constant 0 : index
    %202 = vector.load %arg2[%c2, %c0_116, %c0_117] : memref<3x20x384xf32, #tpu.memory_space<vmem>>, vector<1x20x384xf32>
    %203 = vector.shape_cast %202 : vector<1x20x384xf32> to vector<20x384xf32>
    %cst_118 = arith.constant dense<0.000000e+00> : vector<8x384xf32>
    %204 = tpu.matmul %201, %203, %cst_118 {dimension_numbers = #tpu.dot_dimension_numbers<[1], [0], [0], [1], [0, 0, 1, 1], [], []>} : vector<8x20xf32>, vector<20x384xf32>, vector<8x384xf32> -> vector<8x384xf32>
    %c2_119 = arith.constant 2 : index
    %c0_120 = arith.constant 0 : index
    %c0_121 = arith.constant 0 : index
    %205 = vector.load %arg3[%c2_119, %c0_120, %c0_121] : memref<3x1x384xf32, #tpu.memory_space<vmem>>, vector<1x1x384xf32>
    %206 = vector.shape_cast %205 : vector<1x1x384xf32> to vector<1x384xf32>
    %207 = vector.broadcast %206 : vector<1x384xf32> to vector<8x384xf32>
    %208 = arith.addf %204, %207 : vector<8x384xf32>
    %209 = vector.extract_strided_slice %208 {offsets = [0, 0], sizes = [8, 20], strides = [1, 1]} : vector<8x384xf32> to vector<8x20xf32>
    %210 = vector.extract_strided_slice %208 {offsets = [0, 128], sizes = [8, 20], strides = [1, 1]} : vector<8x384xf32> to vector<8x20xf32>
    %211 = vector.extract_strided_slice %208 {offsets = [0, 256], sizes = [8, 20], strides = [1, 1]} : vector<8x384xf32> to vector<8x20xf32>
    %212 = tpu.concatenate %209, %209, %209, %209, %209, %209, %209, %209, %209, %209 in 0 : vector<8x20xf32>, vector<8x20xf32>, vector<8x20xf32>, vector<8x20xf32>, vector<8x20xf32>, vector<8x20xf32>, vector<8x20xf32>, vector<8x20xf32>, vector<8x20xf32>, vector<8x20xf32> -> vector<80x20xf32>
    %213 = arith.mulf %212, %2 : vector<80x20xf32>
    %cst_122 = arith.constant dense<0.000000e+00> : vector<80x8xf32>
    %214 = tpu.matmul %213, %210, %cst_122 {dimension_numbers = #tpu.dot_dimension_numbers<[1], [1], [0], [0], [0, 0, 1, 0], [], []>} : vector<80x20xf32>, vector<8x20xf32>, vector<80x8xf32> -> vector<80x8xf32>
    %cst_123 = arith.constant dense<0xFF800000> : vector<80xf32>
    %215 = vector.multi_reduction <maximumf>, %214, %cst_123 [1] : vector<80x8xf32> to vector<80xf32>
    %216 = vector.shape_cast %215 : vector<80xf32> to vector<80x1xf32>
    %217 = vector.broadcast %216 : vector<80x1xf32> to vector<80x8xf32>
    %218 = arith.subf %214, %217 : vector<80x8xf32>
    %219 = math.exp %218 : vector<80x8xf32>
    %cst_124 = arith.constant dense<0.000000e+00> : vector<80xf32>
    %220 = vector.multi_reduction <add>, %219, %cst_124 [1] : vector<80x8xf32> to vector<80xf32>
    %221 = vector.shape_cast %220 : vector<80xf32> to vector<80x1xf32>
    %222 = tpu.reciprocal %221 {approx = true} : vector<80x1xf32> -> vector<80x1xf32>
    %223 = vector.broadcast %222 : vector<80x1xf32> to vector<80x8xf32>
    %224 = arith.mulf %219, %223 : vector<80x8xf32>
    %cst_125 = arith.constant dense<0.000000e+00> : vector<80x20xf32>
    %225 = tpu.matmul %224, %211, %cst_125 {dimension_numbers = #tpu.dot_dimension_numbers<[1], [0], [0], [1], [0, 0, 1, 1], [], []>} : vector<80x8xf32>, vector<8x20xf32>, vector<80x20xf32> -> vector<80x20xf32>
    %226 = arith.mulf %225, %2 : vector<80x20xf32>
    %cst_126 = arith.constant dense<0.000000e+00> : vector<8x20xf32>
    %227 = tpu.matmul %3, %226, %cst_126 {dimension_numbers = #tpu.dot_dimension_numbers<[1], [0], [0], [1], [0, 0, 1, 1], [], []>} : vector<8x80xf32>, vector<80x20xf32>, vector<8x20xf32> -> vector<8x20xf32>
    %c2_127 = arith.constant 2 : index
    %c0_128 = arith.constant 0 : index
    %c0_129 = arith.constant 0 : index
    %228 = vector.load %arg4[%c2_127, %c0_128, %c0_129] : memref<3x20x20xf32, #tpu.memory_space<vmem>>, vector<1x20x20xf32>
    %229 = vector.shape_cast %228 : vector<1x20x20xf32> to vector<20x20xf32>
    %cst_130 = arith.constant dense<0.000000e+00> : vector<8x20xf32>
    %230 = tpu.matmul %227, %229, %cst_130 {dimension_numbers = #tpu.dot_dimension_numbers<[1], [0], [0], [1], [0, 0, 1, 1], [], []>} : vector<8x20xf32>, vector<20x20xf32>, vector<8x20xf32> -> vector<8x20xf32>
    %c2_131 = arith.constant 2 : index
    %c0_132 = arith.constant 0 : index
    %c0_133 = arith.constant 0 : index
    %231 = vector.load %arg5[%c2_131, %c0_132, %c0_133] : memref<3x1x20xf32, #tpu.memory_space<vmem>>, vector<1x1x20xf32>
    %232 = vector.shape_cast %231 : vector<1x1x20xf32> to vector<1x20xf32>
    %233 = vector.broadcast %232 : vector<1x20xf32> to vector<8x20xf32>
    %234 = arith.addf %230, %233 : vector<8x20xf32>
    %235 = arith.addf %201, %234 : vector<8x20xf32>
    %c2_134 = arith.constant 2 : index
    %c0_135 = arith.constant 0 : index
    %c0_136 = arith.constant 0 : index
    %236 = vector.load %arg6[%c2_134, %c0_135, %c0_136] : memref<3x1x20xf32, #tpu.memory_space<vmem>>, vector<1x1x20xf32>
    %237 = vector.shape_cast %236 : vector<1x1x20xf32> to vector<1x20xf32>
    %c2_137 = arith.constant 2 : index
    %c0_138 = arith.constant 0 : index
    %c0_139 = arith.constant 0 : index
    %238 = vector.load %arg7[%c2_137, %c0_138, %c0_139] : memref<3x1x20xf32, #tpu.memory_space<vmem>>, vector<1x1x20xf32>
    %239 = vector.shape_cast %238 : vector<1x1x20xf32> to vector<1x20xf32>
    %cst_140 = arith.constant dense<0.000000e+00> : vector<8xf32>
    %240 = vector.multi_reduction <add>, %235, %cst_140 [1] : vector<8x20xf32> to vector<8xf32>
    %241 = vector.shape_cast %240 : vector<8xf32> to vector<8x1xf32>
    %cst_141 = arith.constant 2.000000e+01 : f32
    %242 = vector.broadcast %cst_141 : f32 to vector<8x1xf32>
    %243 = arith.divf %241, %242 : vector<8x1xf32>
    %244 = vector.broadcast %243 : vector<8x1xf32> to vector<8x20xf32>
    %245 = arith.subf %235, %244 : vector<8x20xf32>
    %246 = arith.mulf %245, %245 : vector<8x20xf32>
    %cst_142 = arith.constant dense<0.000000e+00> : vector<8xf32>
    %247 = vector.multi_reduction <add>, %246, %cst_142 [1] : vector<8x20xf32> to vector<8xf32>
    %248 = vector.shape_cast %247 : vector<8xf32> to vector<8x1xf32>
    %cst_143 = arith.constant 2.000000e+01 : f32
    %249 = vector.broadcast %cst_143 : f32 to vector<8x1xf32>
    %250 = arith.divf %248, %249 : vector<8x1xf32>
    %cst_144 = arith.constant 9.99999974E-6 : f32
    %251 = vector.broadcast %cst_144 : f32 to vector<8x1xf32>
    %252 = arith.addf %250, %251 : vector<8x1xf32>
    %253 = math.rsqrt %252 : vector<8x1xf32>
    %254 = vector.broadcast %253 : vector<8x1xf32> to vector<8x20xf32>
    %255 = arith.mulf %245, %254 : vector<8x20xf32>
    %256 = vector.broadcast %237 : vector<1x20xf32> to vector<8x20xf32>
    %257 = arith.mulf %255, %256 : vector<8x20xf32>
    %258 = vector.broadcast %239 : vector<1x20xf32> to vector<8x20xf32>
    %259 = arith.addf %257, %258 : vector<8x20xf32>
    %c2_145 = arith.constant 2 : index
    %c0_146 = arith.constant 0 : index
    %c0_147 = arith.constant 0 : index
    %260 = vector.load %arg10[%c2_145, %c0_146, %c0_147] : memref<3x20x32xf32, #tpu.memory_space<vmem>>, vector<1x20x32xf32>
    %261 = vector.shape_cast %260 : vector<1x20x32xf32> to vector<20x32xf32>
    %cst_148 = arith.constant dense<0.000000e+00> : vector<8x32xf32>
    %262 = tpu.matmul %259, %261, %cst_148 {dimension_numbers = #tpu.dot_dimension_numbers<[1], [0], [0], [1], [0, 0, 1, 1], [], []>} : vector<8x20xf32>, vector<20x32xf32>, vector<8x32xf32> -> vector<8x32xf32>
    %c2_149 = arith.constant 2 : index
    %c0_150 = arith.constant 0 : index
    %c0_151 = arith.constant 0 : index
    %263 = vector.load %arg11[%c2_149, %c0_150, %c0_151] : memref<3x1x32xf32, #tpu.memory_space<vmem>>, vector<1x1x32xf32>
    %264 = vector.shape_cast %263 : vector<1x1x32xf32> to vector<1x32xf32>
    %265 = vector.broadcast %264 : vector<1x32xf32> to vector<8x32xf32>
    %266 = arith.addf %262, %265 : vector<8x32xf32>
    %cst_152 = arith.constant 0.000000e+00 : f32
    %267 = vector.broadcast %cst_152 : f32 to vector<8x32xf32>
    %268 = arith.maximumf %266, %267 : vector<8x32xf32>
    %c2_153 = arith.constant 2 : index
    %c0_154 = arith.constant 0 : index
    %c0_155 = arith.constant 0 : index
    %269 = vector.load %arg12[%c2_153, %c0_154, %c0_155] : memref<3x32x20xf32, #tpu.memory_space<vmem>>, vector<1x32x20xf32>
    %270 = vector.shape_cast %269 : vector<1x32x20xf32> to vector<32x20xf32>
    %cst_156 = arith.constant dense<0.000000e+00> : vector<8x20xf32>
    %271 = tpu.matmul %268, %270, %cst_156 {dimension_numbers = #tpu.dot_dimension_numbers<[1], [0], [0], [1], [0, 0, 1, 1], [], []>} : vector<8x32xf32>, vector<32x20xf32>, vector<8x20xf32> -> vector<8x20xf32>
    %c2_157 = arith.constant 2 : index
    %c0_158 = arith.constant 0 : index
    %c0_159 = arith.constant 0 : index
    %272 = vector.load %arg13[%c2_157, %c0_158, %c0_159] : memref<3x1x20xf32, #tpu.memory_space<vmem>>, vector<1x1x20xf32>
    %273 = vector.shape_cast %272 : vector<1x1x20xf32> to vector<1x20xf32>
    %274 = vector.broadcast %273 : vector<1x20xf32> to vector<8x20xf32>
    %275 = arith.addf %271, %274 : vector<8x20xf32>
    %276 = arith.addf %259, %275 : vector<8x20xf32>
    %c2_160 = arith.constant 2 : index
    %c0_161 = arith.constant 0 : index
    %c0_162 = arith.constant 0 : index
    %277 = vector.load %arg8[%c2_160, %c0_161, %c0_162] : memref<3x1x20xf32, #tpu.memory_space<vmem>>, vector<1x1x20xf32>
    %278 = vector.shape_cast %277 : vector<1x1x20xf32> to vector<1x20xf32>
    %c2_163 = arith.constant 2 : index
    %c0_164 = arith.constant 0 : index
    %c0_165 = arith.constant 0 : index
    %279 = vector.load %arg9[%c2_163, %c0_164, %c0_165] : memref<3x1x20xf32, #tpu.memory_space<vmem>>, vector<1x1x20xf32>
    %280 = vector.shape_cast %279 : vector<1x1x20xf32> to vector<1x20xf32>
    %cst_166 = arith.constant dense<0.000000e+00> : vector<8xf32>
    %281 = vector.multi_reduction <add>, %276, %cst_166 [1] : vector<8x20xf32> to vector<8xf32>
    %282 = vector.shape_cast %281 : vector<8xf32> to vector<8x1xf32>
    %cst_167 = arith.constant 2.000000e+01 : f32
    %283 = vector.broadcast %cst_167 : f32 to vector<8x1xf32>
    %284 = arith.divf %282, %283 : vector<8x1xf32>
    %285 = vector.broadcast %284 : vector<8x1xf32> to vector<8x20xf32>
    %286 = arith.subf %276, %285 : vector<8x20xf32>
    %287 = arith.mulf %286, %286 : vector<8x20xf32>
    %cst_168 = arith.constant dense<0.000000e+00> : vector<8xf32>
    %288 = vector.multi_reduction <add>, %287, %cst_168 [1] : vector<8x20xf32> to vector<8xf32>
    %289 = vector.shape_cast %288 : vector<8xf32> to vector<8x1xf32>
    %cst_169 = arith.constant 2.000000e+01 : f32
    %290 = vector.broadcast %cst_169 : f32 to vector<8x1xf32>
    %291 = arith.divf %289, %290 : vector<8x1xf32>
    %cst_170 = arith.constant 9.99999974E-6 : f32
    %292 = vector.broadcast %cst_170 : f32 to vector<8x1xf32>
    %293 = arith.addf %291, %292 : vector<8x1xf32>
    %294 = math.rsqrt %293 : vector<8x1xf32>
    %295 = vector.broadcast %294 : vector<8x1xf32> to vector<8x20xf32>
    %296 = arith.mulf %286, %295 : vector<8x20xf32>
    %297 = vector.broadcast %278 : vector<1x20xf32> to vector<8x20xf32>
    %298 = arith.mulf %296, %297 : vector<8x20xf32>
    %299 = vector.broadcast %280 : vector<1x20xf32> to vector<8x20xf32>
    %300 = arith.addf %298, %299 : vector<8x20xf32>
    %c0_171 = arith.constant 0 : index
    %c0_172 = arith.constant 0 : index
    %301 = vector.load %arg14[%c0_171, %c0_172] : memref<20x20xf32, #tpu.memory_space<vmem>>, vector<20x20xf32>
    %cst_173 = arith.constant dense<0.000000e+00> : vector<8x20xf32>
    %302 = tpu.matmul %300, %301, %cst_173 {dimension_numbers = #tpu.dot_dimension_numbers<[1], [0], [0], [1], [0, 0, 1, 1], [], []>} : vector<8x20xf32>, vector<20x20xf32>, vector<8x20xf32> -> vector<8x20xf32>
    %c0_174 = arith.constant 0 : index
    %c0_175 = arith.constant 0 : index
    %303 = vector.load %arg15[%c0_174, %c0_175] : memref<1x20xf32, #tpu.memory_space<vmem>>, vector<1x20xf32>
    %304 = vector.broadcast %303 : vector<1x20xf32> to vector<8x20xf32>
    %305 = arith.addf %302, %304 : vector<8x20xf32>
    %cst_176 = arith.constant 0.000000e+00 : f32
    %306 = vector.broadcast %cst_176 : f32 to vector<8x20xf32>
    %307 = arith.maximumf %305, %306 : vector<8x20xf32>
    %c0_177 = arith.constant 0 : index
    %c0_178 = arith.constant 0 : index
    %308 = vector.load %arg16[%c0_177, %c0_178] : memref<8x20xf32, #tpu.memory_space<vmem>>, vector<8x20xf32>
    %309 = arith.mulf %307, %308 : vector<8x20xf32>
    %310 = vector.shape_cast %309 : vector<8x20xf32> to vector<1x8x20xf32>
    %cst_179 = arith.constant dense<0.000000e+00> : vector<1xf32>
    %311 = vector.multi_reduction <add>, %310, %cst_179 [1, 2] : vector<1x8x20xf32> to vector<1xf32>
    %312 = vector.shape_cast %311 : vector<1xf32> to vector<1x1x1xf32>
    %313 = vector.extract %312[0, 0, 0] : f32 from vector<1x1x1xf32>
    %314 = vector.broadcast %313 : f32 to vector<1x1xf32>
    %c0_180 = arith.constant 0 : index
    %c0_181 = arith.constant 0 : index
    %315 = vector.load %arg17[%c0_180, %c0_181] : memref<1x1xf32, #tpu.memory_space<vmem>>, vector<1x1xf32>
    %316 = arith.addf %314, %315 : vector<1x1xf32>
    %c0_182 = arith.constant 0 : index
    %c0_183 = arith.constant 0 : index
    %c0_184 = arith.constant 0 : index
    %317 = vector.load %arg20[%c0_182, %c0_183, %c0_184] : memref<1x1x1xf32, #tpu.memory_space<vmem>>, vector<1x1x1xf32>
    %318 = vector.shape_cast %317 : vector<1x1x1xf32> to vector<1x1xf32>
    %319 = vector.shape_cast %316 : vector<1x1xf32> to vector<1x1x1xf32>
    tpu.vector_store %arg20[%c0_182, %c0_183, %c0_184], %319 {strides = array<i32>} : memref<1x1x1xf32, #tpu.memory_space<vmem>>, vector<1x1x1xf32>,
    return
  }
  func.func @transform_0(%arg0: i32) -> (i32, i32, i32) {
    %c0_i32 = arith.constant 0 : i32
    %c0_i32_0 = arith.constant 0 : i32
    %c0_i32_1 = arith.constant 0 : i32
    return %arg0, %c0_i32, %c0_i32_0 : i32, i32, i32
  }
  func.func @transform_1(%arg0: i32) -> (i32, i32, i32) {
    %c0_i32 = arith.constant 0 : i32
    %c0_i32_0 = arith.constant 0 : i32
    %c0_i32_1 = arith.constant 0 : i32
    %c0_i32_2 = arith.constant 0 : i32
    return %c0_i32, %c0_i32_0, %c0_i32_1 : i32, i32, i32
  }
  func.func @transform_2(%arg0: i32) -> (i32, i32, i32) {
    %c0_i32 = arith.constant 0 : i32
    %c0_i32_0 = arith.constant 0 : i32
    %c0_i32_1 = arith.constant 0 : i32
    %c0_i32_2 = arith.constant 0 : i32
    return %c0_i32, %c0_i32_0, %c0_i32_1 : i32, i32, i32
  }
  func.func @transform_3(%arg0: i32) -> (i32, i32, i32) {
    %c0_i32 = arith.constant 0 : i32
    %c0_i32_0 = arith.constant 0 : i32
    %c0_i32_1 = arith.constant 0 : i32
    %c0_i32_2 = arith.constant 0 : i32
    return %c0_i32, %c0_i32_0, %c0_i32_1 : i32, i32, i32
  }
  func.func @transform_4(%arg0: i32) -> (i32, i32, i32) {
    %c0_i32 = arith.constant 0 : i32
    %c0_i32_0 = arith.constant 0 : i32
    %c0_i32_1 = arith.constant 0 : i32
    %c0_i32_2 = arith.constant 0 : i32
    return %c0_i32, %c0_i32_0, %c0_i32_1 : i32, i32, i32
  }
  func.func @transform_5(%arg0: i32) -> (i32, i32, i32) {
    %c0_i32 = arith.constant 0 : i32
    %c0_i32_0 = arith.constant 0 : i32
    %c0_i32_1 = arith.constant 0 : i32
    %c0_i32_2 = arith.constant 0 : i32
    return %c0_i32, %c0_i32_0, %c0_i32_1 : i32, i32, i32
  }
  func.func @transform_6(%arg0: i32) -> (i32, i32, i32) {
    %c0_i32 = arith.constant 0 : i32
    %c0_i32_0 = arith.constant 0 : i32
    %c0_i32_1 = arith.constant 0 : i32
    %c0_i32_2 = arith.constant 0 : i32
    return %c0_i32, %c0_i32_0, %c0_i32_1 : i32, i32, i32
  }
  func.func @transform_7(%arg0: i32) -> (i32, i32, i32) {
    %c0_i32 = arith.constant 0 : i32
    %c0_i32_0 = arith.constant 0 : i32
    %c0_i32_1 = arith.constant 0 : i32
    %c0_i32_2 = arith.constant 0 : i32
    return %c0_i32, %c0_i32_0, %c0_i32_1 : i32, i32, i32
  }
  func.func @transform_8(%arg0: i32) -> (i32, i32, i32) {
    %c0_i32 = arith.constant 0 : i32
    %c0_i32_0 = arith.constant 0 : i32
    %c0_i32_1 = arith.constant 0 : i32
    %c0_i32_2 = arith.constant 0 : i32
    return %c0_i32, %c0_i32_0, %c0_i32_1 : i32, i32, i32
  }
  func.func @transform_9(%arg0: i32) -> (i32, i32, i32) {
    %c0_i32 = arith.constant 0 : i32
    %c0_i32_0 = arith.constant 0 : i32
    %c0_i32_1 = arith.constant 0 : i32
    %c0_i32_2 = arith.constant 0 : i32
    return %c0_i32, %c0_i32_0, %c0_i32_1 : i32, i32, i32
  }
  func.func @transform_10(%arg0: i32) -> (i32, i32, i32) {
    %c0_i32 = arith.constant 0 : i32
    %c0_i32_0 = arith.constant 0 : i32
    %c0_i32_1 = arith.constant 0 : i32
    %c0_i32_2 = arith.constant 0 : i32
    return %c0_i32, %c0_i32_0, %c0_i32_1 : i32, i32, i32
  }
  func.func @transform_11(%arg0: i32) -> (i32, i32, i32) {
    %c0_i32 = arith.constant 0 : i32
    %c0_i32_0 = arith.constant 0 : i32
    %c0_i32_1 = arith.constant 0 : i32
    %c0_i32_2 = arith.constant 0 : i32
    return %c0_i32, %c0_i32_0, %c0_i32_1 : i32, i32, i32
  }
  func.func @transform_12(%arg0: i32) -> (i32, i32, i32) {
    %c0_i32 = arith.constant 0 : i32
    %c0_i32_0 = arith.constant 0 : i32
    %c0_i32_1 = arith.constant 0 : i32
    %c0_i32_2 = arith.constant 0 : i32
    return %c0_i32, %c0_i32_0, %c0_i32_1 : i32, i32, i32
  }
  func.func @transform_13(%arg0: i32) -> (i32, i32) {
    %c0_i32 = arith.constant 0 : i32
    %c0_i32_0 = arith.constant 0 : i32
    %c0_i32_1 = arith.constant 0 : i32
    return %c0_i32, %c0_i32_0 : i32, i32
  }
  func.func @transform_14(%arg0: i32) -> (i32, i32) {
    %c0_i32 = arith.constant 0 : i32
    %c0_i32_0 = arith.constant 0 : i32
    %c0_i32_1 = arith.constant 0 : i32
    return %c0_i32, %c0_i32_0 : i32, i32
  }
  func.func @transform_15(%arg0: i32) -> (i32, i32) {
    %c0_i32 = arith.constant 0 : i32
    %c0_i32_0 = arith.constant 0 : i32
    %c0_i32_1 = arith.constant 0 : i32
    return %c0_i32, %c0_i32_0 : i32, i32
  }
  func.func @transform_16(%arg0: i32) -> (i32, i32) {
    %c0_i32 = arith.constant 0 : i32
    %c0_i32_0 = arith.constant 0 : i32
    %c0_i32_1 = arith.constant 0 : i32
    return %c0_i32, %c0_i32_0 : i32, i32
  }
  func.func @transform_17(%arg0: i32) -> (i32, i32) {
    %c0_i32 = arith.constant 0 : i32
    %c0_i32_0 = arith.constant 0 : i32
    %c0_i32_1 = arith.constant 0 : i32
    return %c0_i32, %c0_i32_0 : i32, i32
  }
  func.func @transform_18(%arg0: i32) -> (i32, i32) {
    %c0_i32 = arith.constant 0 : i32
    %c0_i32_0 = arith.constant 0 : i32
    %c0_i32_1 = arith.constant 0 : i32
    return %c0_i32, %c0_i32_0 : i32, i32
  }
  func.func @transform_19(%arg0: i32) -> (i32, i32, i32) {
    %c0_i32 = arith.constant 0 : i32
    %c0_i32_0 = arith.constant 0 : i32
    %c0_i32_1 = arith.constant 0 : i32
    return %arg0, %c0_i32, %c0_i32_0 : i32, i32, i32
  }
}

</mosaic_0001>

<bundles_post_ra>
// kernel: tpu_custom_call.1
= control target key start
LH: loop header
LB: loop body
LE: loop exit
PB: predicated region body
PF: predicated region fallthrough
CT: control target
= control target key end

     0   :  { %s6704_s0 = inlined_call_operand.hbm [shape: f32[2,8,20], index: 0, kind: input, shape index: {}]   ;;  %s6705_s1 = inlined_call_operand.vmem [shape: f32[3,20,384], index: 1, kind: input, shape index: {}]   ;;  %s6706_s2 = inlined_call_operand.hbm [shape: f32[3,1,384], index: 2, kind: input, shape index: {}]   ;;  %s6707_s3 = inlined_call_operand.hbm [shape: f32[3,20,20], index: 3, kind: input, shape index: {}]   ;;  %s6708_s4 = inlined_call_operand.hbm [shape: f32[3,1,20], index: 4, kind: input, shape index: {}]   ;;  %s6709_s5 = inlined_call_operand.hbm [shape: f32[3,1,20], index: 5, kind: input, shape index: {}]   ;;  %s6710_s6 = inlined_call_operand.hbm [shape: f32[3,1,20], index: 6, kind: input, shape index: {}]   ;;  %s6711_s7 = inlined_call_operand.hbm [shape: f32[3,1,20], index: 7, kind: input, shape index: {}]   ;;  %s6712_s8 = inlined_call_operand.hbm [shape: f32[3,1,20], index: 8, kind: input, shape index: {}]   ;;  %s6713_s9 = inlined_call_operand.vmem [shape: f32[3,20,32], index: 9, kind: input, shape index: {}]   ;;  %s6714_s10 = inlined_call_operand.hbm [shape: f32[3,1,32], index: 10, kind: input, shape index: {}]   ;;  %s6715_s11 = inlined_call_operand.vmem [shape: f32[3,32,20], index: 11, kind: input, shape index: {}]   ;;  %s6716_s12 = inlined_call_operand.hbm [shape: f32[3,1,20], index: 12, kind: input, shape index: {}]   ;;  %s6717_s13 = inlined_call_operand.vmem [shape: f32[20,20], index: 13, kind: input, shape index: {}]   ;;  %s6718_s14 = inlined_call_operand.hbm [shape: f32[1,20], index: 14, kind: input, shape index: {}]   ;;  %s6719_s15 = inlined_call_operand.hbm [shape: f32[8,20], index: 15, kind: input, shape index: {}]   ;;  %s6720_s16 = inlined_call_operand.<no memory space> [shape: f32[1,1], index: 16, kind: input, shape index: {}]   ;;  %s6721_s17 = inlined_call_operand.vmem [shape: f32[80,20], index: 17, kind: input, shape index: {}]   ;;  %s6722_s18 = inlined_call_operand.hbm [shape: f32[8,80], index: 18, kind: input, shape index: {}]   ;;  %s6723_s19 = inlined_call_operand.vmem [shape: f32[2,1,1], index: 19, kind: output, shape index: {}]  }
   0x1   :  { %6741 = sst [smem:[#allocation32_spill]] %s6704_s0  ;;  %v24_v0 = vstv %s6720_s16 }
   0x2   :  { %6742 = sst [smem:[#allocation33_spill]] %s6705_s1  ;;  %25 = vst [vmem:[#allocation2] sm:$0x1] %v24_v0 }
   0x3   :  { %6743 = sst [smem:[#allocation34_spill]] %s6706_s2 }
   0x4   :  { %6744 = sst [smem:[#allocation35_spill]] %s6707_s3 }
   0x5   :  { %6745 = sst [smem:[#allocation36_spill]] %s6708_s4 }
   0x6   :  { %6746 = sst [smem:[#allocation37_spill]] %s6710_s6 }
   0x7   :  { %6747 = sst [smem:[#allocation38_spill]] %s6712_s8 }
   0x8   :  { %6748 = sst [smem:[#allocation39_spill]] %s6713_s9 }
   0x9   :  { %6749 = sst [smem:[#allocation40_spill]] %s6715_s11 }
   0xa   :  { %6750 = sst [smem:[#allocation41_spill]] %s6717_s13 }
   0xb   :  { %6751 = sst [smem:[#allocation42_spill]] %s6721_s17 }
   0xc   :  { %6752 = sst [smem:[#allocation43_spill]] %s6723_s19 }
   0xd   :  { %26 = vsyncpa [#allocation4], 0 }
   0xe   :  { %28 = vsyncpa [#allocation4 + $0x1], 0 }
   0xf   :  { %29 = vsyncpa [#allocation6], 0 }
  0x10   :  { %30 = vsyncpa [#allocation9], 0 }
  0x11   :  { %31 = vsyncpa [#allocation12], 0 }
  0x12   :  { %32 = vsyncpa [#allocation15], 0 }
  0x13   :  { %33 = vsyncpa [#allocation18], 0 }
  0x14   :  { %34 = vsyncpa [#allocation21], 0  ;;  %s5678_s20 = smov 0   ;;  %s5680_s21 = smov 0  }
  0x15   :  { %s5682_s1 = smov 0   ;;  %s5684_s22 = smov 0  }
  0x16 LB: > { %s5553_s16 = smov [#allocation5]   ;;  %s5699_s23 = sadd.s32 4294967295, %s5551_s22   ;;  %s5551_s22 = sphi %s5684_s22, %s6794_s22   ;;  %s5547_s1 = sphi %s5682_s1, %s6793_s1   ;;  %s5543_s21 = sphi %s5680_s21, %s6792_s21   ;;  %s5539_s20 = sphi %s5678_s20, %s6791_s20  }
  0x17   : > { %s490_s2 = sshll.u32 %s5553_s16, 4  ;;  %6753 = sst [smem:[#allocation30_spill]] %s5699_s23  ;;  %s5704_s2 = int_to_ptr.vmem [resolvable:$true] %s490_s2 }
  0x18   : > { %p4076_p0 = scmp.ge.s32.totalorder %s5551_s22, 1  ;;  %p6735_p1 = scmp.eq.s32.totalorder %s5699_s23, 0 }
  0x19   : > { %p475_p2 = scmp.lt.s32.totalorder %s5551_s22, 3  ;;  %s5554_s25 = smov [#allocation8]  }
  0x1a   : > { %s516_s3 = sshll.u32 %s5554_s25, 4  ;;  %s5555_s27 = smov [#allocation11]   ;;  %s5718_s3 = int_to_ptr.vmem [resolvable:$true] %s516_s3 }
  0x1b   : > { %p5706_p3 = pnand %p4076_p0, %p475_p2  ;;  %s5720_s28 = sshll.u32 %s5555_s27, 4  ;;  %s543_s28 = int_to_ptr.vmem [resolvable:$true] %s5720_s28 }
  0x1c   : > { %s6757_s30 = sld [smem:[#allocation34_spill]] }
  0x1d   : > { %s6754_s24 = scalar_select %p5706_p3, 1, 0 }
  0x1e   : > { %p4865_p4 = pneg %p5706_p3 }
  0x1f   : > { %6755 = sst [smem:[#allocation31_spill]] %s6754_s24 }
  0x20   : > { %p5714_p5 = pnand %p4865_p4, %p6735_p1 }
  0x22   : > { %s5127_s16 = scalar_lea.hbm %s6757_s30, 144  ;;  %p5730_p7 = pneg %p5714_p5 }
  0x23   : > { %p5128_p6 = scmp.ne.s32.totalorder %s6757_s30, %s5127_s16  ;;  %p5134_p10 = scmp.lt.u32.totalorder %s5127_s16, %s6757_s30 }
  0x25   : > { %p5130_p8 = pnand %p5730_p7, %p5128_p6 }
  0x27   : > { %p5131_p9 = pneg %p5130_p8 }
  0x29   : > { %p5136_p11 = pnand %p5134_p10, %p5131_p9 }
  0x2b   : > { %5139 = shalt.err (!%p5136_p11)
}
  0x2c   : > { %s5140_s13 = scalar_lea.vmem %s5704_s2, 144  ;;  %s5147_s19 = scalar_lea.vmem %s5704_s2, 160 }
  0x2d   : > { %p5141_p12 = scmp.ne.s32.totalorder %s5704_s2, %s5140_s13  ;;  %p5148_p2 = scmp.lt.s32.totalorder %s5704_s2, %s5704_s2 }
  0x2e   : > { %p5149_p4 = scmp.lt.s32.totalorder %s5147_s19, %s5140_s13 }
  0x2f   : > { %p5143_p13 = pnand %p5141_p12, %p5730_p7 }
  0x30   : > { %p5150_p6 = por %p5149_p4, %p5148_p2 }
  0x31   : > { %p5144_p0 = pneg %p5143_p13 }
  0x33   : > { %p5151_p8 = pnand %p5150_p6, %p5144_p0 }
  0x35   : > { %5154 = shalt.err (!%p5151_p8)
}
  0x36   : > { %s5556_s11 = smov 48   ;;  %s5557_s29 = smov 3  }
  0x37   : > { %4868 = dma.hbm_to_vmem [thread:$0]  (!%p5714_p5), %s6757_s30, 144, %s5704_s2, [#allocation6], %s5556_s11, %s5556_s11, %s5557_s29  }
  0x38   : > { %s6759_s4 = sld [smem:[#allocation36_spill]] }
  0x3e   : > { %s5155_s17 = scalar_lea.hbm %s6759_s4, 48 }
  0x3f   : > { %p5156_p9 = scmp.ne.s32.totalorder %s6759_s4, %s5155_s17  ;;  %p5162_p12 = scmp.lt.u32.totalorder %s5155_s17, %s6759_s4 }
  0x41   : > { %p5158_p10 = pnand %p5156_p9, %p5730_p7 }
  0x43   : > { %p5159_p11 = pneg %p5158_p10 }
  0x45   : > { %p5164_p13 = pnand %p5162_p12, %p5159_p11 }
  0x47   : > { %5167 = shalt.err (!%p5164_p13)
}
  0x48   : > { %s5168_s9 = scalar_lea.vmem %s5718_s3, 48  ;;  %s5175_s2 = scalar_lea.vmem %s5718_s3, 64 }
  0x49   : > { %p5169_p0 = scmp.ne.s32.totalorder %s5718_s3, %s5168_s9  ;;  %p5176_p6 = scmp.lt.s32.totalorder %s5718_s3, %s5718_s3 }
  0x4a   : > { %p5177_p8 = scmp.lt.s32.totalorder %s5175_s2, %s5168_s9 }
  0x4b   : > { %p5171_p2 = pnand %p5169_p0, %p5730_p7 }
  0x4c   : > { %p5178_p9 = por %p5177_p8, %p5176_p6 }
  0x4d   : > { %p5172_p4 = pneg %p5171_p2 }
  0x4f   : > { %p5179_p10 = pnand %p5178_p9, %p5172_p4 }
  0x51   : > { %5182 = shalt.err (!%p5179_p10)
}
  0x52   : > { %s6737_s17 = smov 16   ;;  %s6739_s23 = smov 1  }
  0x53   : > { %4874 = dma.hbm_to_vmem [thread:$0]  (!%p5714_p5), %s6759_s4, 48, %s5718_s3, [#allocation9], %s6737_s17, %s6737_s17, %s6739_s23  }
  0x54   : > { %s6760_s6 = sld [smem:[#allocation37_spill]] }
  0x5a   : > { %s5183_s16 = scalar_lea.hbm %s6760_s6, 48 }
  0x5b   : > { %p5184_p11 = scmp.ne.s32.totalorder %s6760_s6, %s5183_s16  ;;  %p5190_p0 = scmp.lt.u32.totalorder %s5183_s16, %s6760_s6 }
  0x5d   : > { %p5186_p12 = pnand %p5184_p11, %p5730_p7 }
  0x5f   : > { %p5187_p13 = pneg %p5186_p12 }
  0x61   : > { %p5192_p2 = pnand %p5190_p0, %p5187_p13 }
  0x63   : > { %5195 = shalt.err (!%p5192_p2)
}
  0x64   : > { %s5196_s2 = scalar_lea.vmem %s543_s28, 48  ;;  %s5203_s3 = scalar_lea.vmem %s543_s28, 64 }
  0x65   : > { %p5197_p4 = scmp.ne.s32.totalorder %s543_s28, %s5196_s2  ;;  %p5204_p9 = scmp.lt.s32.totalorder %s543_s28, %s543_s28 }
  0x66   : > { %p5205_p10 = scmp.lt.s32.totalorder %s5203_s3, %s5196_s2 }
  0x67   : > { %p5199_p6 = pnand %p5197_p4, %p5730_p7 }
  0x68   : > { %p5206_p1 = por %p5205_p10, %p5204_p9 }
  0x69   : > { %p5200_p8 = pneg %p5199_p6 }
  0x6b   : > { %p5207_p3 = pnand %p5206_p1, %p5200_p8 }
  0x6d   : > { %5210 = shalt.err (!%p5207_p3)
}
  0x6e   : > { %4880 = dma.hbm_to_vmem [thread:$0]  (!%p5714_p5), %s6760_s6, 48, %s543_s28, [#allocation12], %s6737_s17, %s6737_s17, %s6739_s23  }
  0x6f   : > { %s5560_s29 = smov [#allocation14]   ;;  %s5561_s16 = smov [#allocation17]  }
  0x70   : > { %s568_s0 = sshll.u32 %s5560_s29, 4  ;;  %s600_s27 = sshll.u32 %s5561_s16, 4  ;;  %s569_s0 = int_to_ptr.vmem [resolvable:$true] %s568_s0  ;;  %s601_s27 = int_to_ptr.vmem [resolvable:$true] %s600_s27 }
  0x71   : > { %s6761_s8 = sld [smem:[#allocation38_spill]] }
  0x77   : > { %s5211_s9 = scalar_lea.hbm %s6761_s8, 48 }
  0x78   : > { %p5212_p1 = scmp.ne.s32.totalorder %s6761_s8, %s5211_s9  ;;  %p5218_p12 = scmp.lt.u32.totalorder %s5211_s9, %s6761_s8 }
  0x7a   : > { %p5214_p3 = pnand %p5212_p1, %p5730_p7 }
  0x7c   : > { %p5215_p11 = pneg %p5214_p3 }
  0x7e   : > { %p5220_p13 = pnand %p5218_p12, %p5215_p11 }
  0x80   : > { %5223 = shalt.err (!%p5220_p13)
}
  0x81   : > { %s5224_s28 = scalar_lea.vmem %s569_s0, 48  ;;  %s5231_s11 = scalar_lea.vmem %s569_s0, 64 }
  0x82   : > { %p5225_p0 = scmp.ne.s32.totalorder %s569_s0, %s5224_s28  ;;  %p5232_p6 = scmp.lt.s32.totalorder %s569_s0, %s569_s0 }
  0x83   : > { %p5233_p8 = scmp.lt.s32.totalorder %s5231_s11, %s5224_s28 }
  0x84   : > { %p5227_p2 = pnand %p5225_p0, %p5730_p7 }
  0x85   : > { %p5234_p9 = por %p5233_p8, %p5232_p6 }
  0x86   : > { %p5228_p4 = pneg %p5227_p2 }
  0x88   : > { %p5235_p10 = pnand %p5234_p9, %p5228_p4 }
  0x8a   : > { %5238 = shalt.err (!%p5235_p10)
}
  0x8b   : > { %4886 = dma.hbm_to_vmem [thread:$0]  (!%p5714_p5), %s6761_s8, 48, %s569_s0, [#allocation15], %s6737_s17, %s6737_s17, %s6739_s23  }
  0x8c   : > { %s5239_s19 = scalar_lea.hbm %s6716_s12, 48 }
  0x8d   : > { %p5240_p1 = scmp.ne.s32.totalorder %s6716_s12, %s5239_s19  ;;  %p5246_p12 = scmp.lt.u32.totalorder %s5239_s19, %s6716_s12 }
  0x8f   : > { %p5242_p3 = pnand %p5240_p1, %p5730_p7 }
  0x91   : > { %p5243_p11 = pneg %p5242_p3 }
  0x93   : > { %p5248_p13 = pnand %p5246_p12, %p5243_p11 }
  0x95   : > { %5251 = shalt.err (!%p5248_p13)
}
  0x96   : > { %s5252_s28 = scalar_lea.vmem %s601_s27, 48  ;;  %s5259_s0 = scalar_lea.vmem %s601_s27, 64 }
  0x97   : > { %p5253_p0 = scmp.ne.s32.totalorder %s601_s27, %s5252_s28  ;;  %p5260_p6 = scmp.lt.s32.totalorder %s601_s27, %s601_s27 }
  0x98   : > { %p5261_p8 = scmp.lt.s32.totalorder %s5259_s0, %s5252_s28 }
  0x99   : > { %p5255_p2 = pnand %p5253_p0, %p5730_p7 }
  0x9a   : > { %p5262_p9 = por %p5261_p8, %p5260_p6 }
  0x9b   : > { %p5256_p4 = pneg %p5255_p2 }
  0x9d   : > { %p5263_p10 = pnand %p5262_p9, %p5256_p4 }
  0x9f   : > { %5266 = shalt.err (!%p5263_p10)
}
  0xa0   : > { %4892 = dma.hbm_to_vmem [thread:$0]  (!%p5714_p5), %s6716_s12, 48, %s601_s27, [#allocation18], %s6737_s17, %s6737_s17, %s6739_s23  }
  0xa1   : > { %s5562_s29 = smov [#allocation20]   ;;  %s5563_s13 = smov [#allocation7]  }
  0xa2   : > { %s628_s16 = sshll.u32 %s5562_s29, 4  ;;  %s503_s19 = sshll.u32 %s5563_s13, 4  ;;  %s629_s16 = int_to_ptr.vmem [resolvable:$true] %s628_s16  ;;  %s504_s19 = int_to_ptr.vmem [resolvable:$true] %s503_s19 }
  0xa3   : > { %s5267_s3 = scalar_lea.hbm %s6719_s15, 128 }
  0xa4   : > { %p5268_p1 = scmp.ne.s32.totalorder %s6719_s15, %s5267_s3  ;;  %p5274_p12 = scmp.lt.u32.totalorder %s5267_s3, %s6719_s15 }
  0xa6   : > { %p5270_p3 = pnand %p5268_p1, %p5730_p7 }
  0xa8   : > { %p5271_p11 = pneg %p5270_p3 }
  0xaa   : > { %p5276_p13 = pnand %p5274_p12, %p5271_p11 }
  0xac   : > { %5279 = shalt.err (!%p5276_p13)
}
  0xad   : > { %s5280_s27 = scalar_lea.vmem %s629_s16, 128  ;;  %p5288_p6 = scmp.lt.s32.totalorder %s629_s16, %s629_s16 }
  0xae   : > { %p5281_p0 = scmp.ne.s32.totalorder %s629_s16, %s5280_s27  ;;  %p5289_p8 = scmp.lt.s32.totalorder %s5280_s27, %s5280_s27 }
  0xb0   : > { %p5283_p2 = pnand %p5281_p0, %p5730_p7  ;;  %p5290_p9 = por %p5289_p8, %p5288_p6 }
  0xb2   : > { %p5284_p4 = pneg %p5283_p2 }
  0xb4   : > { %p5291_p10 = pnand %p5290_p9, %p5284_p4 }
  0xb6   : > { %5294 = shalt.err (!%p5291_p10)
}
  0xb7   : > { %4898 = dma.hbm_to_vmem [thread:$0]  (!%p5714_p5), %s6719_s15, 128, %s629_s16, [#allocation21]  }
  0xb8   : > { %s6762_s2 = sld [smem:[#allocation35_spill]] }
  0xbe   : > { %s5295_s3 = scalar_lea.hbm %s6762_s2, 1152 }
  0xbf   : > { %p5296_p1 = scmp.ne.s32.totalorder %s6762_s2, %s5295_s3  ;;  %p5302_p12 = scmp.lt.u32.totalorder %s5295_s3, %s6762_s2 }
  0xc1   : > { %p5298_p3 = pnand %p5296_p1, %p5730_p7 }
  0xc3   : > { %p5299_p11 = pneg %p5298_p3 }
  0xc5   : > { %p5304_p13 = pnand %p5302_p12, %p5299_p11 }
  0xc7   : > { %5307 = shalt.err (!%p5304_p13)
}
  0xc8   : > { %s5308_s27 = scalar_lea.vmem %s504_s19, 1152  ;;  %p5316_p6 = scmp.lt.s32.totalorder %s504_s19, %s504_s19 }
  0xc9   : > { %p5309_p0 = scmp.ne.s32.totalorder %s504_s19, %s5308_s27  ;;  %p5317_p8 = scmp.lt.s32.totalorder %s5308_s27, %s5308_s27 }
  0xcb   : > { %p5311_p2 = pnand %p5309_p0, %p5730_p7  ;;  %p5318_p9 = por %p5317_p8, %p5316_p6 }
  0xcd   : > { %p5312_p4 = pneg %p5311_p2 }
  0xcf   : > { %p5319_p10 = pnand %p5318_p9, %p5312_p4 }
  0xd1   : > { %5322 = shalt.err (!%p5319_p10)
}
  0xd2   : > { %s5564_s16 = smov 128   ;;  %s5565_s4 = smov 8  }
  0xd3   : > { %4871 = dma.hbm_to_vmem [thread:$0]  (!%p5714_p5), %s6762_s2, 1152, %s504_s19, [#allocation6], %s5564_s16, %s5564_s16, %s5565_s4  }
  0xd4   : > { %s5566_s9 = smov [#allocation10]   ;;  %s5567_s24 = smov [#allocation13]  }
  0xd5   : > { %s529_s3 = sshll.u32 %s5566_s9, 4  ;;  %s555_s28 = sshll.u32 %s5567_s24, 4  ;;  %s530_s3 = int_to_ptr.vmem [resolvable:$true] %s529_s3  ;;  %s556_s28 = int_to_ptr.vmem [resolvable:$true] %s555_s28 }
  0xd6   : > { %s5323_s27 = scalar_lea.hbm %s6709_s5, 48 }
  0xd7   : > { %p5324_p1 = scmp.ne.s32.totalorder %s6709_s5, %s5323_s27  ;;  %p5330_p12 = scmp.lt.u32.totalorder %s5323_s27, %s6709_s5 }
  0xd9   : > { %p5326_p3 = pnand %p5324_p1, %p5730_p7 }
  0xdb   : > { %p5327_p11 = pneg %p5326_p3 }
  0xdd   : > { %p5332_p13 = pnand %p5330_p12, %p5327_p11 }
  0xdf   : > { %5335 = shalt.err (!%p5332_p13)
}
  0xe0   : > { %s5336_s19 = scalar_lea.vmem %s530_s3, 48  ;;  %s5343_s16 = scalar_lea.vmem %s530_s3, 64 }
  0xe1   : > { %p5337_p0 = scmp.ne.s32.totalorder %s530_s3, %s5336_s19  ;;  %p5344_p6 = scmp.lt.s32.totalorder %s530_s3, %s530_s3 }
  0xe2   : > { %p5345_p8 = scmp.lt.s32.totalorder %s5343_s16, %s5336_s19 }
  0xe3   : > { %p5339_p2 = pnand %p5337_p0, %p5730_p7 }
  0xe4   : > { %p5346_p9 = por %p5345_p8, %p5344_p6 }
  0xe5   : > { %p5340_p4 = pneg %p5339_p2 }
  0xe7   : > { %p5347_p10 = pnand %p5346_p9, %p5340_p4 }
  0xe9   : > { %5350 = shalt.err (!%p5347_p10)
}
  0xea   : > { %s6763_s17 = smov 1   ;;  %s6764_s23 = smov 16  }
  0xeb   : > { %4877 = dma.hbm_to_vmem [thread:$0]  (!%p5714_p5), %s6709_s5, 48, %s530_s3, [#allocation9], %s6764_s23, %s6764_s23, %s6763_s17  }
  0xec   : > { %s5351_s13 = scalar_lea.hbm %s6711_s7, 48 }
  0xed   : > { %p5352_p1 = scmp.ne.s32.totalorder %s6711_s7, %s5351_s13  ;;  %p5358_p12 = scmp.lt.u32.totalorder %s5351_s13, %s6711_s7 }
  0xef   : > { %p5354_p3 = pnand %p5352_p1, %p5730_p7 }
  0xf1   : > { %p5355_p11 = pneg %p5354_p3 }
  0xf3   : > { %p5360_p13 = pnand %p5358_p12, %p5355_p11 }
  0xf5   : > { %5363 = shalt.err (!%p5360_p13)
}
  0xf6   : > { %s5364_s27 = scalar_lea.vmem %s556_s28, 48  ;;  %s5371_s3 = scalar_lea.vmem %s556_s28, 64 }
  0xf7   : > { %p5365_p0 = scmp.ne.s32.totalorder %s556_s28, %s5364_s27  ;;  %p5372_p6 = scmp.lt.s32.totalorder %s556_s28, %s556_s28 }
  0xf8   : > { %p5373_p8 = scmp.lt.s32.totalorder %s5371_s3, %s5364_s27 }
  0xf9   : > { %p5367_p2 = pnand %p5365_p0, %p5730_p7 }
  0xfa   : > { %p5374_p9 = por %p5373_p8, %p5372_p6 }
  0xfb   : > { %p5368_p4 = pneg %p5367_p2 }
  0xfd   : > { %p5375_p10 = pnand %p5374_p9, %p5368_p4 }
  0xff   : > { %5378 = shalt.err (!%p5375_p10)
}
 0x100   : > { %4883 = dma.hbm_to_vmem [thread:$0]  (!%p5714_p5), %s6711_s7, 48, %s556_s28, [#allocation12], %s6764_s23, %s6764_s23, %s6763_s17  }
 0x101   : > { %s5568_s6 = smov [#allocation16]   ;;  %s5569_s4 = smov [#allocation19]  }
 0x102   : > { %s584_s8 = sshll.u32 %s5568_s6, 4  ;;  %s617_s29 = sshll.u32 %s5569_s4, 4  ;;  %s585_s8 = int_to_ptr.vmem [resolvable:$true] %s584_s8  ;;  %s618_s29 = int_to_ptr.vmem [resolvable:$true] %s617_s29 }
 0x103   : > { %s5379_s24 = scalar_lea.hbm %s6714_s10, 48 }
 0x104   : > { %p5380_p1 = scmp.ne.s32.totalorder %s6714_s10, %s5379_s24  ;;  %p5386_p12 = scmp.lt.u32.totalorder %s5379_s24, %s6714_s10 }
 0x106   : > { %p5382_p3 = pnand %p5380_p1, %p5730_p7 }
 0x108   : > { %p5383_p11 = pneg %p5382_p3 }
 0x10a   : > { %p5388_p13 = pnand %p5386_p12, %p5383_p11 }
 0x10c   : > { %5391 = shalt.err (!%p5388_p13)
}
 0x10d   : > { %s5392_s28 = scalar_lea.vmem %s585_s8, 48  ;;  %s5399_s19 = scalar_lea.vmem %s585_s8, 64 }
 0x10e   : > { %p5393_p0 = scmp.ne.s32.totalorder %s585_s8, %s5392_s28  ;;  %p5400_p6 = scmp.lt.s32.totalorder %s585_s8, %s585_s8 }
 0x10f   : > { %p5401_p8 = scmp.lt.s32.totalorder %s5399_s19, %s5392_s28 }
 0x110   : > { %p5395_p2 = pnand %p5393_p0, %p5730_p7 }
 0x111   : > { %p5402_p9 = por %p5401_p8, %p5400_p6 }
 0x112   : > { %p5396_p4 = pneg %p5395_p2 }
 0x114   : > { %p5403_p10 = pnand %p5402_p9, %p5396_p4 }
 0x116   : > { %5406 = shalt.err (!%p5403_p10)
}
 0x117   : > { %4889 = dma.hbm_to_vmem [thread:$0]  (!%p5714_p5), %s6714_s10, 48, %s585_s8, [#allocation15], %s6764_s23, %s6764_s23, %s6763_s17  }
 0x118   : > { %s5407_s9 = scalar_lea.hbm %s6718_s14, 16 }
 0x119   : > { %p5408_p1 = scmp.ne.s32.totalorder %s6718_s14, %s5407_s9  ;;  %p5414_p12 = scmp.lt.u32.totalorder %s5407_s9, %s6718_s14 }
 0x11b   : > { %p5410_p3 = pnand %p5408_p1, %p5730_p7 }
 0x11d   : > { %p5411_p11 = pneg %p5410_p3 }
 0x11f   : > { %p5416_p13 = pnand %p5414_p12, %p5411_p11 }
 0x121   : > { %5419 = shalt.err (!%p5416_p13)
}
 0x122   : > { %s5420_s3 = scalar_lea.vmem %s618_s29, 16  ;;  %s5427_s17 = scalar_lea.vmem %s618_s29, 32 }
 0x123   : > { %p5421_p0 = scmp.ne.s32.totalorder %s618_s29, %s5420_s3  ;;  %p5428_p6 = scmp.lt.s32.totalorder %s618_s29, %s618_s29 }
 0x124   : > { %p5429_p8 = scmp.lt.s32.totalorder %s5427_s17, %s5420_s3 }
 0x125   : > { %p5423_p2 = pnand %p5421_p0, %p5730_p7 }
 0x126   : > { %p5430_p9 = por %p5429_p8, %p5428_p6 }
 0x127   : > { %p5424_p4 = pneg %p5423_p2 }
 0x129   : > { %p5431_p10 = pnand %p5430_p9, %p5424_p4 }
 0x12b   : > { %5434 = shalt.err (!%p5431_p10)
}
 0x12c   : > { %4895 = dma.hbm_to_vmem [thread:$0]  (!%p5714_p5), %s6718_s14, 16, %s618_s29, [#allocation18]  }
 0x12d   : > { %s5570_s28 = smov [#allocation22]   ;;  %s5435_s4 = scalar_lea.hbm %s6722_s18, 128 }
 0x12e   : > { %s645_s19 = sshll.u32 %s5570_s28, 4  ;;  %p5436_p1 = scmp.ne.s32.totalorder %s6722_s18, %s5435_s4  ;;  %s646_s19 = int_to_ptr.vmem [resolvable:$true] %s645_s19 }
 0x12f   : > { %p5442_p12 = scmp.lt.u32.totalorder %s5435_s4, %s6722_s18 }
 0x130   : > { %p5438_p3 = pnand %p5436_p1, %p5730_p7 }
 0x132   : > { %p5439_p11 = pneg %p5438_p3 }
 0x134   : > { %p5444_p13 = pnand %p5442_p12, %p5439_p11 }
 0x136   : > { %5447 = shalt.err (!%p5444_p13)
}
 0x137   : > { %s5448_s29 = scalar_lea.vmem %s646_s19, 128  ;;  %p5456_p6 = scmp.lt.s32.totalorder %s646_s19, %s646_s19 }
 0x138   : > { %p5449_p0 = scmp.ne.s32.totalorder %s646_s19, %s5448_s29  ;;  %p5457_p8 = scmp.lt.s32.totalorder %s5448_s29, %s5448_s29 }
 0x13a   : > { %p5451_p2 = pnand %p5449_p0, %p5730_p7  ;;  %p5458_p9 = por %p5457_p8, %p5456_p6 }
 0x13c   : > { %p5452_p4 = pneg %p5451_p2 }
 0x13e   : > { %p5459_p10 = pnand %p5458_p9, %p5452_p4 }
 0x140   : > { %5462 = shalt.err (!%p5459_p10)
}
 0x141   : > { %s6765_s25 = sld [smem:[#allocation30_spill]]  ;;  %s5979_s3 = sadd.s32 1, %s5551_s22  }
 0x142   : > { %4901 = dma.hbm_to_vmem [thread:$0]  (!%p5714_p5), %s6722_s18, 128, %s646_s19, [#allocation21]  }
 0x143   : > { %s47_s26 = sadd.s32 1, %s5547_s1  ;;  %s44_s17 = ssub.s32 %s5551_s22, %s5979_s3 }
 0x144   : > { %p54_p7 = scmp.ne.s32.totalorder %s5547_s1, %s5543_s21  ;;  %p45_p1 = scmp.eq.s32.totalorder %s44_s17, 0 }
 0x145   : > { %p55_p3 = scmp.eq.s32.totalorder %s5551_s22, 0  ;;  %p60_p11 = scmp.ne.s32.totalorder %s5543_s21, %s5539_s20 }
 0x146   : > { %p4918_p12 = scmp.lt.s32.totalorder %s5551_s22, 2  ;;  %s656_s28 = sand.u32 1, %s5547_s1  }
 0x147   : > { %s5991_s23 = scalar_select %p45_p1, %s5547_s1, %s47_s26  }
 0x148   : > { %p56_p13 = por %p55_p3, %p54_p7  ;;  %p6766_p0 = scmp.eq.s32.totalorder %s6765_s25, 0 }
 0x149   : > { %s4091_s19 = sshll.u32 %s5551_s22, 7  ;;  %s4090_s16 = sshll.u32 %s656_s28, 3 }
 0x14a   : > { %p5995_p2 = por %p6766_p0, %p60_p11  ;;  %s6768_s13 = sld [smem:[#allocation32_spill]] }
 0x14b   : > { %s660_s20 = scalar_lea.vmem [#allocation3], %s4090_s16  ;;  %p6006_p5 = pnand %p4918_p12, %p56_p13 }
 0x14c   : > { %s667_s24 = sshll.u32 %s660_s20, 4  ;;  %s657_s22 = scalar_lea.sflag [#allocation4], %s656_s28  ;;  %s6010_s24 = int_to_ptr.vmem [resolvable:$true] %s667_s24 }
 0x14d   : > { %p5465_p6 = pneg %p6006_p5 }
 0x150   : > { %s6004_s9 = scalar_lea.hbm %s6768_s13, %s4091_s19  ;;  %s5468_s25 = scalar_lea.hbm %s6768_s13, 256 }
 0x151   : > { %s5463_s29 = scalar_lea.hbm %s6004_s9, 128  ;;  %p5469_p10 = scmp.lt.u32.totalorder %s6004_s9, %s6768_s13 }
 0x152   : > { %p5464_p4 = scmp.ne.s32.totalorder %s6004_s9, %s5463_s29  ;;  %p5470_p7 = scmp.lt.u32.totalorder %s5468_s25, %s5463_s29 }
 0x153   : > { %p5472_p3 = scmp.lt.u32.totalorder %s5463_s29, %s6004_s9 }
 0x154   : > { %p5466_p8 = pnand %p5465_p6, %p5464_p4  ;;  %p5471_p1 = por %p5470_p7, %p5469_p10 }
 0x156   : > { %p5467_p9 = pneg %p5466_p8  ;;  %p5473_p11 = por %p5472_p3, %p5471_p1 }
 0x158   : > { %p5474_p12 = pnand %p5473_p11, %p5467_p9 }
 0x15a   : > { %5477 = shalt.err (!%p5474_p12)
}
 0x15b   : > { %s5478_s28 = scalar_lea.vmem %s6010_s24, 128  ;;  %s5571_s19 = smov [#allocation3]  }
 0x15c   : > { %p5479_p13 = scmp.ne.s32.totalorder %s6010_s24, %s5478_s28  ;;  %s5483_s16 = sshll.u32 %s5571_s19, 4  ;;  %s5484_s16 = int_to_ptr.vmem [resolvable:$false] %s5483_s16 }
 0x15d   : > { %s5485_s6 = scalar_lea.vmem %s5484_s16, 256  ;;  %p5486_p8 = scmp.lt.s32.totalorder %s6010_s24, %s5484_s16 }
 0x15e   : > { %p5481_p0 = pnand %p5479_p13, %p5465_p6  ;;  %p5487_p10 = scmp.lt.s32.totalorder %s5485_s6, %s5478_s28 }
 0x160   : > { %p5482_p4 = pneg %p5481_p0  ;;  %p5488_p7 = por %p5487_p10, %p5486_p8 }
 0x162   : > { %p5489_p1 = pnand %p5488_p7, %p5482_p4 }
 0x164   : > { %5492 = shalt.err (!%p5489_p1)
}
 0x165   : > { %4905 = dma.hbm_to_vmem [thread:$0]  (!%p6006_p5), %s6004_s9, 128, %s6010_s24, %s657_s22  }
 0x166   : > { %s6770_s4 = sld [smem:[#allocation31_spill]] }
 0x16c   : > { %p6771_p9 = scmp.ne.s32.totalorder %s6770_s4, 0 }
 0x16d   : > { %s678_s20 = sand.u32 (!%p6771_p9), 1, %s5543_s21  }
 0x16e   : > { %676 = sbr.rel (%p6771_p9) target bundleno = 8252 (0x203c), region = 96  ;;  %s6040_s29 = sshll.u32 (!%p6771_p9), %s678_s20, 3 }
 0x16f   : > { %s679_s11 = scalar_lea.sflag (!%p6771_p9), [#allocation4], %s678_s20  ;;  %s682_s27 = scalar_lea.vmem (!%p6771_p9), [#allocation3], %s6040_s29 }
 0x175   : > { %5510 = dma.done.wait (%p5995_p2), %s679_s11, 128  }
 0x176   : > { %5512 = vsyncadd (%p5995_p2), %s679_s11, 4294967168  ;;  %s6772_s0 = sld [smem:[#allocation30_spill]] }
 0x17c   : > { %p6773_p6 = scmp.eq.s32.totalorder %s6772_s0, 0 }
 0x17e   : > { %5514 = dma.done.wait (%p6773_p6), [#allocation6], 1296   ;;  %p6774_p5 = pmov %p6773_p6 }
 0x180   : > { %5516 = vsyncadd (%p6774_p5), [#allocation6], 4294966000  ;;  %p6775_p3 = pmov %p6774_p5 }
 0x182   : > { %5518 = dma.done.wait (%p6775_p3), [#allocation9], 96   ;;  %p6776_p11 = pmov %p6775_p3 }
 0x183   : > { %p6777_p12 = pmov %p6775_p3 }
 0x184   : > { %5520 = vsyncadd (%p6776_p11), [#allocation9], 4294967200 }
 0x185   : > { %5522 = dma.done.wait (%p6777_p12), [#allocation12], 96   ;;  %p6778_p13 = pmov %p6775_p3 }
 0x186   : > { %p6779_p2 = pmov %p6775_p3 }
 0x187   : > { %5524 = vsyncadd (%p6778_p13), [#allocation12], 4294967200 }
 0x188   : > { %5526 = dma.done.wait (%p6779_p2), [#allocation15], 96   ;;  %p6780_p0 = pmov %p6779_p2 }
 0x18a   : > { %5528 = vsyncadd (%p6780_p0), [#allocation15], 4294967200  ;;  %p6781_p4 = pmov %p6780_p0 }
 0x18b   : > { %p6782_p8 = pmov %p6780_p0 }
 0x18c   : > { %5530 = dma.done.wait (%p6781_p4), [#allocation18], 64  }
 0x18d   : > { %5532 = vsyncadd (%p6782_p8), [#allocation18], 4294967232  ;;  %p6783_p10 = pmov %p6780_p0 }
 0x18e   : > { %p6784_p7 = pmov %p6780_p0 }
 0x18f   : > { %5534 = dma.done.wait (%p6783_p10), [#allocation21], 256  }
 0x190   : > { %5536 = vsyncadd (%p6784_p7), [#allocation21], 4294967040  ;;  %v5572_v1 = vmov 0.0   ;;  %s6785_s24 = sld [smem:[#allocation33_spill]]  ;;  %vm828_vm0 = vcmask 1043456   ;;  %v6091_v10 = vld [vmem:[%s682_s27] sm:$0xff]  ;;  %v809_v11 = vlaneseq }
 0x191   : > { %902 = vmatprep.mubr.f32.mxu0 %v5572_v1  ;;  %vm824_vm1 = vcmask 162816   ;;  %v6101_v14 = vld [vmem:[#allocation5] sm:$0x7]  ;;  %s6786_s27 = sld [smem:[#allocation42_spill]]  ;;  %v5573_v44 = vmov 0.0|0.0   ;;  %vm5574_vm2 = vmmov 0  }
 0x192   : > { %v6096_v12 = vshrl.u32 %v809_v11, 7  ;;  %4712 = vmatprep.subr.bf16.mxu1 %v5573_v44  ;;  %4420 = vmatprep.mubr.msk.f32.mxu1 %vm5574_vm2, %v5572_v1  ;;  %vm1137_vm3 = vcmask 64512   ;;  %vm1403_vm4 = vcmask 654336   ;;  %s6787_s29 = sld [smem:[#allocation39_spill]]  ;;  %s6788_s17 = sld [smem:[#allocation40_spill]]  ;;  %vm1692_vm5 = vcmask 261120  }
 0x193   : > { %s6789_s9 = sld [smem:[#allocation41_spill]]  ;;  %p783_p1 = scmp.lt.s32.totalorder %s6772_s0, 1  ;;  %vm3900_vm6 = vcmask 0  }
 0x194   : > { %v6099_v13 = vsub.s32 0, %v6096_v12  ;;  %v6104_v15 = vsub.s32 1, %v6096_v12  ;;  %s6790_s4 = sld [smem:[#allocation43_spill]] }
 0x195   : > { %s6796_s0 = smov (!%p783_p1, %s6772_s0), 1 }
 0x196   : > { %v799_v2 = vld [vmem:[%s6785_s24 + $0x8] sm:$0xff]  ;;  %v802_v3 = vld [vmem:[%s6785_s24 + $0x20] sm:$0xff]  ;;  %v801_v6 = vld [vmem:[%s6785_s24 + $0x18] sm:$0xff]  ;;  %v812_v16 = vrot.slane %v6101_v14, %v6099_v13  ;;  %v816_v17 = vrot.slane %v6101_v14, %v6104_v15 }
 0x197   : > { %v798_v4 = vld [vmem:[%s6785_s24] sm:$0xff]  ;;  %v4708_v5 = vpack.c.bf16 %v802_v3, %v799_v2  ;;  %v805_v8 = vld [vmem:[%s6785_s24 + $0x38] sm:$0xf]  ;;  %v804_v9 = vld [vmem:[%s6785_s24 + $0x30] sm:$0xf] }
 0x198   : > { %v4710_v7 = vpack.c.bf16 %v801_v6, %v798_v4  ;;  %v6113_v19 = vld [vmem:[%s6786_s27] sm:$0xff]  ;;  %v6119_v24 = vld [vmem:[%s6786_s27 + $0x8] sm:$0xff]  ;;  %v6125_v25 = vld [vmem:[%s6786_s27 + $0x10] sm:$0xff] }
 0x199   : > { %4709 = vmatprep.subr.bf16.mxu0 %v4708_v5  ;;  %v6134_v28 = vld [vmem:[%s6786_s27 + $0x18] sm:$0xff]  ;;  %v6140_v29 = vld [vmem:[%s6786_s27 + $0x20] sm:$0xff]  ;;  %v6148_v32 = vld [vmem:[%s6786_s27 + $0x28] sm:$0xff] }
 0x19a   : > { %4711 = vmatpush1.bf16.msra.mxu0 %v4710_v7  ;;  %v6154_v33 = vld [vmem:[%s6786_s27 + $0x30] sm:$0xff]  ;;  %v6162_v36 = vld [vmem:[%s6786_s27 + $0x38] sm:$0xff]  ;;  %v6168_v37 = vld [vmem:[%s6786_s27 + $0x40] sm:$0xff]  ;;  %s785_s20 = scalar_lea.vmem %s6790_s4, %s6796_s0 }
 0x19b   : > { %4106 = vmatprep.subr.msk.mxu0 %vm828_vm0, %v805_v8  ;;  %v6176_v40 = vld [vmem:[%s6786_s27 + $0x48] sm:$0xff]  ;;  %v800_v42 = vld [vmem:[%s6785_s24 + $0x10] sm:$0xff]  ;;  %v806_v46 = vld [vmem:[%s6785_s24 + $0x40] sm:$0xf] }
 0x19c   : > { %v803_v43 = vld [vmem:[%s6785_s24 + $0x28] sm:$0xff] }
 0x19d   : > { %v4713_v45 = vpack.c.bf16 %v803_v43, %v800_v42 }
 0x19e   : > { %4107 = vmatpush1.msk.msra.mxu0 %vm828_vm0, %v804_v9 }
 0x19f   : > { %4108 = vmatmul.mubr.msk.f32.vlgmr.msra.gmra.mrb[0].mxu0 %vm824_vm1, %v6091_v10  ;;  %4714 = vmatpush3.bf16.msra.mxu1 %v4713_v45 }
 0x1a0   : > { %4418 = vmatprep.subr.mxu1 %v5572_v1 }
 0x1a3   : > { %4419 = vmatpush3.msk.msra.mxu1 %vm828_vm0, %v806_v46 }
 0x1a4   : > { %4421 = vmatmul.mubr.msk.f32.vlgmr.msra.gmra.mrb[0].mxu1 %vm824_vm1, %v6091_v10 }
 0x272   : > { %v904_v18 = vpop.f32.mrb[0].mxu0 }
 0x273   : > { %v905_v20 = vadd.f32 %v904_v18, %v812_v16  ;;  %v906_v21 = vpop.f32.mrb[1].mxu0 }
 0x274   : > { %v907_v22 = vadd.f32 %v906_v21, %v816_v17 }
 0x275   : > { %v979_v23 = vmul.f32 %v905_v20, %v6113_v19  ;;  %v980_v26 = vmul.f32 %v905_v20, %v6119_v24  ;;  %v981_v27 = vmul.f32 %v905_v20, %v6125_v25  ;;  %v982_v30 = vmul.f32 %v905_v20, %v6134_v28 }
 0x276   : > { %4423 = vmatprep.subr.msk.mxu0 %vm824_vm1, %v907_v22  ;;  %v983_v31 = vmul.f32 %v905_v20, %v6140_v29  ;;  %v984_v34 = vmul.f32 %v905_v20, %v6148_v32  ;;  %v985_v35 = vmul.f32 %v905_v20, %v6154_v33  ;;  %v986_v38 = vmul.f32 %v905_v20, %v6162_v36 }
 0x277   : > { %4424 = vmatpush3.xpose.msk.msra.mxu0 %vm824_vm1, %v907_v22  ;;  %4425 = vmatprep.mubr.msk.f32.mxu0 %vm824_vm1, %v979_v23  ;;  %v987_v39 = vmul.f32 %v905_v20, %v6168_v37  ;;  %v988_v41 = vmul.f32 %v905_v20, %v6176_v40 }
 0x278   : > { %4715 = vmatprep.subr.bf16.mxu0 %v5573_v44 }
 0x27a   : > { %4426 = vmatmul.mubr.msk.f32.vlgmr.msra.gmra.mrb[2].mxu0 %vm824_vm1, %v980_v26 }
 0x27b   : > { %4428 = vmatprep.mubr.msk.f32.mxu0 %vm824_vm1, %v981_v27 }
 0x27e   : > { %4429 = vmatmul.mubr.msk.f32.gmra.mrb[4].mxu0 %vm824_vm1, %v982_v30 }
 0x27f   : > { %4431 = vmatprep.mubr.msk.f32.mxu0 %vm824_vm1, %v983_v31 }
 0x282   : > { %4432 = vmatmul.mubr.msk.f32.gmra.mrb[6].mxu0 %vm824_vm1, %v984_v34 }
 0x283   : > { %4434 = vmatprep.mubr.msk.f32.mxu0 %vm824_vm1, %v985_v35 }
 0x286   : > { %4435 = vmatmul.mubr.msk.f32.gmra.mrb[8].mxu0 %vm824_vm1, %v986_v38 }
 0x287   : > { %4437 = vmatprep.mubr.msk.f32.mxu0 %vm824_vm1, %v987_v39 }
 0x28a   : > { %4438 = vmatmul.mubr.msk.f32.gmra.mrb[10].mxu0 %vm824_vm1, %v988_v41 }
 0x28b   : > { %4477 = vmatprep.mubr.msk.f32.mxu0 %vm5574_vm2, %v5572_v1 }
 0x34d   : > { %v4427_v47 = vpop.f32.mrb[2].mxu0 }
 0x34e   : > { %v1088_v48 = vpop.f32.mrb[3].mxu0  ;;  %v1141_v52 = vsel %vm1137_vm3, %v4427_v47, -inf }
 0x34f   : > { %v1138_v49 = vsel %vm1137_vm3, %v1088_v48, -inf }
 0x350   : > { %1139 = vmax.xlane.f32.xlu0 %v1138_v49 }
 0x351   : > { %v4430_v50 = vpop.f32.mrb[4].mxu0 }
 0x352   : > { %v1098_v51 = vpop.f32.mrb[5].mxu0  ;;  %v1147_v56 = vsel %vm1137_vm3, %v4430_v50, -inf }
 0x353   : > { %v1144_v53 = vsel %vm1137_vm3, %v1098_v51, -inf }
 0x354   : > { %1142 = vmax.xlane.f32.xlu0 %v1141_v52  ;;  %1145 = vmax.xlane.f32.xlu1 %v1144_v53 }
 0x355   : > { %v4433_v54 = vpop.f32.mrb[6].mxu0 }
 0x356   : > { %v1108_v55 = vpop.f32.mrb[7].mxu0  ;;  %v1153_v60 = vsel %vm1137_vm3, %v4433_v54, -inf }
 0x357   : > { %v1150_v57 = vsel %vm1137_vm3, %v1108_v55, -inf }
 0x358   : > { %1148 = vmax.xlane.f32.xlu1 %v1147_v56  ;;  %1151 = vmax.xlane.f32.xlu0 %v1150_v57 }
 0x359   : > { %v4436_v58 = vpop.f32.mrb[8].mxu0 }
 0x35a   : > { %v1118_v59 = vpop.f32.mrb[9].mxu0  ;;  %v1159_v0 = vsel %vm1137_vm3, %v4436_v58, -inf }
 0x35b   : > { %v1156_v61 = vsel %vm1137_vm3, %v1118_v59, -inf }
 0x35c   : > { %1154 = vmax.xlane.f32.xlu1 %v1153_v60  ;;  %1157 = vmax.xlane.f32.xlu0 %v1156_v61 }
 0x35d   : > { %v4439_v62 = vpop.f32.mrb[10].mxu0 }
 0x35e   : > { %v1128_v63 = vpop.f32.mrb[11].mxu0  ;;  %v1165_v3 = vsel %vm1137_vm3, %v4439_v62, -inf }
 0x35f   : > { %v1162_v2 = vsel %vm1137_vm3, %v1128_v63, -inf }
 0x360   : > { %1160 = vmax.xlane.f32.xlu1 %v1159_v0  ;;  %1163 = vmax.xlane.f32.xlu0 %v1162_v2 }
 0x364   : > { %1166 = vmax.xlane.f32.xlu1 %v1165_v3 }
 0x3dd   : > { %v1140_v4 = vpop.xlane.xlu0 %1139 }
 0x3de   : > { %v1168_v5 = vsub.f32 %v1088_v48, %v1140_v4 }
 0x3e0   : > { %v1178_v6 = vmul.f32 1.442695, %v1168_v5 }
 0x3e1   : > { %v1143_v7 = vpop.xlane.xlu0 %1142  ;;  %v1146_v8 = vpop.xlane.xlu1 %1145 }
 0x3e2   : > { %4984 = vpow2.f32 %v1178_v6  ;;  %v1169_v9 = vsub.f32 %v4427_v47, %v1143_v7  ;;  %v1170_v11 = vsub.f32 %v1098_v51, %v1146_v8  ;;  %v6228_v7 = vsub.s32 2, %v6096_v12 }
 0x3e4   : > { %v1180_v16 = vmul.f32 1.442695, %v1169_v9  ;;  %v1182_v17 = vmul.f32 1.442695, %v1170_v11  ;;  %v820_v8 = vrot.slane %v6101_v14, %v6228_v7  ;;  %v975_v9 = vpop.f32.mrb[0].mxu1 }
 0x3e5   : > { %v1149_v18 = vpop.xlane.xlu1 %1148  ;;  %v1152_v20 = vpop.xlane.xlu0 %1151 }
 0x3e6   : > { %4986 = vpow2.f32 %v1180_v16  ;;  %v1171_v21 = vsub.f32 %v4430_v50, %v1149_v18  ;;  %v1172_v22 = vsub.f32 %v1108_v55, %v1152_v20  ;;  %v976_v11 = vadd.f32 %v975_v9, %v820_v8  ;;  %v4422_v16 = vpop.f32.mrb[1].mxu1 }
 0x3e7   : > { %4988 = vpow2.f32 %v1182_v17 }
 0x3e8   : > { %v1184_v23 = vmul.f32 1.442695, %v1171_v21  ;;  %v1186_v26 = vmul.f32 1.442695, %v1172_v22  ;;  %4440 = vmatprep.subr.mxu1 %v976_v11 }
 0x3e9   : > { %v1155_v27 = vpop.xlane.xlu1 %1154  ;;  %v1158_v30 = vpop.xlane.xlu0 %1157  ;;  %4441 = vmatpush3.msra.mxu1 %v976_v11 }
 0x3ea   : > { %4990 = vpow2.f32 %v1184_v23  ;;  %v1173_v31 = vsub.f32 %v4433_v54, %v1155_v27  ;;  %v1174_v34 = vsub.f32 %v1118_v59, %v1158_v30  ;;  %4730 = vmatprep.subr.bf16.mxu1 %v5573_v44 }
 0x3eb   : > { %4992 = vpow2.f32 %v1186_v26 }
 0x3ec   : > { %v6211_v35 = vpop.eup %4984  ;;  %v1188_v38 = vmul.f32 1.442695, %v1173_v31  ;;  %v1190_v39 = vmul.f32 1.442695, %v1174_v34 }
 0x3ed   : > { %v1161_v41 = vpop.xlane.xlu1 %1160  ;;  %v1164_v42 = vpop.xlane.xlu0 %1163  ;;  %v1198_v43 = vsel %vm1137_vm3, %v6211_v35, 0.0 }
 0x3ee   : > { %4994 = vpow2.f32 %v1188_v38  ;;  %v1175_v45 = vsub.f32 %v4436_v58, %v1161_v41  ;;  %v1176_v46 = vsub.f32 %v1128_v63, %v1164_v42  ;;  %1199 = vadd.xlane.f32.xlu0 %v1198_v43 }
 0x3ef   : > { %4996 = vpow2.f32 %v1190_v39 }
 0x3f0   : > { %v4987_v47 = vpop.eup %4986  ;;  %v1192_v48 = vmul.f32 1.442695, %v1175_v45  ;;  %v1194_v49 = vmul.f32 1.442695, %v1176_v46 }
 0x3f1   : > { %v6215_v50 = vpop.eup %4988  ;;  %v1167_v51 = vpop.xlane.xlu1 %1166  ;;  %v1201_v52 = vsel %vm1137_vm3, %v4987_v47, 0.0 }
 0x3f2   : > { %4998 = vpow2.f32 %v1192_v48  ;;  %v1177_v53 = vsub.f32 %v4439_v62, %v1167_v51  ;;  %1202 = vadd.xlane.f32.xlu1 %v1201_v52  ;;  %v1204_v54 = vsel %vm1137_vm3, %v6215_v50, 0.0 }
 0x3f3   : > { %5000 = vpow2.f32 %v1194_v49  ;;  %1205 = vadd.xlane.f32.xlu0 %v1204_v54 }
 0x3f4   : > { %v4991_v55 = vpop.eup %4990  ;;  %v1196_v56 = vmul.f32 1.442695, %v1177_v53 }
 0x3f5   : > { %v4993_v57 = vpop.eup %4992  ;;  %v1207_v58 = vsel %vm1137_vm3, %v4991_v55, 0.0 }
 0x3f6   : > { %5002 = vpow2.f32 %v1196_v56  ;;  %1208 = vadd.xlane.f32.xlu1 %v1207_v58  ;;  %v1210_v59 = vsel %vm1137_vm3, %v4993_v57, 0.0  ;;  %v1477_v56 = vld [vmem:[#allocation7] sm:$0xff] }
 0x3f7   : > { %1211 = vadd.xlane.f32.xlu0 %v1210_v59  ;;  %v1479_v59 = vld [vmem:[#allocation7 + $0x10] sm:$0xf] }
 0x3f8   : > { %v4995_v60 = vpop.eup %4994 }
 0x3f9   : > { %v4997_v61 = vpop.eup %4996  ;;  %v1213_v62 = vsel %vm1137_vm3, %v4995_v60, 0.0 }
 0x3fa   : > { %1214 = vadd.xlane.f32.xlu1 %v1213_v62  ;;  %v1216_v63 = vsel %vm1137_vm3, %v4997_v61, 0.0 }
 0x3fb   : > { %1217 = vadd.xlane.f32.xlu0 %v1216_v63 }
 0x3fc   : > { %v4999_v0 = vpop.eup %4998 }
 0x3fd   : > { %v5001_v2 = vpop.eup %5000  ;;  %v1219_v3 = vsel %vm1137_vm3, %v4999_v0, 0.0 }
 0x3fe   : > { %1220 = vadd.xlane.f32.xlu1 %v1219_v3  ;;  %v1222_v4 = vsel %vm1137_vm3, %v5001_v2, 0.0 }
 0x3ff   : > { %1223 = vadd.xlane.f32.xlu0 %v1222_v4 }
 0x400   : > { %v5003_v5 = vpop.eup %5002 }
 0x401   : > { %v1225_v6 = vsel %vm1137_vm3, %v5003_v5, 0.0 }
 0x402   : > { %1226 = vadd.xlane.f32.xlu1 %v1225_v6 }
 0x47b   : > { %v1200_v17 = vpop.xlane.xlu0 %1199 }
 0x47c   : > { %5004 = vrcp.f32 %v1200_v17 }
 0x47f   : > { %v1203_v18 = vpop.xlane.xlu1 %1202 }
 0x480   : > { %5006 = vrcp.f32 %v1203_v18  ;;  %v1206_v20 = vpop.xlane.xlu0 %1205 }
 0x481   : > { %5008 = vrcp.f32 %v1206_v20 }
 0x483   : > { %v1209_v21 = vpop.xlane.xlu1 %1208 }
 0x484   : > { %5010 = vrcp.f32 %v1209_v21  ;;  %v1212_v12 = vpop.xlane.xlu0 %1211 }
 0x485   : > { %5012 = vrcp.f32 %v1212_v12 }
 0x486   : > { %v5005_v22 = vpop.eup %5004 }
 0x487   : > { %v1215_v23 = vpop.xlane.xlu1 %1214  ;;  %v1238_v14 = vmul.f32 %v5005_v22, %v6211_v35 }
 0x488   : > { %5014 = vrcp.f32 %v1215_v23  ;;  %v1218_v26 = vpop.xlane.xlu0 %1217 }
 0x489   : > { %5016 = vrcp.f32 %v1218_v26  ;;  %4442 = vmatprep.mubr.msk.f32.mxu1 %vm1137_vm3, %v1238_v14 }
 0x48a   : > { %v5007_v27 = vpop.eup %5006 }
 0x48b   : > { %v5009_v30 = vpop.eup %5008  ;;  %v1239_v31 = vmul.f32 %v5007_v27, %v4987_v47  ;;  %v1221_v34 = vpop.xlane.xlu1 %1220 }
 0x48c   : > { %5018 = vrcp.f32 %v1221_v34  ;;  %v1224_v38 = vpop.xlane.xlu0 %1223  ;;  %v1240_v39 = vmul.f32 %v5009_v30, %v6215_v50 }
 0x48d   : > { %5020 = vrcp.f32 %v1224_v38  ;;  %4443 = vmatmul.mubr.msk.f32.vlgmr.msra.gmra.mrb[2].mxu1 %vm1137_vm3, %v1239_v31  ;;  %v6264_v31 = vld [vmem:[#allocation22] sm:$0xff] }
 0x48e   : > { %v5011_v41 = vpop.eup %5010  ;;  %4445 = vmatprep.mubr.msk.f32.mxu1 %vm1137_vm3, %v1240_v39  ;;  %v4133_v39 = vld [vmem:[#allocation8] ss:$0 sm:$0xff] }
 0x48f   : > { %v5013_v35 = vpop.eup %5012  ;;  %v1227_v42 = vpop.xlane.xlu1 %1226  ;;  %v1241_v43 = vmul.f32 %v5011_v41, %v4991_v55 }
 0x490   : > { %5022 = vrcp.f32 %v1227_v42  ;;  %v1242_v45 = vmul.f32 %v5013_v35, %v4993_v57  ;;  %v1478_v57 = vld [vmem:[#allocation7 + $0x8] sm:$0xff] }
 0x491   : > { %4446 = vmatmul.mubr.msk.f32.gmra.mrb[4].mxu1 %vm1137_vm3, %v1241_v43  ;;  %v4731_v58 = vpack.c.bf16 %v1478_v57, %v1477_v56 }
 0x492   : > { %v5015_v46 = vpop.eup %5014  ;;  %4448 = vmatprep.mubr.msk.f32.mxu1 %vm1137_vm3, %v1242_v45 }
 0x493   : > { %v5017_v47 = vpop.eup %5016  ;;  %v1243_v48 = vmul.f32 %v5015_v46, %v4995_v60  ;;  %4732 = vmatpush3.bf16.msra.mxu1 %v4731_v58 }
 0x494   : > { %v1244_v49 = vmul.f32 %v5017_v47, %v4997_v61  ;;  %4484 = vmatprep.subr.mxu1 %v5572_v1 }
 0x495   : > { %4449 = vmatmul.mubr.msk.f32.gmra.mrb[6].mxu1 %vm1137_vm3, %v1243_v48 }
 0x496   : > { %v5019_v50 = vpop.eup %5018  ;;  %4451 = vmatprep.mubr.msk.f32.mxu1 %vm1137_vm3, %v1244_v49 }
 0x497   : > { %v5021_v51 = vpop.eup %5020  ;;  %v1245_v52 = vmul.f32 %v5019_v50, %v4999_v0  ;;  %4485 = vmatpush3.msk.msra.mxu1 %vm828_vm0, %v1479_v59 }
 0x498   : > { %v1246_v53 = vmul.f32 %v5021_v51, %v5001_v2  ;;  %4736 = vmatprep.subr.bf16.mxu1 %v5573_v44  ;;  %v1594_v51 = vld [vmem:[%s6787_s29] sm:$0xff] }
 0x499   : > { %4452 = vmatmul.mubr.msk.f32.gmra.mrb[8].mxu1 %vm1137_vm3, %v1245_v52  ;;  %v1595_v52 = vld [vmem:[%s6787_s29 + $0x8] sm:$0xff] }
 0x49a   : > { %v5023_v54 = vpop.eup %5022  ;;  %4454 = vmatprep.mubr.msk.f32.mxu1 %vm1137_vm3, %v1246_v53  ;;  %v4734_v53 = vpack.c.bf16 %v1595_v52, %v1594_v51 }
 0x49b   : > { %v1247_v55 = vmul.f32 %v5023_v54, %v5003_v5  ;;  %v1681_v54 = vld [vmem:[%s6788_s17] sm:$0xff] }
 0x49d   : > { %4455 = vmatmul.mubr.msk.f32.gmra.mrb[10].mxu1 %vm1137_vm3, %v1247_v55  ;;  %v1682_v55 = vld [vmem:[%s6788_s17 + $0x8] sm:$0xff] }
 0x49e   : > { %4486 = vmatprep.mubr.msk.f32.mxu1 %vm5574_vm2, %v5572_v1  ;;  %v4737_v56 = vpack.c.bf16 %v1682_v55, %v1681_v54  ;;  %v4144_v55 = vld [vmem:[#allocation14] ss:$0 sm:$0xff] }
 0x560   : > { %v4444_v60 = vpop.f32.mrb[2].mxu1 }
 0x561   : > { %v1394_v61 = vmul.f32 %v4444_v60, %v6119_v24  ;;  %v1344_v62 = vpop.f32.mrb[3].mxu1 }
 0x562   : > { %v1393_v63 = vmul.f32 %v1344_v62, %v6113_v19 }
 0x564   : > { %v4716_v0 = vpack.c.bf16 %v1394_v61, %v1393_v63  ;;  %v4447_v2 = vpop.f32.mrb[4].mxu1  ;;  %v4136_v61 = vld [vmem:[#allocation10] ss:$0 sm:$0xff]  ;;  %v4137_v63 = vld [vmem:[#allocation11] ss:$0 sm:$0xff] }
 0x565   : > { %v1396_v3 = vmul.f32 %v4447_v2, %v6134_v28  ;;  %v1354_v4 = vpop.f32.mrb[5].mxu1 }
 0x566   : > { %v1395_v5 = vmul.f32 %v1354_v4, %v6125_v25  ;;  %4717 = vmatpush3.bf16.msra.mxu0 %v4716_v0  ;;  %v1684_v4 = vld [vmem:[%s6788_s17 + $0x18] sm:$0xff] }
 0x567   : > { %4718 = vmatprep.subr.bf16.mxu0 %v5573_v44 }
 0x568   : > { %v4719_v6 = vpack.c.bf16 %v1396_v3, %v1395_v5  ;;  %v4450_v8 = vpop.f32.mrb[6].mxu1  ;;  %v1683_v3 = vld [vmem:[%s6788_s17 + $0x10] sm:$0xff] }
 0x569   : > { %v1398_v9 = vmul.f32 %v4450_v8, %v6148_v32  ;;  %v1364_v11 = vpop.f32.mrb[7].mxu1  ;;  %v4740_v5 = vpack.c.bf16 %v1684_v4, %v1683_v3 }
 0x56a   : > { %v1397_v16 = vmul.f32 %v1364_v11, %v6140_v29  ;;  %4720 = vmatpush3.bf16.msra.mxu0 %v4719_v6  ;;  %v4138_v6 = vld [vmem:[#allocation16] ss:$0 sm:$0xff] }
 0x56b   : > { %4721 = vmatprep.subr.bf16.mxu0 %v5573_v44 }
 0x56c   : > { %v4722_v17 = vpack.c.bf16 %v1398_v9, %v1397_v16  ;;  %v4453_v18 = vpop.f32.mrb[8].mxu1 }
 0x56d   : > { %v1400_v20 = vmul.f32 %v4453_v18, %v6162_v36  ;;  %v1374_v21 = vpop.f32.mrb[9].mxu1 }
 0x56e   : > { %v1399_v12 = vmul.f32 %v1374_v21, %v6154_v33  ;;  %4723 = vmatpush3.bf16.msra.mxu0 %v4722_v17  ;;  %v4141_v17 = vld [vmem:[#allocation17] ss:$0 sm:$0xff] }
 0x56f   : > { %4724 = vmatprep.subr.bf16.mxu0 %v5573_v44 }
 0x570   : > { %v4725_v22 = vpack.c.bf16 %v1400_v20, %v1399_v12  ;;  %v4456_v23 = vpop.f32.mrb[10].mxu1 }
 0x571   : > { %v1402_v14 = vmul.f32 %v4456_v23, %v6176_v40  ;;  %v1384_v26 = vpop.f32.mrb[11].mxu1 }
 0x572   : > { %v1401_v27 = vmul.f32 %v1384_v26, %v6168_v37  ;;  %4726 = vmatpush3.bf16.msra.mxu0 %v4725_v22 }
 0x573   : > { %4727 = vmatprep.subr.bf16.mxu0 %v5573_v44 }
 0x574   : > { %v4728_v30 = vpack.c.bf16 %v1402_v14, %v1401_v27 }
 0x576   : > { %4729 = vmatpush3.bf16.msra.mxu0 %v4728_v30 }
 0x577   : > { %4733 = vmatprep.subr.bf16.mxu0 %v5573_v44 }
 0x579   : > { %4478 = vmatmul.mubr.msk.f32.vlgmr.msra.gmra.mrb[12].mxu0 %vm1403_vm4, %v6264_v31 }
 0x57a   : > { %4495 = vmatprep.mubr.msk.f32.mxu0 %vm5574_vm2, %v5572_v1  ;;  %4735 = vmatpush3.bf16.msra.mxu0 %v4734_v53 }
 0x57b   : > { %4493 = vmatprep.subr.mxu0 %v5572_v1 }
 0x64c   : > { %v1473_v34 = vpop.f32.mrb[12].mxu0 }
 0x64d   : > { %v4479_v38 = vpop.f32.mrb[13].mxu0  ;;  %4487 = vmatmul.mubr.msk.f32.vlgmr.msra.gmra.mrb[12].mxu1 %vm824_vm1, %v1473_v34  ;;  %v4146_v34 = vld [vmem:[%s6785_s24 + $0x50] sm:$0xff] }
 0x64e   : > { %4506 = vmatprep.mubr.msk.f32.mxu1 %vm5574_vm2, %v5572_v1  ;;  %4738 = vmatpush3.bf16.msra.mxu1 %v4737_v56  ;;  %v4149_v38 = vld [vmem:[%s6785_s24 + $0x68] sm:$0xff] }
 0x64f   : > { %4739 = vmatprep.subr.bf16.mxu1 %v5573_v44 }
 0x652   : > { %4741 = vmatpush3.bf16.msra.mxu1 %v4740_v5 }
 0x653   : > { %4746 = vmatprep.subr.bf16.mxu1 %v5573_v44 }
 0x720   : > { %v1559_v41 = vpop.f32.mrb[12].mxu1 }
 0x721   : > { %v1560_v35 = vadd.f32 %v4133_v39, %v1559_v41  ;;  %v4488_v42 = vpop.f32.mrb[13].mxu1  ;;  %v4742_v39 = vpack.c.bf16 %v4149_v38, %v4146_v34  ;;  %v4145_v41 = vld [vmem:[%s6785_s24 + $0x48] sm:$0xff] }
 0x722   : > { %v4147_v42 = vld [vmem:[%s6785_s24 + $0x58] sm:$0xff] }
 0x723   : > { %v1563_v43 = vadd.f32 %v1560_v35, %v6091_v10  ;;  %v1596_v10 = vld [vmem:[%s6787_s29 + $0x10] sm:$0xf]  ;;  %v4148_v35 = vld [vmem:[%s6785_s24 + $0x60] sm:$0xff] }
 0x724   : > { %4494 = vmatpush3.msk.msra.mxu0 %vm828_vm0, %v1596_v10  ;;  %v4143_v10 = vld [vmem:[#allocation13] ss:$0 sm:$0xff] }
 0x725   : > { %v1566_v45 = vsel %vm824_vm1, %v1563_v43, 0.0  ;;  %4743 = vmatprep.subr.bf16.mxu0 %v4742_v39 }
 0x726   : > { %1567 = vadd.xlane.f32.xlu0 %v1566_v45  ;;  %v4150_v45 = vld [vmem:[%s6785_s24 + $0x70] sm:$0xff] }
 0x7b3   : > { %v1568_v46 = vpop.xlane.xlu0 %1567 }
 0x7b4   : > { %v1570_v47 = vmul.f32 0.05, %v1568_v46  ;;  %v4152_v46 = vld [vmem:[%s6785_s24 + $0x80] sm:$0xf] }
 0x7b6   : > { %v1571_v48 = vsub.f32 %v1563_v43, %v1570_v47  ;;  %v4744_v43 = vpack.c.bf16 %v4148_v35, %v4145_v41  ;;  %v4747_v47 = vpack.c.bf16 %v4150_v45, %v4147_v42 }
 0x7b8   : > { %v1572_v49 = vmul.f32 %v1571_v48, %v1571_v48 }
 0x7ba   : > { %v1573_v50 = vsel %vm824_vm1, %v1572_v49, 0.0  ;;  %v4153_v49 = vld [vmem:[%s6785_s24 + $0x88] sm:$0xf] }
 0x7bb   : > { %1574 = vadd.xlane.f32.xlu1 %v1573_v50 }
 0x848   : > { %v1575_v57 = vpop.xlane.xlu1 %1574 }
 0x849   : > { %v1576_v58 = vmul.f32 0.05, %v1575_v57 }
 0x84b   : > { %v1577_v59 = vadd.f32 1e-05, %v1576_v58  ;;  %v1807_v58 = vld [vmem:[#allocation5 + $0x3] sm:$0x7] }
 0x84d   : > { %5024 = vrsqrt.f32 %v1577_v59  ;;  %v1812_v59 = vrot.slane %v1807_v58, %v6099_v13 }
 0x857   : > { %v5025_v60 = vpop.eup %5024 }
 0x858   : > { %v1579_v62 = vmul.f32 %v5025_v60, %v1571_v48  ;;  %v4151_v48 = vld [vmem:[%s6785_s24 + $0x78] sm:$0xf]  ;;  %v1820_v60 = vrot.slane %v1807_v58, %v6228_v7 }
 0x85a   : > { %v1586_v0 = vmul.f32 %v4136_v61, %v1579_v62  ;;  %v1816_v61 = vrot.slane %v1807_v58, %v6104_v15 }
 0x85c   : > { %v1593_v2 = vadd.f32 %v4137_v63, %v1586_v0 }
 0x85e   : > { %4496 = vmatmul.mubr.msk.f32.vlgmr.msra.gmra.mrb[14].mxu0 %vm824_vm1, %v1593_v2 }
 0x85f   : > { %1900 = vmatprep.mubr.f32.mxu0 %v5572_v1  ;;  %4745 = vmatpush1.bf16.msra.mxu0 %v4744_v43 }
 0x860   : > { %4154 = vmatprep.subr.msk.mxu0 %vm828_vm0, %v4152_v46 }
 0x863   : > { %4155 = vmatpush1.msk.msra.mxu0 %vm828_vm0, %v4151_v48 }
 0x931   : > { %v1676_v8 = vpop.f32.mrb[14].mxu0 }
 0x932   : > { %v1677_v9 = vadd.f32 %v4138_v6, %v1676_v8  ;;  %v4497_v11 = vpop.f32.mrb[15].mxu0 }
 0x934   : > { %v1680_v16 = vmax.f32 %v1677_v9, 0.0 }
 0x936   : > { %4507 = vmatmul.mubr.msk.f32.vlgmr.msra.gmra.mrb[14].mxu1 %vm1692_vm5, %v1680_v16 }
 0x937   : > { %4515 = vmatprep.mubr.msk.f32.mxu1 %vm5574_vm2, %v5572_v1  ;;  %4748 = vmatpush3.bf16.msra.mxu1 %v4747_v47 }
 0x938   : > { %4513 = vmatprep.subr.mxu1 %v5572_v1 }
 0x93b   : > { %4514 = vmatpush3.msk.msra.mxu1 %vm828_vm0, %v4153_v49 }
 0xa09   : > { %v1762_v18 = vpop.f32.mrb[14].mxu1 }
 0xa0a   : > { %v1763_v20 = vadd.f32 %v4141_v17, %v1762_v18  ;;  %v4508_v21 = vpop.f32.mrb[15].mxu1 }
 0xa0c   : > { %v1766_v12 = vadd.f32 %v1763_v20, %v1593_v2 }
 0xa0e   : > { %v1769_v22 = vsel %vm824_vm1, %v1766_v12, 0.0 }
 0xa0f   : > { %1770 = vadd.xlane.f32.xlu0 %v1769_v22 }
 0xa9c   : > { %v1771_v23 = vpop.xlane.xlu0 %1770 }
 0xa9d   : > { %v1772_v14 = vmul.f32 0.05, %v1771_v23 }
 0xa9f   : > { %v1773_v26 = vsub.f32 %v1766_v12, %v1772_v14 }
 0xaa1   : > { %v1774_v27 = vmul.f32 %v1773_v26, %v1773_v26 }
 0xaa3   : > { %v1775_v30 = vsel %vm824_vm1, %v1774_v27, 0.0 }
 0xaa4   : > { %1776 = vadd.xlane.f32.xlu1 %v1775_v30 }
 0xb31   : > { %v1777_v50 = vpop.xlane.xlu1 %1776 }
 0xb32   : > { %v1778_v51 = vmul.f32 0.05, %v1777_v50 }
 0xb34   : > { %v1779_v52 = vadd.f32 1e-05, %v1778_v51 }
 0xb36   : > { %5026 = vrsqrt.f32 %v1779_v52 }
 0xb40   : > { %v5027_v53 = vpop.eup %5026 }
 0xb41   : > { %v1781_v54 = vmul.f32 %v5027_v53, %v1773_v26 }
 0xb43   : > { %v1788_v56 = vmul.f32 %v4143_v10, %v1781_v54 }
 0xb45   : > { %v6340_v57 = vadd.f32 %v4144_v55, %v1788_v56 }
 0xb47   : > { %4156 = vmatmul.mubr.msk.f32.vlgmr.msra.gmra.mrb[16].mxu0 %vm824_vm1, %v6340_v57  ;;  %4516 = vmatmul.mubr.msk.f32.vlgmr.msra.gmra.mrb[16].mxu1 %vm824_vm1, %v6340_v57 }
 0xc1a   : > { %v1902_v62 = vpop.f32.mrb[16].mxu0  ;;  %v1973_v63 = vpop.f32.mrb[16].mxu1 }
 0xc1b   : > { %v1903_v0 = vadd.f32 %v1902_v62, %v1812_v59  ;;  %v1974_v2 = vadd.f32 %v1973_v63, %v1820_v60  ;;  %v1904_v3 = vpop.f32.mrb[17].mxu0  ;;  %v4517_v4 = vpop.f32.mrb[17].mxu1 }
 0xc1c   : > { %v1905_v5 = vadd.f32 %v1904_v3, %v1816_v61 }
 0xc1d   : > { %4535 = vmatprep.subr.mxu1 %v1974_v2  ;;  %v1977_v6 = vmul.f32 %v1903_v0, %v6113_v19  ;;  %v1978_v8 = vmul.f32 %v1903_v0, %v6119_v24  ;;  %v1979_v9 = vmul.f32 %v1903_v0, %v6125_v25  ;;  %v1980_v19 = vmul.f32 %v1903_v0, %v6134_v28 }
 0xc1e   : > { %4518 = vmatprep.subr.msk.mxu0 %vm824_vm1, %v1905_v5  ;;  %4536 = vmatpush3.msra.mxu1 %v1974_v2  ;;  %v1981_v11 = vmul.f32 %v1903_v0, %v6140_v29  ;;  %v1982_v24 = vmul.f32 %v1903_v0, %v6148_v32  ;;  %v1983_v16 = vmul.f32 %v1903_v0, %v6154_v33 }
 0xc1f   : > { %4519 = vmatpush3.xpose.msk.msra.mxu0 %vm824_vm1, %v1905_v5  ;;  %4520 = vmatprep.mubr.msk.f32.mxu0 %vm824_vm1, %v1977_v6  ;;  %v1984_v25 = vmul.f32 %v1903_v0, %v6162_v36  ;;  %v1985_v17 = vmul.f32 %v1903_v0, %v6168_v37  ;;  %v1986_v28 = vmul.f32 %v1903_v0, %v6176_v40 }
 0xc20   : > { %4749 = vmatprep.subr.bf16.mxu0 %v5573_v44  ;;  %4764 = vmatprep.subr.bf16.mxu1 %v5573_v44 }
 0xc22   : > { %4521 = vmatmul.mubr.msk.f32.vlgmr.msra.gmra.mrb[18].mxu0 %vm824_vm1, %v1978_v8 }
 0xc23   : > { %4523 = vmatprep.mubr.msk.f32.mxu0 %vm824_vm1, %v1979_v9 }
 0xc26   : > { %4524 = vmatmul.mubr.msk.f32.gmra.mrb[20].mxu0 %vm824_vm1, %v1980_v19 }
 0xc27   : > { %4526 = vmatprep.mubr.msk.f32.mxu0 %vm824_vm1, %v1981_v11 }
 0xc2a   : > { %4527 = vmatmul.mubr.msk.f32.gmra.mrb[22].mxu0 %vm824_vm1, %v1982_v24 }
 0xc2b   : > { %4529 = vmatprep.mubr.msk.f32.mxu0 %vm824_vm1, %v1983_v16 }
 0xc2e   : > { %4530 = vmatmul.mubr.msk.f32.gmra.mrb[24].mxu0 %vm824_vm1, %v1984_v25 }
 0xc2f   : > { %4532 = vmatprep.mubr.msk.f32.mxu0 %vm824_vm1, %v1985_v17 }
 0xc32   : > { %4533 = vmatmul.mubr.msk.f32.gmra.mrb[26].mxu0 %vm824_vm1, %v1986_v28 }
 0xc33   : > { %4572 = vmatprep.mubr.msk.f32.mxu0 %vm5574_vm2, %v5572_v1 }
 0xcf5   : > { %v4522_v29 = vpop.f32.mrb[18].mxu0 }
 0xcf6   : > { %v2086_v32 = vpop.f32.mrb[19].mxu0  ;;  %v2138_v33 = vsel %vm1137_vm3, %v4522_v29, -inf }
 0xcf7   : > { %2139 = vmax.xlane.f32.xlu1 %v2138_v33  ;;  %v2135_v36 = vsel %vm1137_vm3, %v2086_v32, -inf }
 0xcf8   : > { %2136 = vmax.xlane.f32.xlu0 %v2135_v36 }
 0xcf9   : > { %v4525_v37 = vpop.f32.mrb[20].mxu0 }
 0xcfa   : > { %v2096_v18 = vpop.f32.mrb[21].mxu0  ;;  %v2144_v20 = vsel %vm1137_vm3, %v4525_v37, -inf }
 0xcfb   : > { %2145 = vmax.xlane.f32.xlu1 %v2144_v20  ;;  %v2141_v40 = vsel %vm1137_vm3, %v2096_v18, -inf }
 0xcfc   : > { %2142 = vmax.xlane.f32.xlu0 %v2141_v40 }
 0xcfd   : > { %v4528_v21 = vpop.f32.mrb[22].mxu0 }
 0xcfe   : > { %v2106_v12 = vpop.f32.mrb[23].mxu0  ;;  %v2150_v22 = vsel %vm1137_vm3, %v4528_v21, -inf }
 0xcff   : > { %2151 = vmax.xlane.f32.xlu1 %v2150_v22  ;;  %v2147_v23 = vsel %vm1137_vm3, %v2106_v12, -inf }
 0xd00   : > { %2148 = vmax.xlane.f32.xlu0 %v2147_v23 }
 0xd01   : > { %v4531_v14 = vpop.f32.mrb[24].mxu0 }
 0xd02   : > { %v2116_v26 = vpop.f32.mrb[25].mxu0  ;;  %v2156_v27 = vsel %vm1137_vm3, %v4531_v14, -inf }
 0xd03   : > { %2157 = vmax.xlane.f32.xlu1 %v2156_v27  ;;  %v2153_v30 = vsel %vm1137_vm3, %v2116_v26, -inf }
 0xd04   : > { %2154 = vmax.xlane.f32.xlu0 %v2153_v30 }
 0xd05   : > { %v4534_v34 = vpop.f32.mrb[26].mxu0 }
 0xd06   : > { %v2126_v38 = vpop.f32.mrb[27].mxu0  ;;  %v2162_v39 = vsel %vm1137_vm3, %v4534_v34, -inf }
 0xd07   : > { %2163 = vmax.xlane.f32.xlu1 %v2162_v39  ;;  %v2159_v41 = vsel %vm1137_vm3, %v2126_v38, -inf }
 0xd08   : > { %2160 = vmax.xlane.f32.xlu0 %v2159_v41 }
 0xd84   : > { %v2140_v35 = vpop.xlane.xlu1 %2139 }
 0xd85   : > { %v2166_v42 = vsub.f32 %v4522_v29, %v2140_v35  ;;  %v2137_v43 = vpop.xlane.xlu0 %2136 }
 0xd86   : > { %v2165_v45 = vsub.f32 %v2086_v32, %v2137_v43 }
 0xd87   : > { %v2177_v46 = vmul.f32 1.442695, %v2166_v42 }
 0xd88   : > { %v2175_v47 = vmul.f32 1.442695, %v2165_v45  ;;  %v2146_v48 = vpop.xlane.xlu1 %2145 }
 0xd89   : > { %5028 = vpow2.f32 %v2177_v46  ;;  %v2168_v49 = vsub.f32 %v4525_v37, %v2146_v48  ;;  %v2143_v50 = vpop.xlane.xlu0 %2142 }
 0xd8a   : > { %5030 = vpow2.f32 %v2175_v47  ;;  %v2167_v51 = vsub.f32 %v2096_v18, %v2143_v50 }
 0xd8b   : > { %v2181_v52 = vmul.f32 1.442695, %v2168_v49 }
 0xd8c   : > { %v2179_v53 = vmul.f32 1.442695, %v2167_v51  ;;  %v2152_v10 = vpop.xlane.xlu1 %2151 }
 0xd8d   : > { %5032 = vpow2.f32 %v2181_v52  ;;  %v2170_v54 = vsub.f32 %v4528_v21, %v2152_v10  ;;  %v2149_v55 = vpop.xlane.xlu0 %2148 }
 0xd8e   : > { %5034 = vpow2.f32 %v2179_v53  ;;  %v2169_v56 = vsub.f32 %v2106_v12, %v2149_v55 }
 0xd8f   : > { %v2185_v58 = vmul.f32 1.442695, %v2170_v54 }
 0xd90   : > { %v2183_v59 = vmul.f32 1.442695, %v2169_v56  ;;  %v2158_v60 = vpop.xlane.xlu1 %2157 }
 0xd91   : > { %5036 = vpow2.f32 %v2185_v58  ;;  %v2172_v61 = vsub.f32 %v4531_v14, %v2158_v60  ;;  %v2155_v62 = vpop.xlane.xlu0 %2154 }
 0xd92   : > { %5038 = vpow2.f32 %v2183_v59  ;;  %v2171_v63 = vsub.f32 %v2116_v26, %v2155_v62 }
 0xd93   : > { %v5029_v0 = vpop.eup %5028  ;;  %v2189_v2 = vmul.f32 1.442695, %v2172_v61 }
 0xd94   : > { %v5031_v3 = vpop.eup %5030  ;;  %v2187_v4 = vmul.f32 1.442695, %v2171_v63  ;;  %v2164_v5 = vpop.xlane.xlu1 %2163  ;;  %v2198_v6 = vsel %vm1137_vm3, %v5029_v0, 0.0 }
 0xd95   : > { %5040 = vpow2.f32 %v2189_v2  ;;  %v2174_v8 = vsub.f32 %v4534_v34, %v2164_v5  ;;  %2199 = vadd.xlane.f32.xlu1 %v2198_v6  ;;  %v2161_v9 = vpop.xlane.xlu0 %2160  ;;  %v2195_v19 = vsel %vm1137_vm3, %v5031_v3, 0.0  ;;  %v2471_v2 = vld [vmem:[#allocation7 + $0x18] sm:$0xff]  ;;  %v2473_v5 = vld [vmem:[#allocation7 + $0x28] sm:$0xf] }
 0xd96   : > { %5042 = vpow2.f32 %v2187_v4  ;;  %v2173_v11 = vsub.f32 %v2126_v38, %v2161_v9  ;;  %2196 = vadd.xlane.f32.xlu0 %v2195_v19 }
 0xd97   : > { %v5033_v24 = vpop.eup %5032  ;;  %v2193_v16 = vmul.f32 1.442695, %v2174_v8  ;;  %v6413_v8 = vld [vmem:[%s6786_s27 + $0x8] sm:$0xff] }
 0xd98   : > { %v5035_v25 = vpop.eup %5034  ;;  %v2191_v17 = vmul.f32 1.442695, %v2173_v11  ;;  %v2204_v28 = vsel %vm1137_vm3, %v5033_v24, 0.0  ;;  %v6419_v11 = vld [vmem:[%s6786_s27] sm:$0xff] }
 0xd99   : > { %5044 = vpow2.f32 %v2193_v16  ;;  %2205 = vadd.xlane.f32.xlu1 %v2204_v28  ;;  %v2201_v29 = vsel %vm1137_vm3, %v5035_v25, 0.0 }
 0xd9a   : > { %5046 = vpow2.f32 %v2191_v17  ;;  %2202 = vadd.xlane.f32.xlu0 %v2201_v29  ;;  %v6425_v17 = vld [vmem:[%s6786_s27 + $0x18] sm:$0xff] }
 0xd9b   : > { %v5037_v32 = vpop.eup %5036 }
 0xd9c   : > { %v5039_v33 = vpop.eup %5038  ;;  %v2210_v36 = vsel %vm1137_vm3, %v5037_v32, 0.0 }
 0xd9d   : > { %2211 = vadd.xlane.f32.xlu1 %v2210_v36  ;;  %v2207_v37 = vsel %vm1137_vm3, %v5039_v33, 0.0 }
 0xd9e   : > { %2208 = vadd.xlane.f32.xlu0 %v2207_v37 }
 0xd9f   : > { %v5041_v18 = vpop.eup %5040 }
 0xda0   : > { %v5043_v20 = vpop.eup %5042  ;;  %v2216_v40 = vsel %vm1137_vm3, %v5041_v18, 0.0 }
 0xda1   : > { %2217 = vadd.xlane.f32.xlu1 %v2216_v40  ;;  %v2213_v21 = vsel %vm1137_vm3, %v5043_v20, 0.0 }
 0xda2   : > { %2214 = vadd.xlane.f32.xlu0 %v2213_v21  ;;  %v6444_v21 = vld [vmem:[%s6786_s27 + $0x20] sm:$0xff] }
 0xda3   : > { %v5045_v12 = vpop.eup %5044 }
 0xda4   : > { %v5047_v22 = vpop.eup %5046  ;;  %v2222_v23 = vsel %vm1137_vm3, %v5045_v12, 0.0 }
 0xda5   : > { %2223 = vadd.xlane.f32.xlu1 %v2222_v23  ;;  %v2219_v14 = vsel %vm1137_vm3, %v5047_v22, 0.0 }
 0xda6   : > { %2220 = vadd.xlane.f32.xlu0 %v2219_v14  ;;  %v6451_v14 = vld [vmem:[%s6786_s27 + $0x38] sm:$0xff] }
 0xe22   : > { %v2200_v26 = vpop.xlane.xlu1 %2199 }
 0xe23   : > { %5048 = vrcp.f32 %v2200_v26  ;;  %v2197_v27 = vpop.xlane.xlu0 %2196 }
 0xe24   : > { %5050 = vrcp.f32 %v2197_v27 }
 0xe26   : > { %v2206_v30 = vpop.xlane.xlu1 %2205 }
 0xe27   : > { %5052 = vrcp.f32 %v2206_v30  ;;  %v2203_v34 = vpop.xlane.xlu0 %2202  ;;  %v6457_v30 = vld [vmem:[%s6786_s27 + $0x30] sm:$0xff] }
 0xe28   : > { %5054 = vrcp.f32 %v2203_v34 }
 0xe2a   : > { %v2212_v38 = vpop.xlane.xlu1 %2211 }
 0xe2b   : > { %5056 = vrcp.f32 %v2212_v38  ;;  %v2209_v39 = vpop.xlane.xlu0 %2208 }
 0xe2c   : > { %5058 = vrcp.f32 %v2209_v39 }
 0xe2d   : > { %v5049_v41 = vpop.eup %5048 }
 0xe2e   : > { %v5051_v35 = vpop.eup %5050  ;;  %v2218_v42 = vpop.xlane.xlu1 %2217  ;;  %v2236_v46 = vmul.f32 %v5049_v41, %v5029_v0  ;;  %v6464_v41 = vld [vmem:[%s6786_s27 + $0x48] sm:$0xff] }
 0xe2f   : > { %5060 = vrcp.f32 %v2218_v42  ;;  %v2215_v43 = vpop.xlane.xlu0 %2214  ;;  %v2235_v45 = vmul.f32 %v5051_v35, %v5031_v3  ;;  %v2472_v3 = vld [vmem:[#allocation7 + $0x20] sm:$0xff] }
 0xe30   : > { %5062 = vrcp.f32 %v2215_v43  ;;  %v4765_v4 = vpack.c.bf16 %v2472_v3, %v2471_v2  ;;  %v6470_v43 = vld [vmem:[%s6786_s27 + $0x40] sm:$0xff] }
 0xe31   : > { %v5053_v47 = vpop.eup %5052  ;;  %4537 = vmatprep.mubr.msk.f32.mxu1 %vm1137_vm3, %v2235_v45 }
 0xe32   : > { %v5055_v48 = vpop.eup %5054  ;;  %v2224_v49 = vpop.xlane.xlu1 %2223  ;;  %4538 = vmatmul.mubr.msk.f32.vlgmr.msra.gmra.mrb[18].mxu1 %vm1137_vm3, %v2236_v46  ;;  %v2238_v52 = vmul.f32 %v5053_v47, %v5033_v24 }
 0xe33   : > { %5064 = vrcp.f32 %v2224_v49  ;;  %v2221_v50 = vpop.xlane.xlu0 %2220  ;;  %v2237_v51 = vmul.f32 %v5055_v48, %v5035_v25  ;;  %4766 = vmatpush3.bf16.msra.mxu1 %v4765_v4  ;;  %v4181_v49 = vld [vmem:[#allocation8 + $0x1] ss:$0 sm:$0xff] }
 0xe34   : > { %5066 = vrcp.f32 %v2221_v50  ;;  %4579 = vmatprep.subr.mxu1 %v5572_v1 }
 0xe35   : > { %v5057_v53 = vpop.eup %5056  ;;  %4540 = vmatprep.mubr.msk.f32.mxu1 %vm1137_vm3, %v2237_v51 }
 0xe36   : > { %v5059_v10 = vpop.eup %5058  ;;  %4541 = vmatmul.mubr.msk.f32.gmra.mrb[20].mxu1 %vm1137_vm3, %v2238_v52  ;;  %v2240_v55 = vmul.f32 %v5057_v53, %v5037_v32  ;;  %v6431_v32 = vld [vmem:[%s6786_s27 + $0x10] sm:$0xff] }
 0xe37   : > { %v2239_v54 = vmul.f32 %v5059_v10, %v5039_v33  ;;  %4580 = vmatpush3.msk.msra.mxu1 %vm828_vm0, %v2473_v5 }
 0xe38   : > { %4770 = vmatprep.subr.bf16.mxu1 %v5573_v44 }
 0xe39   : > { %v5061_v56 = vpop.eup %5060  ;;  %4543 = vmatprep.mubr.msk.f32.mxu1 %vm1137_vm3, %v2239_v54 }
 0xe3a   : > { %v5063_v58 = vpop.eup %5062  ;;  %4544 = vmatmul.mubr.msk.f32.gmra.mrb[22].mxu1 %vm1137_vm3, %v2240_v55  ;;  %v2242_v60 = vmul.f32 %v5061_v56, %v5041_v18  ;;  %v6438_v18 = vld [vmem:[%s6786_s27 + $0x28] sm:$0xff] }
 0xe3b   : > { %v2241_v59 = vmul.f32 %v5063_v58, %v5043_v20 }
 0xe3d   : > { %v5065_v61 = vpop.eup %5064  ;;  %4546 = vmatprep.mubr.msk.f32.mxu1 %vm1137_vm3, %v2241_v59  ;;  %v4186_v59 = vld [vmem:[%s6787_s29 + $0x18] sm:$0xff] }
 0xe3e   : > { %v5067_v62 = vpop.eup %5066  ;;  %4547 = vmatmul.mubr.msk.f32.gmra.mrb[24].mxu1 %vm1137_vm3, %v2242_v60  ;;  %v2244_v0 = vmul.f32 %v5065_v61, %v5045_v12  ;;  %v4187_v60 = vld [vmem:[%s6787_s29 + $0x20] sm:$0xff] }
 0xe3f   : > { %v2243_v63 = vmul.f32 %v5067_v62, %v5047_v22  ;;  %v4768_v61 = vpack.c.bf16 %v4187_v60, %v4186_v59  ;;  %v4192_v62 = vld [vmem:[%s6788_s17 + $0x20] sm:$0xff] }
 0xe41   : > { %4549 = vmatprep.mubr.msk.f32.mxu1 %vm1137_vm3, %v2243_v63  ;;  %v4193_v63 = vld [vmem:[%s6788_s17 + $0x28] sm:$0xff] }
 0xe42   : > { %4550 = vmatmul.mubr.msk.f32.gmra.mrb[26].mxu1 %vm1137_vm3, %v2244_v0  ;;  %v4771_v0 = vpack.c.bf16 %v4193_v63, %v4192_v62  ;;  %v4199_v62 = vld [vmem:[#allocation14 + $0x1] ss:$0 sm:$0xff] }
 0xe43   : > { %4581 = vmatprep.mubr.msk.f32.mxu1 %vm5574_vm2, %v5572_v1 }
 0xf05   : > { %v4539_v6 = vpop.f32.mrb[18].mxu1 }
 0xf06   : > { %v2391_v9 = vmul.f32 %v6413_v8, %v4539_v6  ;;  %v2341_v19 = vpop.f32.mrb[19].mxu1  ;;  %v4184_v6 = vld [vmem:[#allocation10 + $0x1] ss:$0 sm:$0xff] }
 0xf07   : > { %v2390_v24 = vmul.f32 %v6419_v11, %v2341_v19  ;;  %v4185_v19 = vld [vmem:[#allocation11 + $0x1] ss:$0 sm:$0xff] }
 0xf09   : > { %v4750_v16 = vpack.c.bf16 %v2391_v9, %v2390_v24  ;;  %v4542_v25 = vpop.f32.mrb[20].mxu1 }
 0xf0a   : > { %v2393_v28 = vmul.f32 %v6425_v17, %v4542_v25  ;;  %v2351_v29 = vpop.f32.mrb[21].mxu1  ;;  %v4194_v25 = vld [vmem:[%s6788_s17 + $0x30] sm:$0xff] }
 0xf0b   : > { %v2392_v33 = vmul.f32 %v6431_v32, %v2351_v29  ;;  %4751 = vmatpush3.bf16.msra.mxu0 %v4750_v16 }
 0xf0c   : > { %4752 = vmatprep.subr.bf16.mxu0 %v5573_v44 }
 0xf0d   : > { %v4753_v36 = vpack.c.bf16 %v2393_v28, %v2392_v33  ;;  %v4545_v37 = vpop.f32.mrb[22].mxu1  ;;  %v4195_v28 = vld [vmem:[%s6788_s17 + $0x38] sm:$0xff] }
 0xf0e   : > { %v2395_v20 = vmul.f32 %v6438_v18, %v4545_v37  ;;  %v2361_v40 = vpop.f32.mrb[23].mxu1  ;;  %v4774_v29 = vpack.c.bf16 %v4195_v28, %v4194_v25  ;;  %v4189_v33 = vld [vmem:[#allocation16 + $0x1] ss:$0 sm:$0xff] }
 0xf0f   : > { %v2394_v12 = vmul.f32 %v6444_v21, %v2361_v40  ;;  %4754 = vmatpush3.bf16.msra.mxu0 %v4753_v36 }
 0xf10   : > { %4755 = vmatprep.subr.bf16.mxu0 %v5573_v44 }
 0xf11   : > { %v4756_v22 = vpack.c.bf16 %v2395_v20, %v2394_v12  ;;  %v4548_v23 = vpop.f32.mrb[24].mxu1  ;;  %v4196_v12 = vld [vmem:[#allocation17 + $0x1] ss:$0 sm:$0xff] }
 0xf12   : > { %v2397_v26 = vmul.f32 %v6451_v14, %v4548_v23  ;;  %v2371_v27 = vpop.f32.mrb[25].mxu1 }
 0xf13   : > { %v2396_v34 = vmul.f32 %v6457_v30, %v2371_v27  ;;  %4757 = vmatpush3.bf16.msra.mxu0 %v4756_v22 }
 0xf14   : > { %4758 = vmatprep.subr.bf16.mxu0 %v5573_v44 }
 0xf15   : > { %v4759_v38 = vpack.c.bf16 %v2397_v26, %v2396_v34  ;;  %v4551_v39 = vpop.f32.mrb[26].mxu1 }
 0xf16   : > { %v2399_v35 = vmul.f32 %v6464_v41, %v4551_v39  ;;  %v2381_v42 = vpop.f32.mrb[27].mxu1 }
 0xf17   : > { %v2398_v45 = vmul.f32 %v6470_v43, %v2381_v42  ;;  %4760 = vmatpush3.bf16.msra.mxu0 %v4759_v38 }
 0xf18   : > { %4761 = vmatprep.subr.bf16.mxu0 %v5573_v44 }
 0xf19   : > { %v4762_v46 = vpack.c.bf16 %v2399_v35, %v2398_v45 }
 0xf1b   : > { %4763 = vmatpush3.bf16.msra.mxu0 %v4762_v46  ;;  %v4201_v46 = vld [vmem:[%s6785_s24 + $0x98] sm:$0xff] }
 0xf1c   : > { %4767 = vmatprep.subr.bf16.mxu0 %v5573_v44 }
 0xf1e   : > { %4573 = vmatmul.mubr.msk.f32.vlgmr.msra.gmra.mrb[28].mxu0 %vm1403_vm4, %v6264_v31 }
 0xf1f   : > { %4590 = vmatprep.mubr.msk.f32.mxu0 %vm5574_vm2, %v5572_v1  ;;  %4769 = vmatpush3.bf16.msra.mxu0 %v4768_v61  ;;  %v4198_v61 = vld [vmem:[#allocation13 + $0x1] ss:$0 sm:$0xff] }
 0xf20   : > { %4588 = vmatprep.subr.mxu0 %v5572_v1 }
 0xff1   : > { %v2466_v47 = vpop.f32.mrb[28].mxu0 }
 0xff2   : > { %v4574_v48 = vpop.f32.mrb[29].mxu0  ;;  %4582 = vmatmul.mubr.msk.f32.vlgmr.msra.gmra.mrb[28].mxu1 %vm824_vm1, %v2466_v47  ;;  %v4204_v47 = vld [vmem:[%s6785_s24 + $0xb0] sm:$0xff] }
 0xff3   : > { %4601 = vmatprep.mubr.msk.f32.mxu1 %vm5574_vm2, %v5572_v1  ;;  %4772 = vmatpush3.bf16.msra.mxu1 %v4771_v0  ;;  %v4776_v48 = vpack.c.bf16 %v4204_v47, %v4201_v46 }
 0xff4   : > { %4773 = vmatprep.subr.bf16.mxu1 %v5573_v44 }
 0xff7   : > { %4775 = vmatpush3.bf16.msra.mxu1 %v4774_v29 }
 0xff8   : > { %4780 = vmatprep.subr.bf16.mxu1 %v5573_v44 }
0x10c5   : > { %v2554_v50 = vpop.f32.mrb[28].mxu1 }
0x10c6   : > { %v2555_v51 = vadd.f32 %v4181_v49, %v2554_v50  ;;  %v4583_v52 = vpop.f32.mrb[29].mxu1  ;;  %v4200_v49 = vld [vmem:[%s6785_s24 + $0x90] sm:$0xff]  ;;  %v4203_v50 = vld [vmem:[%s6785_s24 + $0xa8] sm:$0xff] }
0x10c7   : > { %v4778_v52 = vpack.c.bf16 %v4203_v50, %v4200_v49 }
0x10c8   : > { %v2558_v53 = vadd.f32 %v2555_v51, %v6340_v57  ;;  %v4188_v57 = vld [vmem:[%s6787_s29 + $0x28] sm:$0xf]  ;;  %v4202_v51 = vld [vmem:[%s6785_s24 + $0xa0] sm:$0xff] }
0x10c9   : > { %4589 = vmatpush3.msk.msra.mxu0 %vm828_vm0, %v4188_v57 }
0x10ca   : > { %v2563_v10 = vsel %vm824_vm1, %v2558_v53, 0.0  ;;  %4777 = vmatprep.subr.bf16.mxu0 %v4776_v48 }
0x10cb   : > { %2564 = vadd.xlane.f32.xlu0 %v2563_v10  ;;  %v4207_v10 = vld [vmem:[%s6785_s24 + $0xc8] sm:$0xf] }
0x1158   : > { %v2565_v31 = vpop.xlane.xlu0 %2564 }
0x1159   : > { %v2566_v54 = vmul.f32 0.05, %v2565_v31 }
0x115b   : > { %v2567_v55 = vsub.f32 %v2558_v53, %v2566_v54  ;;  %v4205_v53 = vld [vmem:[%s6785_s24 + $0xb8] sm:$0xff]  ;;  %v4206_v54 = vld [vmem:[%s6785_s24 + $0xc0] sm:$0xf] }
0x115c   : > { %v4781_v31 = vpack.c.bf16 %v4205_v53, %v4202_v51 }
0x115d   : > { %v2568_v56 = vmul.f32 %v2567_v55, %v2567_v55 }
0x115f   : > { %v2569_v58 = vsel %vm824_vm1, %v2568_v56, 0.0 }
0x1160   : > { %2570 = vadd.xlane.f32.xlu1 %v2569_v58 }
0x11ed   : > { %v2571_v2 = vpop.xlane.xlu1 %2570 }
0x11ee   : > { %v2572_v3 = vmul.f32 0.05, %v2571_v2  ;;  %v2808_v2 = vld [vmem:[#allocation5 + $0x6] sm:$0x7] }
0x11f0   : > { %v2573_v4 = vadd.f32 1e-05, %v2572_v3  ;;  %v2813_v3 = vrot.slane %v2808_v2, %v6099_v13 }
0x11f2   : > { %5068 = vrsqrt.f32 %v2573_v4  ;;  %v2821_v4 = vrot.slane %v2808_v2, %v6228_v7 }
0x11fc   : > { %v5069_v5 = vpop.eup %5068 }
0x11fd   : > { %v2575_v9 = vmul.f32 %v5069_v5, %v2567_v55  ;;  %v4208_v55 = vld [vmem:[%s6785_s24 + $0xd0] sm:$0xf]  ;;  %v2817_v5 = vrot.slane %v2808_v2, %v6104_v15 }
0x11ff   : > { %v2582_v24 = vmul.f32 %v4184_v6, %v2575_v9 }
0x1201   : > { %v2589_v16 = vadd.f32 %v4185_v19, %v2582_v24 }
0x1203   : > { %4591 = vmatmul.mubr.msk.f32.vlgmr.msra.gmra.mrb[30].mxu0 %vm824_vm1, %v2589_v16 }
0x1204   : > { %2901 = vmatprep.mubr.f32.mxu0 %v5572_v1  ;;  %4779 = vmatpush1.bf16.msra.mxu0 %v4778_v52 }
0x1205   : > { %4209 = vmatprep.subr.msk.mxu0 %vm828_vm0, %v4207_v10 }
0x1208   : > { %4210 = vmatpush1.msk.msra.mxu0 %vm828_vm0, %v4206_v54 }
0x12d6   : > { %v2674_v36 = vpop.f32.mrb[30].mxu0 }
0x12d7   : > { %v2675_v37 = vadd.f32 %v4189_v33, %v2674_v36  ;;  %v4592_v20 = vpop.f32.mrb[31].mxu0 }
0x12d9   : > { %v2678_v40 = vmax.f32 %v2675_v37, 0.0 }
0x12db   : > { %4602 = vmatmul.mubr.msk.f32.vlgmr.msra.gmra.mrb[30].mxu1 %vm1692_vm5, %v2678_v40 }
0x12dc   : > { %4610 = vmatprep.mubr.msk.f32.mxu1 %vm5574_vm2, %v5572_v1  ;;  %4782 = vmatpush3.bf16.msra.mxu1 %v4781_v31 }
0x12dd   : > { %4608 = vmatprep.subr.mxu1 %v5572_v1 }
0x12e0   : > { %4609 = vmatpush3.msk.msra.mxu1 %vm828_vm0, %v4208_v55 }
0x13ae   : > { %v2761_v22 = vpop.f32.mrb[30].mxu1 }
0x13af   : > { %v2762_v23 = vadd.f32 %v4196_v12, %v2761_v22  ;;  %v4603_v26 = vpop.f32.mrb[31].mxu1 }
0x13b1   : > { %v2765_v27 = vadd.f32 %v2762_v23, %v2589_v16 }
0x13b3   : > { %v2770_v34 = vsel %vm824_vm1, %v2765_v27, 0.0 }
0x13b4   : > { %2771 = vadd.xlane.f32.xlu0 %v2770_v34 }
0x1441   : > { %v2772_v38 = vpop.xlane.xlu0 %2771 }
0x1442   : > { %v2773_v39 = vmul.f32 0.05, %v2772_v38 }
0x1444   : > { %v2774_v35 = vsub.f32 %v2765_v27, %v2773_v39 }
0x1446   : > { %v2775_v42 = vmul.f32 %v2774_v35, %v2774_v35 }
0x1448   : > { %v2776_v45 = vsel %vm824_vm1, %v2775_v42, 0.0 }
0x1449   : > { %2777 = vadd.xlane.f32.xlu1 %v2776_v45 }
0x14d6   : > { %v2778_v56 = vpop.xlane.xlu1 %2777 }
0x14d7   : > { %v2779_v58 = vmul.f32 0.05, %v2778_v56 }
0x14d9   : > { %v2780_v59 = vadd.f32 1e-05, %v2779_v58 }
0x14db   : > { %5070 = vrsqrt.f32 %v2780_v59 }
0x14e5   : > { %v5071_v60 = vpop.eup %5070 }
0x14e6   : > { %v2782_v57 = vmul.f32 %v5071_v60, %v2774_v35 }
0x14e8   : > { %v2789_v63 = vmul.f32 %v4198_v61, %v2782_v57 }
0x14ea   : > { %v6548_v0 = vadd.f32 %v4199_v62, %v2789_v63 }
0x14ec   : > { %4211 = vmatmul.mubr.msk.f32.vlgmr.msra.gmra.mrb[32].mxu0 %vm824_vm1, %v6548_v0  ;;  %4611 = vmatmul.mubr.msk.f32.vlgmr.msra.gmra.mrb[32].mxu1 %vm824_vm1, %v6548_v0 }
0x15bf   : > { %v2903_v6 = vpop.f32.mrb[32].mxu0  ;;  %v2974_v9 = vpop.f32.mrb[32].mxu1 }
0x15c0   : > { %v2904_v19 = vadd.f32 %v2903_v6, %v2813_v3  ;;  %v2975_v24 = vadd.f32 %v2974_v9, %v2821_v4  ;;  %v2905_v16 = vpop.f32.mrb[33].mxu0  ;;  %v4612_v25 = vpop.f32.mrb[33].mxu1 }
0x15c1   : > { %v2906_v28 = vadd.f32 %v2905_v16, %v2817_v5 }
0x15c2   : > { %4630 = vmatprep.subr.mxu1 %v2975_v24  ;;  %v2978_v29 = vmul.f32 %v6419_v11, %v2904_v19  ;;  %v2979_v13 = vmul.f32 %v6413_v8, %v2904_v19  ;;  %v2980_v15 = vmul.f32 %v6431_v32, %v2904_v19  ;;  %v2981_v7 = vmul.f32 %v6425_v17, %v2904_v19 }
0x15c3   : > { %4613 = vmatprep.subr.msk.mxu0 %vm824_vm1, %v2906_v28  ;;  %4631 = vmatpush3.msra.mxu1 %v2975_v24  ;;  %v2982_v33 = vmul.f32 %v6444_v21, %v2904_v19  ;;  %v2983_v36 = vmul.f32 %v6438_v18, %v2904_v19  ;;  %v2984_v37 = vmul.f32 %v6457_v30, %v2904_v19 }
0x15c4   : > { %4614 = vmatpush3.xpose.msk.msra.mxu0 %vm824_vm1, %v2906_v28  ;;  %4615 = vmatprep.mubr.msk.f32.mxu0 %vm824_vm1, %v2978_v29  ;;  %v2985_v20 = vmul.f32 %v6451_v14, %v2904_v19  ;;  %v2986_v40 = vmul.f32 %v6470_v43, %v2904_v19  ;;  %v2987_v12 = vmul.f32 %v6464_v41, %v2904_v19 }
0x15c5   : > { %4783 = vmatprep.subr.bf16.mxu0 %v5573_v44  ;;  %4798 = vmatprep.subr.bf16.mxu1 %v5573_v44 }
0x15c7   : > { %4616 = vmatmul.mubr.msk.f32.vlgmr.msra.gmra.mrb[34].mxu0 %vm824_vm1, %v2979_v13 }
0x15c8   : > { %4618 = vmatprep.mubr.msk.f32.mxu0 %vm824_vm1, %v2980_v15 }
0x15cb   : > { %4619 = vmatmul.mubr.msk.f32.gmra.mrb[36].mxu0 %vm824_vm1, %v2981_v7 }
0x15cc   : > { %4621 = vmatprep.mubr.msk.f32.mxu0 %vm824_vm1, %v2982_v33 }
0x15cf   : > { %4622 = vmatmul.mubr.msk.f32.gmra.mrb[38].mxu0 %vm824_vm1, %v2983_v36 }
0x15d0   : > { %4624 = vmatprep.mubr.msk.f32.mxu0 %vm824_vm1, %v2984_v37 }
0x15d3   : > { %4625 = vmatmul.mubr.msk.f32.gmra.mrb[40].mxu0 %vm824_vm1, %v2985_v20 }
0x15d4   : > { %4627 = vmatprep.mubr.msk.f32.mxu0 %vm824_vm1, %v2986_v40 }
0x15d7   : > { %4628 = vmatmul.mubr.msk.f32.gmra.mrb[42].mxu0 %vm824_vm1, %v2987_v12 }
0x15d8   : > { %4667 = vmatprep.mubr.msk.f32.mxu0 %vm5574_vm2, %v5572_v1 }
0x169a   : > { %v4617_v22 = vpop.f32.mrb[34].mxu0 }
0x169b   : > { %v3087_v23 = vpop.f32.mrb[35].mxu0  ;;  %v3139_v26 = vsel %vm1137_vm3, %v4617_v22, -inf }
0x169c   : > { %3140 = vmax.xlane.f32.xlu1 %v3139_v26  ;;  %v3136_v27 = vsel %vm1137_vm3, %v3087_v23, -inf }
0x169d   : > { %3137 = vmax.xlane.f32.xlu0 %v3136_v27 }
0x169e   : > { %v4620_v34 = vpop.f32.mrb[36].mxu0 }
0x169f   : > { %v3097_v38 = vpop.f32.mrb[37].mxu0  ;;  %v3145_v39 = vsel %vm1137_vm3, %v4620_v34, -inf }
0x16a0   : > { %3146 = vmax.xlane.f32.xlu1 %v3145_v39  ;;  %v3142_v35 = vsel %vm1137_vm3, %v3097_v38, -inf }
0x16a1   : > { %3143 = vmax.xlane.f32.xlu0 %v3142_v35 }
0x16a2   : > { %v4623_v42 = vpop.f32.mrb[38].mxu0 }
0x16a3   : > { %v3107_v45 = vpop.f32.mrb[39].mxu0  ;;  %v3151_v46 = vsel %vm1137_vm3, %v4623_v42, -inf }
0x16a4   : > { %3152 = vmax.xlane.f32.xlu1 %v3151_v46  ;;  %v3148_v47 = vsel %vm1137_vm3, %v3107_v45, -inf }
0x16a5   : > { %3149 = vmax.xlane.f32.xlu0 %v3148_v47 }
0x16a6   : > { %v4626_v48 = vpop.f32.mrb[40].mxu0 }
0x16a7   : > { %v3117_v49 = vpop.f32.mrb[41].mxu0  ;;  %v3157_v50 = vsel %vm1137_vm3, %v4626_v48, -inf }
0x16a8   : > { %3158 = vmax.xlane.f32.xlu1 %v3157_v50  ;;  %v3154_v51 = vsel %vm1137_vm3, %v3117_v49, -inf }
0x16a9   : > { %3155 = vmax.xlane.f32.xlu0 %v3154_v51 }
0x16aa   : > { %v4629_v52 = vpop.f32.mrb[42].mxu0 }
0x16ab   : > { %v3127_v53 = vpop.f32.mrb[43].mxu0  ;;  %v3163_v10 = vsel %vm1137_vm3, %v4629_v52, -inf }
0x16ac   : > { %3164 = vmax.xlane.f32.xlu1 %v3163_v10  ;;  %v3160_v31 = vsel %vm1137_vm3, %v3127_v53, -inf }
0x16ad   : > { %3161 = vmax.xlane.f32.xlu0 %v3160_v31 }
0x1729   : > { %v3141_v54 = vpop.xlane.xlu1 %3140 }
0x172a   : > { %v3167_v55 = vsub.f32 %v4617_v22, %v3141_v54  ;;  %v3138_v56 = vpop.xlane.xlu0 %3137 }
0x172b   : > { %v3166_v58 = vsub.f32 %v3087_v23, %v3138_v56 }
0x172c   : > { %v3178_v59 = vmul.f32 1.442695, %v3167_v55 }
0x172d   : > { %v3176_v60 = vmul.f32 1.442695, %v3166_v58  ;;  %v3147_v61 = vpop.xlane.xlu1 %3146 }
0x172e   : > { %5072 = vpow2.f32 %v3178_v59  ;;  %v3169_v57 = vsub.f32 %v4620_v34, %v3147_v61  ;;  %v3144_v62 = vpop.xlane.xlu0 %3143 }
0x172f   : > { %5074 = vpow2.f32 %v3176_v60  ;;  %v3168_v63 = vsub.f32 %v3097_v38, %v3144_v62 }
0x1730   : > { %v3182_v2 = vmul.f32 1.442695, %v3169_v57 }
0x1731   : > { %v3180_v3 = vmul.f32 1.442695, %v3168_v63  ;;  %v3153_v4 = vpop.xlane.xlu1 %3152 }
0x1732   : > { %5076 = vpow2.f32 %v3182_v2  ;;  %v3171_v5 = vsub.f32 %v4623_v42, %v3153_v4  ;;  %v3150_v6 = vpop.xlane.xlu0 %3149 }
0x1733   : > { %5078 = vpow2.f32 %v3180_v3  ;;  %v3170_v9 = vsub.f32 %v3107_v45, %v3150_v6 }
0x1734   : > { %v3186_v19 = vmul.f32 1.442695, %v3171_v5 }
0x1735   : > { %v3184_v24 = vmul.f32 1.442695, %v3170_v9  ;;  %v3159_v16 = vpop.xlane.xlu1 %3158 }
0x1736   : > { %5080 = vpow2.f32 %v3186_v19  ;;  %v3173_v25 = vsub.f32 %v4626_v48, %v3159_v16  ;;  %v3156_v28 = vpop.xlane.xlu0 %3155 }
0x1737   : > { %5082 = vpow2.f32 %v3184_v24  ;;  %v3172_v29 = vsub.f32 %v3117_v49, %v3156_v28 }
0x1738   : > { %v5073_v13 = vpop.eup %5072  ;;  %v3190_v15 = vmul.f32 1.442695, %v3173_v25 }
0x1739   : > { %v5075_v7 = vpop.eup %5074  ;;  %v3188_v33 = vmul.f32 1.442695, %v3172_v29  ;;  %v3165_v36 = vpop.xlane.xlu1 %3164  ;;  %v3199_v37 = vsel %vm1137_vm3, %v5073_v13, 0.0 }
0x173a   : > { %5084 = vpow2.f32 %v3190_v15  ;;  %v3175_v20 = vsub.f32 %v4629_v52, %v3165_v36  ;;  %3200 = vadd.xlane.f32.xlu1 %v3199_v37  ;;  %v3162_v40 = vpop.xlane.xlu0 %3161  ;;  %v3196_v12 = vsel %vm1137_vm3, %v5075_v7, 0.0 }
0x173b   : > { %5086 = vpow2.f32 %v3188_v33  ;;  %v3174_v22 = vsub.f32 %v3127_v53, %v3162_v40  ;;  %3197 = vadd.xlane.f32.xlu0 %v3196_v12  ;;  %v3472_v40 = vld [vmem:[#allocation7 + $0x30] sm:$0xff]  ;;  %v3473_v12 = vld [vmem:[#allocation7 + $0x38] sm:$0xff] }
0x173c   : > { %v5077_v23 = vpop.eup %5076  ;;  %v3194_v26 = vmul.f32 1.442695, %v3175_v20 }
0x173d   : > { %v5079_v27 = vpop.eup %5078  ;;  %v3192_v34 = vmul.f32 1.442695, %v3174_v22  ;;  %v3205_v38 = vsel %vm1137_vm3, %v5077_v23, 0.0  ;;  %v4799_v22 = vpack.c.bf16 %v3473_v12, %v3472_v40 }
0x173e   : > { %5088 = vpow2.f32 %v3194_v26  ;;  %3206 = vadd.xlane.f32.xlu1 %v3205_v38  ;;  %v3202_v39 = vsel %vm1137_vm3, %v5079_v27, 0.0 }
0x173f   : > { %5090 = vpow2.f32 %v3192_v34  ;;  %3203 = vadd.xlane.f32.xlu0 %v3202_v39 }
0x1740   : > { %v5081_v35 = vpop.eup %5080 }
0x1741   : > { %v5083_v42 = vpop.eup %5082  ;;  %v3211_v45 = vsel %vm1137_vm3, %v5081_v35, 0.0 }
0x1742   : > { %3212 = vadd.xlane.f32.xlu1 %v3211_v45  ;;  %v3208_v46 = vsel %vm1137_vm3, %v5083_v42, 0.0 }
0x1743   : > { %3209 = vadd.xlane.f32.xlu0 %v3208_v46 }
0x1744   : > { %v5085_v47 = vpop.eup %5084 }
0x1745   : > { %v5087_v48 = vpop.eup %5086  ;;  %v3217_v49 = vsel %vm1137_vm3, %v5085_v47, 0.0 }
0x1746   : > { %3218 = vadd.xlane.f32.xlu1 %v3217_v49  ;;  %v3214_v50 = vsel %vm1137_vm3, %v5087_v48, 0.0 }
0x1747   : > { %3215 = vadd.xlane.f32.xlu0 %v3214_v50 }
0x1748   : > { %v5089_v51 = vpop.eup %5088 }
0x1749   : > { %v5091_v52 = vpop.eup %5090  ;;  %v3223_v53 = vsel %vm1137_vm3, %v5089_v51, 0.0 }
0x174a   : > { %3224 = vadd.xlane.f32.xlu1 %v3223_v53  ;;  %v3220_v10 = vsel %vm1137_vm3, %v5091_v52, 0.0 }
0x174b   : > { %3221 = vadd.xlane.f32.xlu0 %v3220_v10 }
0x17c7   : > { %v3201_v31 = vpop.xlane.xlu1 %3200 }
0x17c8   : > { %5092 = vrcp.f32 %v3201_v31  ;;  %v3198_v54 = vpop.xlane.xlu0 %3197 }
0x17c9   : > { %5094 = vrcp.f32 %v3198_v54 }
0x17cb   : > { %v3207_v55 = vpop.xlane.xlu1 %3206 }
0x17cc   : > { %5096 = vrcp.f32 %v3207_v55  ;;  %v3204_v56 = vpop.xlane.xlu0 %3203 }
0x17cd   : > { %5098 = vrcp.f32 %v3204_v56 }
0x17cf   : > { %v3213_v58 = vpop.xlane.xlu1 %3212 }
0x17d0   : > { %5100 = vrcp.f32 %v3213_v58  ;;  %v3210_v59 = vpop.xlane.xlu0 %3209 }
0x17d1   : > { %5102 = vrcp.f32 %v3210_v59 }
0x17d2   : > { %v5093_v60 = vpop.eup %5092 }
0x17d3   : > { %v5095_v61 = vpop.eup %5094  ;;  %v3219_v57 = vpop.xlane.xlu1 %3218  ;;  %v3237_v2 = vmul.f32 %v5093_v60, %v5073_v13 }
0x17d4   : > { %5104 = vrcp.f32 %v3219_v57  ;;  %v3216_v62 = vpop.xlane.xlu0 %3215  ;;  %v3236_v63 = vmul.f32 %v5095_v61, %v5075_v7 }
0x17d5   : > { %5106 = vrcp.f32 %v3216_v62 }
0x17d6   : > { %v5097_v3 = vpop.eup %5096  ;;  %4632 = vmatprep.mubr.msk.f32.mxu1 %vm1137_vm3, %v3236_v63 }
0x17d7   : > { %v5099_v4 = vpop.eup %5098  ;;  %v3225_v5 = vpop.xlane.xlu1 %3224  ;;  %4633 = vmatmul.mubr.msk.f32.vlgmr.msra.gmra.mrb[34].mxu1 %vm1137_vm3, %v3237_v2  ;;  %v3239_v19 = vmul.f32 %v5097_v3, %v5077_v23  ;;  %v3474_v23 = vld [vmem:[#allocation7 + $0x40] sm:$0xf]  ;;  %v4241_v3 = vld [vmem:[%s6787_s29 + $0x30] sm:$0xff] }
0x17d8   : > { %5108 = vrcp.f32 %v3225_v5  ;;  %v3222_v6 = vpop.xlane.xlu0 %3221  ;;  %v3238_v9 = vmul.f32 %v5099_v4, %v5079_v27  ;;  %4800 = vmatpush3.bf16.msra.mxu1 %v4799_v22  ;;  %v4242_v4 = vld [vmem:[%s6787_s29 + $0x38] sm:$0xff] }
0x17d9   : > { %5110 = vrcp.f32 %v3222_v6  ;;  %4674 = vmatprep.subr.mxu1 %v5572_v1  ;;  %v4802_v5 = vpack.c.bf16 %v4242_v4, %v4241_v3  ;;  %v4247_v6 = vld [vmem:[%s6788_s17 + $0x40] sm:$0xff] }
0x17da   : > { %v5101_v24 = vpop.eup %5100  ;;  %4635 = vmatprep.mubr.msk.f32.mxu1 %vm1137_vm3, %v3238_v9  ;;  %v4248_v9 = vld [vmem:[%s6788_s17 + $0x48] sm:$0xff] }
0x17db   : > { %v5103_v16 = vpop.eup %5102  ;;  %4636 = vmatmul.mubr.msk.f32.gmra.mrb[36].mxu1 %vm1137_vm3, %v3239_v19  ;;  %v3241_v28 = vmul.f32 %v5101_v24, %v5081_v35  ;;  %v4805_v19 = vpack.c.bf16 %v4248_v9, %v4247_v6 }
0x17dc   : > { %v3240_v25 = vmul.f32 %v5103_v16, %v5083_v42  ;;  %4675 = vmatpush3.msk.msra.mxu1 %vm828_vm0, %v3474_v23 }
0x17dd   : > { %4804 = vmatprep.subr.bf16.mxu1 %v5573_v44 }
0x17de   : > { %v5105_v29 = vpop.eup %5104  ;;  %4638 = vmatprep.mubr.msk.f32.mxu1 %vm1137_vm3, %v3240_v25 }
0x17df   : > { %v5107_v13 = vpop.eup %5106  ;;  %4639 = vmatmul.mubr.msk.f32.gmra.mrb[38].mxu1 %vm1137_vm3, %v3241_v28  ;;  %v3243_v7 = vmul.f32 %v5105_v29, %v5085_v47  ;;  %v4239_v29 = vld [vmem:[#allocation10 + $0x2] ss:$0 sm:$0xff] }
0x17e0   : > { %v3242_v15 = vmul.f32 %v5107_v13, %v5087_v48 }
0x17e2   : > { %v5109_v33 = vpop.eup %5108  ;;  %4641 = vmatprep.mubr.msk.f32.mxu1 %vm1137_vm3, %v3242_v15  ;;  %v4240_v15 = vld [vmem:[#allocation11 + $0x2] ss:$0 sm:$0xff] }
0x17e3   : > { %v5111_v36 = vpop.eup %5110  ;;  %4642 = vmatmul.mubr.msk.f32.gmra.mrb[40].mxu1 %vm1137_vm3, %v3243_v7  ;;  %v3245_v20 = vmul.f32 %v5109_v33, %v5089_v51 }
0x17e4   : > { %v3244_v37 = vmul.f32 %v5111_v36, %v5091_v52  ;;  %v4249_v36 = vld [vmem:[%s6788_s17 + $0x50] sm:$0xff] }
0x17e6   : > { %4644 = vmatprep.mubr.msk.f32.mxu1 %vm1137_vm3, %v3244_v37 }
0x17e7   : > { %4645 = vmatmul.mubr.msk.f32.gmra.mrb[42].mxu1 %vm1137_vm3, %v3245_v20  ;;  %v4244_v20 = vld [vmem:[#allocation16 + $0x2] ss:$0 sm:$0xff] }
0x17e8   : > { %4676 = vmatprep.mubr.msk.f32.mxu1 %vm5574_vm2, %v5572_v1 }
0x18aa   : > { %v4634_v26 = vpop.f32.mrb[34].mxu1 }
0x18ab   : > { %v3392_v27 = vmul.f32 %v6413_v8, %v4634_v26  ;;  %v3342_v34 = vpop.f32.mrb[35].mxu1  ;;  %v4251_v26 = vld [vmem:[#allocation17 + $0x2] ss:$0 sm:$0xff] }
0x18ac   : > { %v3391_v38 = vmul.f32 %v6419_v11, %v3342_v34 }
0x18ae   : > { %v4784_v39 = vpack.c.bf16 %v3392_v27, %v3391_v38  ;;  %v4637_v35 = vpop.f32.mrb[36].mxu1 }
0x18af   : > { %v3394_v42 = vmul.f32 %v6425_v17, %v4637_v35  ;;  %v3352_v45 = vpop.f32.mrb[37].mxu1 }
0x18b0   : > { %v3393_v46 = vmul.f32 %v6431_v32, %v3352_v45  ;;  %4785 = vmatpush3.bf16.msra.mxu0 %v4784_v39 }
0x18b1   : > { %4786 = vmatprep.subr.bf16.mxu0 %v5573_v44 }
0x18b2   : > { %v4787_v47 = vpack.c.bf16 %v3394_v42, %v3393_v46  ;;  %v4640_v48 = vpop.f32.mrb[38].mxu1 }
0x18b3   : > { %v3396_v49 = vmul.f32 %v6438_v18, %v4640_v48  ;;  %v3362_v50 = vpop.f32.mrb[39].mxu1 }
0x18b4   : > { %v3395_v8 = vmul.f32 %v6444_v21, %v3362_v50  ;;  %4788 = vmatpush3.bf16.msra.mxu0 %v4787_v47  ;;  %v3799_v50 = vld [vmem:[%s6789_s9 + $0x8] sm:$0xff] }
0x18b5   : > { %4789 = vmatprep.subr.bf16.mxu0 %v5573_v44 }
0x18b6   : > { %v4790_v11 = vpack.c.bf16 %v3396_v49, %v3395_v8  ;;  %v4643_v51 = vpop.f32.mrb[40].mxu1  ;;  %v3798_v49 = vld [vmem:[%s6789_s9] sm:$0xff] }
0x18b7   : > { %v3398_v17 = vmul.f32 %v6451_v14, %v4643_v51  ;;  %v3372_v52 = vpop.f32.mrb[41].mxu1  ;;  %v5126_v14 = vld [vmem:[#allocation22] sm:$0xff]  ;;  %v4811_v8 = vpack.c.bf16 %v3799_v50, %v3798_v49 }
0x18b8   : > { %v3397_v32 = vmul.f32 %v6457_v30, %v3372_v52  ;;  %4791 = vmatpush3.bf16.msra.mxu0 %v4790_v11  ;;  %v3800_v11 = vld [vmem:[%s6789_s9 + $0x10] sm:$0xf] }
0x18b9   : > { %4792 = vmatprep.subr.bf16.mxu0 %v5573_v44 }
0x18ba   : > { %v4793_v53 = vpack.c.bf16 %v3398_v17, %v3397_v32  ;;  %v4646_v10 = vpop.f32.mrb[42].mxu1 }
0x18bb   : > { %v3400_v18 = vmul.f32 %v6464_v41, %v4646_v10  ;;  %v3382_v31 = vpop.f32.mrb[43].mxu1  ;;  %v4236_v41 = vld [vmem:[#allocation8 + $0x2] ss:$0 sm:$0xff] }
0x18bc   : > { %v3399_v21 = vmul.f32 %v6470_v43, %v3382_v31  ;;  %4794 = vmatpush3.bf16.msra.mxu0 %v4793_v53  ;;  %v4253_v53 = vld [vmem:[#allocation13 + $0x2] ss:$0 sm:$0xff] }
0x18bd   : > { %4795 = vmatprep.subr.bf16.mxu0 %v5573_v44 }
0x18be   : > { %v4796_v54 = vpack.c.bf16 %v3400_v18, %v3399_v21  ;;  %v4254_v18 = vld [vmem:[#allocation14 + $0x2] ss:$0 sm:$0xff] }
0x18c0   : > { %4797 = vmatpush3.bf16.msra.mxu0 %v4796_v54  ;;  %v4255_v54 = vld [vmem:[#allocation19] ss:$0 sm:$0xff] }
0x18c1   : > { %4801 = vmatprep.subr.bf16.mxu0 %v5573_v44 }
0x18c3   : > { %4668 = vmatmul.mubr.msk.f32.vlgmr.msra.gmra.mrb[44].mxu0 %vm1403_vm4, %v5126_v14 }
0x18c4   : > { %4685 = vmatprep.mubr.msk.f32.mxu0 %vm5574_vm2, %v5572_v1  ;;  %4803 = vmatpush3.bf16.msra.mxu0 %v4802_v5 }
0x18c5   : > { %4683 = vmatprep.subr.mxu0 %v5572_v1 }
0x1996   : > { %v3467_v30 = vpop.f32.mrb[44].mxu0 }
0x1997   : > { %v4669_v55 = vpop.f32.mrb[45].mxu0  ;;  %4677 = vmatmul.mubr.msk.f32.vlgmr.msra.gmra.mrb[44].mxu1 %vm824_vm1, %v3467_v30 }
0x1998   : > { %4696 = vmatprep.mubr.msk.f32.mxu1 %vm5574_vm2, %v5572_v1  ;;  %4806 = vmatpush3.bf16.msra.mxu1 %v4805_v19  ;;  %v3885_v55 = vld [vmem:[#allocation20] sm:$0xff] }
0x1999   : > { %4807 = vmatprep.subr.bf16.mxu1 %v5573_v44 }
0x1a6a   : > { %v3555_v43 = vpop.f32.mrb[44].mxu1 }
0x1a6b   : > { %v3556_v56 = vadd.f32 %v4236_v41, %v3555_v43  ;;  %v4678_v58 = vpop.f32.mrb[45].mxu1 }
0x1a6d   : > { %v3559_v59 = vadd.f32 %v3556_v56, %v6548_v0  ;;  %v4243_v0 = vld [vmem:[%s6787_s29 + $0x40] sm:$0xf] }
0x1a6e   : > { %4684 = vmatpush3.msk.msra.mxu0 %vm828_vm0, %v4243_v0 }
0x1a6f   : > { %v3564_v60 = vsel %vm824_vm1, %v3559_v59, 0.0  ;;  %4810 = vmatprep.subr.bf16.mxu0 %v5573_v44  ;;  %v4250_v44 = vld [vmem:[%s6788_s17 + $0x58] sm:$0xff] }
0x1a70   : > { %3565 = vadd.xlane.f32.xlu0 %v3564_v60  ;;  %v4808_v37 = vpack.c.bf16 %v4250_v44, %v4249_v36 }
0x1a72   : > { %4809 = vmatpush3.bf16.msra.mxu1 %v4808_v37 }
0x1afd   : > { %v3566_v61 = vpop.xlane.xlu0 %3565 }
0x1afe   : > { %v3567_v57 = vmul.f32 0.05, %v3566_v61 }
0x1b00   : > { %v3568_v62 = vsub.f32 %v3559_v59, %v3567_v57 }
0x1b02   : > { %v3569_v63 = vmul.f32 %v3568_v62, %v3568_v62 }
0x1b04   : > { %v3570_v2 = vsel %vm824_vm1, %v3569_v63, 0.0 }
0x1b05   : > { %3571 = vadd.xlane.f32.xlu1 %v3570_v2  ;;  %v3898_v2 = vld [vmem:[#allocation2] sm:$0x1] }
0x1b92   : > { %v3572_v24 = vpop.xlane.xlu1 %3571 }
0x1b93   : > { %v3573_v16 = vmul.f32 0.05, %v3572_v24 }
0x1b95   : > { %v3574_v25 = vadd.f32 1e-05, %v3573_v16 }
0x1b97   : > { %5112 = vrsqrt.f32 %v3574_v25 }
0x1ba1   : > { %v5113_v28 = vpop.eup %5112 }
0x1ba2   : > { %v3576_v13 = vmul.f32 %v5113_v28, %v3568_v62 }
0x1ba4   : > { %v3583_v7 = vmul.f32 %v4239_v29, %v3576_v13 }
0x1ba6   : > { %v3590_v33 = vadd.f32 %v4240_v15, %v3583_v7 }
0x1ba8   : > { %4686 = vmatmul.mubr.msk.f32.vlgmr.msra.gmra.mrb[46].mxu0 %vm824_vm1, %v3590_v33 }
0x1ba9   : > { %4705 = vmatprep.mubr.msk.f32.mxu0 %vm5574_vm2, %v5572_v1  ;;  %4812 = vmatpush3.bf16.msra.mxu0 %v4811_v8 }
0x1baa   : > { %4703 = vmatprep.subr.mxu0 %v5572_v1 }
0x1bad   : > { %4704 = vmatpush3.msk.msra.mxu0 %vm828_vm0, %v3800_v11 }
0x1c7b   : > { %v3675_v40 = vpop.f32.mrb[46].mxu0 }
0x1c7c   : > { %v3676_v12 = vadd.f32 %v4244_v20, %v3675_v40  ;;  %v4687_v22 = vpop.f32.mrb[47].mxu0 }
0x1c7e   : > { %v3679_v23 = vmax.f32 %v3676_v12, 0.0 }
0x1c80   : > { %4697 = vmatmul.mubr.msk.f32.vlgmr.msra.gmra.mrb[46].mxu1 %vm1692_vm5, %v3679_v23 }
0x1d53   : > { %v3762_v27 = vpop.f32.mrb[46].mxu1 }
0x1d54   : > { %v3763_v34 = vadd.f32 %v4251_v26, %v3762_v27  ;;  %v4698_v38 = vpop.f32.mrb[47].mxu1 }
0x1d56   : > { %v3766_v39 = vadd.f32 %v3763_v34, %v3590_v33 }
0x1d58   : > { %v3771_v35 = vsel %vm824_vm1, %v3766_v39, 0.0 }
0x1d59   : > { %3772 = vadd.xlane.f32.xlu0 %v3771_v35 }
0x1de6   : > { %v3773_v42 = vpop.xlane.xlu0 %3772 }
0x1de7   : > { %v3774_v45 = vmul.f32 0.05, %v3773_v42 }
0x1de9   : > { %v3775_v46 = vsub.f32 %v3766_v39, %v3774_v45 }
0x1deb   : > { %v3776_v47 = vmul.f32 %v3775_v46, %v3775_v46 }
0x1ded   : > { %v3777_v48 = vsel %vm824_vm1, %v3776_v47, 0.0 }
0x1dee   : > { %3778 = vadd.xlane.f32.xlu1 %v3777_v48 }
0x1e7b   : > { %v3779_v51 = vpop.xlane.xlu1 %3778 }
0x1e7c   : > { %v3780_v17 = vmul.f32 0.05, %v3779_v51 }
0x1e7e   : > { %v3781_v52 = vadd.f32 1e-05, %v3780_v17 }
0x1e80   : > { %5114 = vrsqrt.f32 %v3781_v52 }
0x1e8a   : > { %v5115_v32 = vpop.eup %5114 }
0x1e8b   : > { %v3783_v10 = vmul.f32 %v5115_v32, %v3775_v46 }
0x1e8d   : > { %v3790_v31 = vmul.f32 %v4253_v53, %v3783_v10 }
0x1e8f   : > { %v3797_v21 = vadd.f32 %v4254_v18, %v3790_v31 }
0x1e91   : > { %4706 = vmatmul.mubr.msk.f32.vlgmr.msra.gmra.mrb[48].mxu0 %vm824_vm1, %v3797_v21 }
0x1f64   : > { %v3880_v1 = vpop.f32.mrb[48].mxu0 }
0x1f65   : > { %v3881_v14 = vadd.f32 %v4255_v54, %v3880_v1  ;;  %v4707_v30 = vpop.f32.mrb[49].mxu0 }
0x1f67   : > { %v3884_v41 = vmax.f32 %v3881_v14, 0.0 }
0x1f69   : > { %v3886_v43 = vmul.f32 %v3885_v55, %v3884_v41 }
0x1f6b   : > { %v3887_v56 = vsel %vm824_vm1, %v3886_v43, 0.0 }
0x1f6c   : > { %3888 = vadd.xlane.f32.xlu0 %v3887_v56 }
0x1ff9   : > { %v3889_v58 = vpop.xlane.xlu0 %3888 }
0x1ffa   : > { %v3890_v59 = vrot.slane %v3889_v58, 4 }
0x1ffc   : > { %v3891_v60 = vadd.f32 %v3890_v59, %v3889_v58 }
0x1ffe   : > { %v3892_v61 = vrot.slane %v3891_v60, 2 }
0x2000   : > { %v3893_v57 = vadd.f32 %v3892_v61, %v3891_v60 }
0x2002   : > { %v3894_v62 = vrot.slane %v3893_v57, 1 }
0x2004   : > { %v3895_v63 = vadd.f32 %v3894_v62, %v3893_v57 }
0x2006   : > { %4813 = vpush %v3895_v63 }
0x2037   : > { %s4814_s19 = spop %4813 }
0x2038   : > { %v3897_v3 = vstv %s4814_s19 }
0x2039   : > { %v3899_v4 = vadd.f32 %v3898_v2, %v3897_v3 }
0x203b   : > { %3901 = vst.msk [vmem:[%s785_s20] sm:$0x1] %vm3900_vm6, %v3899_v4 }
0x203c PF: > { %p37_p9 = scmp.ge.s32.totalorder %s5979_s3, 4   ;;  %s6791_s20 = smov %s5543_s21 }
0x203d   : > { %s6792_s21 = smov %s5547_s1  ;;  %s6793_s1 = smov %s5991_s23 }
0x203e   : > { %s6794_s22 = smov %s5979_s3  ;;  %39 = sbr.rel (!%p37_p9) target bundleno = 22 (0x16), region = 208 }
0x2045   :  { %3919 = vsyncpa [#allocation4], 1 }
0x2046   :  { %3921 = vsyncpa [#allocation4 + $0x1], 1 }
0x2047   :  { %3922 = vsyncpa [#allocation6], 1 }
0x2048   :  { %3923 = vsyncpa [#allocation9], 1 }
0x2049   :  { %3924 = vsyncpa [#allocation12], 1 }
0x204a   :  { %3925 = vsyncpa [#allocation15], 1 }
0x204b   :  { %3926 = vsyncpa [#allocation18], 1 }
0x204c   :  { %3927 = vsyncpa [#allocation21], 1 }

</bundles_post_ra>
